<compile_context>
chip_gen: v7x
topology: tpu7x:2x2x1
jax: 0.10.0
libtpu: 0.0.40
codegen_flags: <defaults>
</compile_context>

<pallas_src>
import jax
import jax.numpy as jnp
from jax.experimental import pallas as pl
from jax.experimental.pallas import tpu as pltpu

# ----------------------------------------------------------------------------
# Static LeNet geometry (16*5*5 flatten implies 3x32x32 inputs)
# ----------------------------------------------------------------------------
K = 5                       # conv kernel size
H_IN = 32                   # input spatial size
C_IN, C1, C2 = 3, 6, 16     # channels
W1_OUT = H_IN - K + 1       # 28  (conv1 output width/height)
P1 = W1_OUT // 2            # 14  (pool1 output)
W2_OUT = P1 - K + 1         # 10  (conv2 output)
P2 = W2_OUT // 2            # 5   (pool2 output)
D1, D2, D3 = 120, 84, 10    # linear sizes

L0 = C_IN * H_IN            # 96   input lanes   c*32 + w
L1 = C1 * W1_OUT            # 168  conv1 lanes   c*28 + w   (pool kept "in place")
L2 = C2 * W2_OUT            # 160  conv2 lanes   c*10 + w

R1 = W1_OUT - 1             # 27   rows carried after conv1 (valid pooled rows = even)
R2 = 4 * (P2 - 1) + 1       # 17   rows carried after conv2 (valid pooled rows = 0,4,..,16)


# ----------------------------------------------------------------------------
# Fused kernel: whole network for one image
# ----------------------------------------------------------------------------
def lenet_kernel(x_ref, wt1_ref, b1_ref, sh1_ref,
                 wt2_ref, b2_ref, sh2_ref,
                 wl1_ref, bl1_ref, wl2_ref, bl2_ref, wl3_ref, bl3_ref,
                 o_ref, s1_ref, s2_ref):
    f32 = jnp.float32

    # ---- conv1 + bias + ReLU + 2x2 max-pool ---------------------------------
    # Evaluate the Toeplitz conv at row offsets a and a+1 directly from the
    # input ref (contiguous sublane windows) -> row-pair max without slicing.
    def conv1_at(a):
        acc = jnp.dot(x_ref[0, pl.ds(a, R1), :], wt1_ref[0],
                      preferred_element_type=f32)
        for p in range(1, K):
            acc = acc + jnp.dot(x_ref[0, pl.ds(a + p, R1), :], wt1_ref[p],
                                preferred_element_type=f32)
        return acc

    r1 = jnp.maximum(conv1_at(0), conv1_at(1))                     # (27, 168)
    r1 = jnp.maximum(r1 + b1_ref[...], 0.0)                        # bias + ReLU
    # lane-pair max via a one-lane shift matmul (MXU), pooled values at even lanes
    m1 = jnp.maximum(r1, jnp.dot(r1, sh1_ref[...], preferred_element_type=f32))
    s1_ref[...] = m1                                               # scratch for row windows

    # ---- conv2 + bias + ReLU + 2x2 max-pool ---------------------------------
    # Input rows are "uncompacted" (valid pooled rows at even indices), so the
    # conv window step over kh is 2 rows; row-pair of pool2 is offsets 0 / 2.
    def conv2_at(a):
        acc = jnp.dot(s1_ref[pl.ds(a, R2), :], wt2_ref[0],
                      preferred_element_type=f32)
        for p in range(1, K):
            acc = acc + jnp.dot(s1_ref[pl.ds(2 * p + a, R2), :], wt2_ref[p],
                                preferred_element_type=f32)
        return acc

    r2 = jnp.maximum(conv2_at(0), conv2_at(2))                     # (17, 160)
    r2 = jnp.maximum(r2 + b2_ref[...], 0.0)
    m2 = jnp.maximum(r2, jnp.dot(r2, sh2_ref[...], preferred_element_type=f32))
    s2_ref[...] = m2                                               # valid rows 0,4,...,16

    # ---- linear1 (+ReLU): NCHW flatten + pool2 w-selection folded into wl1 ---
    y = jnp.dot(s2_ref[pl.ds(0, 1), :], wl1_ref[0], preferred_element_type=f32)
    for hp in range(1, P2):
        y = y + jnp.dot(s2_ref[pl.ds(4 * hp, 1), :], wl1_ref[hp],
                        preferred_element_type=f32)
    y = jnp.maximum(y + bl1_ref[...], 0.0)                         # (1, 120)

    # ---- linear2 (+ReLU), linear3 -------------------------------------------
    y = jnp.maximum(jnp.dot(y, wl2_ref[...], preferred_element_type=f32)
                    + bl2_ref[...], 0.0)                           # (1, 84)
    y = jnp.dot(y, wl3_ref[...], preferred_element_type=f32) + bl3_ref[...]

    o_ref[0] = y.astype(o_ref.dtype)                               # (1, 10)


# ----------------------------------------------------------------------------
# One-time weight re-layout (pure JAX, outside the forward pass)
# ----------------------------------------------------------------------------
def _onehot_cols(n_rows, row_of_col):
    """M[r, c] = 1.0 iff r == row_of_col[c]; out-of-range -> zero column."""
    r = jnp.arange(n_rows)[:, None]
    return (r == row_of_col[None, :]).astype(jnp.float32)


def prepare_params(p):
    # conv1 Toeplitz: wt1[p][c*32 + (j+q), o*28 + j] = w1[o, c, p, q]
    sel1 = jnp.stack([_onehot_cols(H_IN, jnp.arange(W1_OUT) + q) for q in range(K)])
    wt1 = jnp.einsum("ocpq,qwj->pcwoj", p["w1"], sel1).reshape(K, L0, L1)

    # conv2 Toeplitz over the UNCOMPACTED pooled-conv1 lane layout:
    # wt2[p][o*28 + 2*(j+q), O*10 + j] = w2[O, o, p, q]   (odd lanes -> zero rows)
    sel2 = jnp.stack([_onehot_cols(W1_OUT, 2 * (jnp.arange(W2_OUT) + q))
                      for q in range(K)])
    wt2 = jnp.einsum("Oopq,quj->pouOj", p["w2"], sel2).reshape(K, L1, L2)

    # one-lane shift matrices for the lane-pair max of each pool
    sh1 = _onehot_cols(L1, jnp.arange(L1) + 1)
    sh2 = _onehot_cols(L2, jnp.arange(L2) + 1)

    # linear1: wl1[u][o2*10 + 2*v, n] = torch_wl1[n, o2*25 + u*5 + v]
    wl1_r = p["wl1"].reshape(D1, C2, P2, P2)                 # (120, c, u, v)
    wl1_t = jnp.transpose(wl1_r, (2, 1, 3, 0))               # (u, c, v, 120)
    expand = _onehot_cols(W2_OUT, 2 * jnp.arange(P2)).T      # (5, 10): [v, m]=1 iff m=2v
    wl1 = jnp.einsum("ucvn,vm->ucmn", wl1_t, expand).reshape(P2, L2, D1)

    return {
        "wt1": wt1,                                           # (5, 96, 168)
        "b1": jnp.repeat(p["b1"], W1_OUT).reshape(1, L1),     # (1, 168)
        "sh1": sh1,                                           # (168, 168)
        "wt2": wt2,                                           # (5, 168, 160)
        "b2": jnp.repeat(p["b2"], W2_OUT).reshape(1, L2),     # (1, 160)
        "sh2": sh2,                                           # (160, 160)
        "wl1": wl1,                                           # (5, 160, 120)
        "bl1": p["bl1"].reshape(1, -1),                       # (1, 120)
        "wl2": p["wl2"].T,                                    # (120, 84)
        "bl2": p["bl2"].reshape(1, -1),                       # (1, 84)
        "wl3": p["wl3"].T,                                    # (84, 10)
        "bl3": p["bl3"].reshape(1, -1),                       # (1, 10)
    }


# ----------------------------------------------------------------------------
# Forward pass: one fused pallas_call, grid over the batch
# ----------------------------------------------------------------------------
@jax.jit
def lenet_forward(x_nchw, pp):
    n = x_nchw.shape[0]
    # NCHW -> (N, H, Cin*W) channel-major folded lanes (single tiny transform)
    x = jnp.transpose(x_nchw, (0, 2, 1, 3)).reshape(n, H_IN, L0)

    def _full(arr):                      # whole array resident on every step
        zeros = (0,) * arr.ndim
        return pl.BlockSpec(arr.shape, lambda i, z=zeros: z)

    weights = (pp["wt1"], pp["b1"], pp["sh1"], pp["wt2"], pp["b2"], pp["sh2"],
               pp["wl1"], pp["bl1"], pp["wl2"], pp["bl2"], pp["wl3"], pp["bl3"])

    out = pl.pallas_call(
        lenet_kernel,
        out_shape=jax.ShapeDtypeStruct((n, 1, D3), jnp.float32),
        grid=(n,),
        in_specs=[pl.BlockSpec((1, H_IN, L0), lambda i: (i, 0, 0))]
                 + [_full(w) for w in weights],
        out_specs=pl.BlockSpec((1, 1, D3), lambda i: (i, 0, 0)),
        scratch_shapes=[pltpu.VMEM((R1, L1), jnp.float32),
                        pltpu.VMEM((R2, L2), jnp.float32)],
        compiler_params=pltpu.CompilerParams(
            dimension_semantics=("parallel",)),
    )(x, *weights)
    return out.reshape(n, D3)


# ----------------------------------------------------------------------------
# Torch-style parameters and a plain-JAX reference (correctness check)
# ----------------------------------------------------------------------------
def init_params(key):
    def u(k, shape, fan_in):
        bound = 1.0 / float(fan_in) ** 0.5
        return jax.random.uniform(k, shape, jnp.float32, -bound, bound)

    ks = jax.random.split(key, 10)
    return {
        "w1": u(ks[0], (C1, C_IN, K, K), C_IN * K * K),   # OIHW (torch layout)
        "b1": u(ks[1], (C1,), C_IN * K * K),
        "w2": u(ks[2], (C2, C1, K, K), C1 * K * K),
        "b2": u(ks[3], (C2,), C1 * K * K),
        "wl1": u(ks[4], (D1, C2 * P2 * P2), C2 * P2 * P2),  # (out, in) torch layout
        "bl1": u(ks[5], (D1,), C2 * P2 * P2),
        "wl2": u(ks[6], (D2, D1), D1),
        "bl2": u(ks[7], (D2,), D1),
        "wl3": u(ks[8], (D3, D2), D2),
        "bl3": u(ks[9], (D3,), D2),
    }


def lenet_reference(x_nchw, p):
    hp = jax.lax.Precision.HIGHEST

    def conv(x, w, b):
        y = jax.lax.conv_general_dilated(
            x, w, window_strides=(1, 1), padding="VALID",
            dimension_numbers=("NCHW", "OIHW", "NCHW"), precision=hp)
        return jax.nn.relu(y + b.reshape(1, -1, 1, 1))

    def pool(x):
        return jax.lax.reduce_window(x, -jnp.inf, jax.lax.max,
                                     (1, 1, 2, 2), (1, 1, 2, 2), "VALID")

    y = pool(conv(x_nchw, p["w1"], p["b1"]))
    y = pool(conv(y, p["w2"], p["b2"]))
    y = y.reshape(y.shape[0], -1)                     # torch NCHW-order flatten
    y = jax.nn.relu(jnp.dot(y, p["wl1"].T, precision=hp) + p["bl1"])
    y = jax.nn.relu(jnp.dot(y, p["wl2"].T, precision=hp) + p["bl2"])
    return jnp.dot(y, p["wl3"].T, precision=hp) + p["bl3"]


if __name__ == "__main__":
    key = jax.random.PRNGKey(0)
    k_x, k_p = jax.random.split(key)
    x = jax.random.normal(k_x, (2, C_IN, H_IN, H_IN), jnp.float32)   # batch = 2
    params = init_params(k_p)
    prepared = prepare_params(params)            # one-time weight re-layout

    out = lenet_forward(x, prepared)
    out = jax.block_until_ready(out)
    assert out.shape == (2, D3), out.shape
    assert bool(jnp.all(jnp.isfinite(out)))

    ref = lenet_reference(x, params)
    err = float(jnp.max(jnp.abs(out - ref)))
    assert err < 5e-3, f"max |pallas - reference| = {err}"

    print("KERNEL_OK")
</pallas_src>

<mosaic_0001>
module attributes {stable_mosaic.version = 11 : i64} {
  func.func @lenet_kernel(%arg0: i32, %arg1: memref<1x32x96xf32, #tpu.memory_space<vmem>>, %arg2: memref<5x96x168xf32, #tpu.memory_space<vmem>>, %arg3: memref<1x168xf32, #tpu.memory_space<vmem>>, %arg4: memref<168x168xf32, #tpu.memory_space<vmem>>, %arg5: memref<5x168x160xf32, #tpu.memory_space<vmem>>, %arg6: memref<1x160xf32, #tpu.memory_space<vmem>>, %arg7: memref<160x160xf32, #tpu.memory_space<vmem>>, %arg8: memref<5x160x120xf32, #tpu.memory_space<vmem>>, %arg9: memref<1x120xf32, #tpu.memory_space<vmem>>, %arg10: memref<120x84xf32, #tpu.memory_space<vmem>>, %arg11: memref<1x84xf32, #tpu.memory_space<vmem>>, %arg12: memref<84x10xf32, #tpu.memory_space<vmem>>, %arg13: memref<1x10xf32, #tpu.memory_space<vmem>>, %arg14: memref<1x1x10xf32, #tpu.memory_space<vmem>>, %arg15: memref<27x168xf32, #tpu.memory_space<vmem>>, %arg16: memref<17x160xf32, #tpu.memory_space<vmem>>) attributes {dimension_semantics = [#tpu.dimension_semantics<parallel>], iteration_bounds = array<i64: 2>, scalar_prefetch = 0 : i64, scratch_operands = 2 : i64, tpu.core_type = #tpu.core_type<tc>, window_params = [{transform_indices = @transform_0, window_bounds = array<i64: 1, 32, 96>}, {pipeline_mode = #tpu.pipeline_mode<synchronous>, transform_indices = @transform_1, window_bounds = array<i64: 5, 96, 168>}, {pipeline_mode = #tpu.pipeline_mode<synchronous>, transform_indices = @transform_2, window_bounds = array<i64: 1, 168>}, {pipeline_mode = #tpu.pipeline_mode<synchronous>, transform_indices = @transform_3, window_bounds = array<i64: 168, 168>}, {pipeline_mode = #tpu.pipeline_mode<synchronous>, transform_indices = @transform_4, window_bounds = array<i64: 5, 168, 160>}, {pipeline_mode = #tpu.pipeline_mode<synchronous>, transform_indices = @transform_5, window_bounds = array<i64: 1, 160>}, {pipeline_mode = #tpu.pipeline_mode<synchronous>, transform_indices = @transform_6, window_bounds = array<i64: 160, 160>}, {pipeline_mode = #tpu.pipeline_mode<synchronous>, transform_indices = @transform_7, window_bounds = array<i64: 5, 160, 120>}, {pipeline_mode = #tpu.pipeline_mode<synchronous>, transform_indices = @transform_8, window_bounds = array<i64: 1, 120>}, {pipeline_mode = #tpu.pipeline_mode<synchronous>, transform_indices = @transform_9, window_bounds = array<i64: 120, 84>}, {pipeline_mode = #tpu.pipeline_mode<synchronous>, transform_indices = @transform_10, window_bounds = array<i64: 1, 84>}, {pipeline_mode = #tpu.pipeline_mode<synchronous>, transform_indices = @transform_11, window_bounds = array<i64: 84, 10>}, {pipeline_mode = #tpu.pipeline_mode<synchronous>, transform_indices = @transform_12, window_bounds = array<i64: 1, 10>}, {transform_indices = @transform_13, window_bounds = array<i64: 1, 1, 10>}]} {
    %c0 = arith.constant 0 : index
    %c0_0 = arith.constant 0 : index
    %c0_1 = arith.constant 0 : index
    %0 = vector.load %arg1[%c0, %c0_0, %c0_1] : memref<1x32x96xf32, #tpu.memory_space<vmem>>, vector<1x27x96xf32>
    %1 = vector.shape_cast %0 : vector<1x27x96xf32> to vector<27x96xf32>
    %c0_2 = arith.constant 0 : index
    %c0_3 = arith.constant 0 : index
    %c0_4 = arith.constant 0 : index
    %2 = vector.load %arg2[%c0_2, %c0_3, %c0_4] : memref<5x96x168xf32, #tpu.memory_space<vmem>>, vector<1x96x168xf32>
    %3 = vector.shape_cast %2 : vector<1x96x168xf32> to vector<96x168xf32>
    %cst = arith.constant dense<0.000000e+00> : vector<27x168xf32>
    %4 = tpu.matmul %1, %3, %cst {dimension_numbers = #tpu.dot_dimension_numbers<[1], [0], [0], [1], [0, 0, 1, 1], [], []>} : vector<27x96xf32>, vector<96x168xf32>, vector<27x168xf32> -> vector<27x168xf32>
    %c0_5 = arith.constant 0 : index
    %c1 = arith.constant 1 : index
    %c0_6 = arith.constant 0 : index
    %5 = vector.load %arg1[%c0_5, %c1, %c0_6] : memref<1x32x96xf32, #tpu.memory_space<vmem>>, vector<1x27x96xf32>
    %6 = vector.shape_cast %5 : vector<1x27x96xf32> to vector<27x96xf32>
    %c1_7 = arith.constant 1 : index
    %c0_8 = arith.constant 0 : index
    %c0_9 = arith.constant 0 : index
    %7 = vector.load %arg2[%c1_7, %c0_8, %c0_9] : memref<5x96x168xf32, #tpu.memory_space<vmem>>, vector<1x96x168xf32>
    %8 = vector.shape_cast %7 : vector<1x96x168xf32> to vector<96x168xf32>
    %cst_10 = arith.constant dense<0.000000e+00> : vector<27x168xf32>
    %9 = tpu.matmul %6, %8, %cst_10 {dimension_numbers = #tpu.dot_dimension_numbers<[1], [0], [0], [1], [0, 0, 1, 1], [], []>} : vector<27x96xf32>, vector<96x168xf32>, vector<27x168xf32> -> vector<27x168xf32>
    %10 = arith.addf %4, %9 : vector<27x168xf32>
    %c0_11 = arith.constant 0 : index
    %c2 = arith.constant 2 : index
    %c0_12 = arith.constant 0 : index
    %11 = vector.load %arg1[%c0_11, %c2, %c0_12] : memref<1x32x96xf32, #tpu.memory_space<vmem>>, vector<1x27x96xf32>
    %12 = vector.shape_cast %11 : vector<1x27x96xf32> to vector<27x96xf32>
    %c2_13 = arith.constant 2 : index
    %c0_14 = arith.constant 0 : index
    %c0_15 = arith.constant 0 : index
    %13 = vector.load %arg2[%c2_13, %c0_14, %c0_15] : memref<5x96x168xf32, #tpu.memory_space<vmem>>, vector<1x96x168xf32>
    %14 = vector.shape_cast %13 : vector<1x96x168xf32> to vector<96x168xf32>
    %cst_16 = arith.constant dense<0.000000e+00> : vector<27x168xf32>
    %15 = tpu.matmul %12, %14, %cst_16 {dimension_numbers = #tpu.dot_dimension_numbers<[1], [0], [0], [1], [0, 0, 1, 1], [], []>} : vector<27x96xf32>, vector<96x168xf32>, vector<27x168xf32> -> vector<27x168xf32>
    %16 = arith.addf %10, %15 : vector<27x168xf32>
    %c0_17 = arith.constant 0 : index
    %c3 = arith.constant 3 : index
    %c0_18 = arith.constant 0 : index
    %17 = vector.load %arg1[%c0_17, %c3, %c0_18] : memref<1x32x96xf32, #tpu.memory_space<vmem>>, vector<1x27x96xf32>
    %18 = vector.shape_cast %17 : vector<1x27x96xf32> to vector<27x96xf32>
    %c3_19 = arith.constant 3 : index
    %c0_20 = arith.constant 0 : index
    %c0_21 = arith.constant 0 : index
    %19 = vector.load %arg2[%c3_19, %c0_20, %c0_21] : memref<5x96x168xf32, #tpu.memory_space<vmem>>, vector<1x96x168xf32>
    %20 = vector.shape_cast %19 : vector<1x96x168xf32> to vector<96x168xf32>
    %cst_22 = arith.constant dense<0.000000e+00> : vector<27x168xf32>
    %21 = tpu.matmul %18, %20, %cst_22 {dimension_numbers = #tpu.dot_dimension_numbers<[1], [0], [0], [1], [0, 0, 1, 1], [], []>} : vector<27x96xf32>, vector<96x168xf32>, vector<27x168xf32> -> vector<27x168xf32>
    %22 = arith.addf %16, %21 : vector<27x168xf32>
    %c0_23 = arith.constant 0 : index
    %c4 = arith.constant 4 : index
    %c0_24 = arith.constant 0 : index
    %23 = vector.load %arg1[%c0_23, %c4, %c0_24] : memref<1x32x96xf32, #tpu.memory_space<vmem>>, vector<1x27x96xf32>
    %24 = vector.shape_cast %23 : vector<1x27x96xf32> to vector<27x96xf32>
    %c4_25 = arith.constant 4 : index
    %c0_26 = arith.constant 0 : index
    %c0_27 = arith.constant 0 : index
    %25 = vector.load %arg2[%c4_25, %c0_26, %c0_27] : memref<5x96x168xf32, #tpu.memory_space<vmem>>, vector<1x96x168xf32>
    %26 = vector.shape_cast %25 : vector<1x96x168xf32> to vector<96x168xf32>
    %cst_28 = arith.constant dense<0.000000e+00> : vector<27x168xf32>
    %27 = tpu.matmul %24, %26, %cst_28 {dimension_numbers = #tpu.dot_dimension_numbers<[1], [0], [0], [1], [0, 0, 1, 1], [], []>} : vector<27x96xf32>, vector<96x168xf32>, vector<27x168xf32> -> vector<27x168xf32>
    %28 = arith.addf %22, %27 : vector<27x168xf32>
    %c0_29 = arith.constant 0 : index
    %c1_30 = arith.constant 1 : index
    %c0_31 = arith.constant 0 : index
    %29 = vector.load %arg1[%c0_29, %c1_30, %c0_31] : memref<1x32x96xf32, #tpu.memory_space<vmem>>, vector<1x27x96xf32>
    %30 = vector.shape_cast %29 : vector<1x27x96xf32> to vector<27x96xf32>
    %c0_32 = arith.constant 0 : index
    %c0_33 = arith.constant 0 : index
    %c0_34 = arith.constant 0 : index
    %31 = vector.load %arg2[%c0_32, %c0_33, %c0_34] : memref<5x96x168xf32, #tpu.memory_space<vmem>>, vector<1x96x168xf32>
    %32 = vector.shape_cast %31 : vector<1x96x168xf32> to vector<96x168xf32>
    %cst_35 = arith.constant dense<0.000000e+00> : vector<27x168xf32>
    %33 = tpu.matmul %30, %32, %cst_35 {dimension_numbers = #tpu.dot_dimension_numbers<[1], [0], [0], [1], [0, 0, 1, 1], [], []>} : vector<27x96xf32>, vector<96x168xf32>, vector<27x168xf32> -> vector<27x168xf32>
    %c0_36 = arith.constant 0 : index
    %c2_37 = arith.constant 2 : index
    %c0_38 = arith.constant 0 : index
    %34 = vector.load %arg1[%c0_36, %c2_37, %c0_38] : memref<1x32x96xf32, #tpu.memory_space<vmem>>, vector<1x27x96xf32>
    %35 = vector.shape_cast %34 : vector<1x27x96xf32> to vector<27x96xf32>
    %c1_39 = arith.constant 1 : index
    %c0_40 = arith.constant 0 : index
    %c0_41 = arith.constant 0 : index
    %36 = vector.load %arg2[%c1_39, %c0_40, %c0_41] : memref<5x96x168xf32, #tpu.memory_space<vmem>>, vector<1x96x168xf32>
    %37 = vector.shape_cast %36 : vector<1x96x168xf32> to vector<96x168xf32>
    %cst_42 = arith.constant dense<0.000000e+00> : vector<27x168xf32>
    %38 = tpu.matmul %35, %37, %cst_42 {dimension_numbers = #tpu.dot_dimension_numbers<[1], [0], [0], [1], [0, 0, 1, 1], [], []>} : vector<27x96xf32>, vector<96x168xf32>, vector<27x168xf32> -> vector<27x168xf32>
    %39 = arith.addf %33, %38 : vector<27x168xf32>
    %c0_43 = arith.constant 0 : index
    %c3_44 = arith.constant 3 : index
    %c0_45 = arith.constant 0 : index
    %40 = vector.load %arg1[%c0_43, %c3_44, %c0_45] : memref<1x32x96xf32, #tpu.memory_space<vmem>>, vector<1x27x96xf32>
    %41 = vector.shape_cast %40 : vector<1x27x96xf32> to vector<27x96xf32>
    %c2_46 = arith.constant 2 : index
    %c0_47 = arith.constant 0 : index
    %c0_48 = arith.constant 0 : index
    %42 = vector.load %arg2[%c2_46, %c0_47, %c0_48] : memref<5x96x168xf32, #tpu.memory_space<vmem>>, vector<1x96x168xf32>
    %43 = vector.shape_cast %42 : vector<1x96x168xf32> to vector<96x168xf32>
    %cst_49 = arith.constant dense<0.000000e+00> : vector<27x168xf32>
    %44 = tpu.matmul %41, %43, %cst_49 {dimension_numbers = #tpu.dot_dimension_numbers<[1], [0], [0], [1], [0, 0, 1, 1], [], []>} : vector<27x96xf32>, vector<96x168xf32>, vector<27x168xf32> -> vector<27x168xf32>
    %45 = arith.addf %39, %44 : vector<27x168xf32>
    %c0_50 = arith.constant 0 : index
    %c4_51 = arith.constant 4 : index
    %c0_52 = arith.constant 0 : index
    %46 = vector.load %arg1[%c0_50, %c4_51, %c0_52] : memref<1x32x96xf32, #tpu.memory_space<vmem>>, vector<1x27x96xf32>
    %47 = vector.shape_cast %46 : vector<1x27x96xf32> to vector<27x96xf32>
    %c3_53 = arith.constant 3 : index
    %c0_54 = arith.constant 0 : index
    %c0_55 = arith.constant 0 : index
    %48 = vector.load %arg2[%c3_53, %c0_54, %c0_55] : memref<5x96x168xf32, #tpu.memory_space<vmem>>, vector<1x96x168xf32>
    %49 = vector.shape_cast %48 : vector<1x96x168xf32> to vector<96x168xf32>
    %cst_56 = arith.constant dense<0.000000e+00> : vector<27x168xf32>
    %50 = tpu.matmul %47, %49, %cst_56 {dimension_numbers = #tpu.dot_dimension_numbers<[1], [0], [0], [1], [0, 0, 1, 1], [], []>} : vector<27x96xf32>, vector<96x168xf32>, vector<27x168xf32> -> vector<27x168xf32>
    %51 = arith.addf %45, %50 : vector<27x168xf32>
    %c0_57 = arith.constant 0 : index
    %c5 = arith.constant 5 : index
    %c0_58 = arith.constant 0 : index
    %52 = vector.load %arg1[%c0_57, %c5, %c0_58] : memref<1x32x96xf32, #tpu.memory_space<vmem>>, vector<1x27x96xf32>
    %53 = vector.shape_cast %52 : vector<1x27x96xf32> to vector<27x96xf32>
    %c4_59 = arith.constant 4 : index
    %c0_60 = arith.constant 0 : index
    %c0_61 = arith.constant 0 : index
    %54 = vector.load %arg2[%c4_59, %c0_60, %c0_61] : memref<5x96x168xf32, #tpu.memory_space<vmem>>, vector<1x96x168xf32>
    %55 = vector.shape_cast %54 : vector<1x96x168xf32> to vector<96x168xf32>
    %cst_62 = arith.constant dense<0.000000e+00> : vector<27x168xf32>
    %56 = tpu.matmul %53, %55, %cst_62 {dimension_numbers = #tpu.dot_dimension_numbers<[1], [0], [0], [1], [0, 0, 1, 1], [], []>} : vector<27x96xf32>, vector<96x168xf32>, vector<27x168xf32> -> vector<27x168xf32>
    %57 = arith.addf %51, %56 : vector<27x168xf32>
    %58 = arith.maximumf %28, %57 : vector<27x168xf32>
    %c0_63 = arith.constant 0 : index
    %c0_64 = arith.constant 0 : index
    %59 = vector.load %arg3[%c0_63, %c0_64] : memref<1x168xf32, #tpu.memory_space<vmem>>, vector<1x168xf32>
    %60 = vector.broadcast %59 : vector<1x168xf32> to vector<27x168xf32>
    %61 = arith.addf %58, %60 : vector<27x168xf32>
    %cst_65 = arith.constant 0.000000e+00 : f32
    %62 = vector.broadcast %cst_65 : f32 to vector<27x168xf32>
    %63 = arith.maximumf %61, %62 : vector<27x168xf32>
    %c0_66 = arith.constant 0 : index
    %c0_67 = arith.constant 0 : index
    %64 = vector.load %arg4[%c0_66, %c0_67] : memref<168x168xf32, #tpu.memory_space<vmem>>, vector<168x168xf32>
    %cst_68 = arith.constant dense<0.000000e+00> : vector<27x168xf32>
    %65 = tpu.matmul %63, %64, %cst_68 {dimension_numbers = #tpu.dot_dimension_numbers<[1], [0], [0], [1], [0, 0, 1, 1], [], []>} : vector<27x168xf32>, vector<168x168xf32>, vector<27x168xf32> -> vector<27x168xf32>
    %66 = arith.maximumf %63, %65 : vector<27x168xf32>
    %c0_69 = arith.constant 0 : index
    %c0_70 = arith.constant 0 : index
    %67 = vector.load %arg15[%c0_69, %c0_70] : memref<27x168xf32, #tpu.memory_space<vmem>>, vector<27x168xf32>
    tpu.vector_store %arg15[%c0_69, %c0_70], %66 {strides = array<i32>} : memref<27x168xf32, #tpu.memory_space<vmem>>, vector<27x168xf32>,
    %c0_71 = arith.constant 0 : index
    %c0_72 = arith.constant 0 : index
    %68 = vector.load %arg15[%c0_71, %c0_72] : memref<27x168xf32, #tpu.memory_space<vmem>>, vector<17x168xf32>
    %c0_73 = arith.constant 0 : index
    %c0_74 = arith.constant 0 : index
    %c0_75 = arith.constant 0 : index
    %69 = vector.load %arg5[%c0_73, %c0_74, %c0_75] : memref<5x168x160xf32, #tpu.memory_space<vmem>>, vector<1x168x160xf32>
    %70 = vector.shape_cast %69 : vector<1x168x160xf32> to vector<168x160xf32>
    %cst_76 = arith.constant dense<0.000000e+00> : vector<17x160xf32>
    %71 = tpu.matmul %68, %70, %cst_76 {dimension_numbers = #tpu.dot_dimension_numbers<[1], [0], [0], [1], [0, 0, 1, 1], [], []>} : vector<17x168xf32>, vector<168x160xf32>, vector<17x160xf32> -> vector<17x160xf32>
    %c2_77 = arith.constant 2 : index
    %c0_78 = arith.constant 0 : index
    %72 = vector.load %arg15[%c2_77, %c0_78] : memref<27x168xf32, #tpu.memory_space<vmem>>, vector<17x168xf32>
    %c1_79 = arith.constant 1 : index
    %c0_80 = arith.constant 0 : index
    %c0_81 = arith.constant 0 : index
    %73 = vector.load %arg5[%c1_79, %c0_80, %c0_81] : memref<5x168x160xf32, #tpu.memory_space<vmem>>, vector<1x168x160xf32>
    %74 = vector.shape_cast %73 : vector<1x168x160xf32> to vector<168x160xf32>
    %cst_82 = arith.constant dense<0.000000e+00> : vector<17x160xf32>
    %75 = tpu.matmul %72, %74, %cst_82 {dimension_numbers = #tpu.dot_dimension_numbers<[1], [0], [0], [1], [0, 0, 1, 1], [], []>} : vector<17x168xf32>, vector<168x160xf32>, vector<17x160xf32> -> vector<17x160xf32>
    %76 = arith.addf %71, %75 : vector<17x160xf32>
    %c4_83 = arith.constant 4 : index
    %c0_84 = arith.constant 0 : index
    %77 = vector.load %arg15[%c4_83, %c0_84] : memref<27x168xf32, #tpu.memory_space<vmem>>, vector<17x168xf32>
    %c2_85 = arith.constant 2 : index
    %c0_86 = arith.constant 0 : index
    %c0_87 = arith.constant 0 : index
    %78 = vector.load %arg5[%c2_85, %c0_86, %c0_87] : memref<5x168x160xf32, #tpu.memory_space<vmem>>, vector<1x168x160xf32>
    %79 = vector.shape_cast %78 : vector<1x168x160xf32> to vector<168x160xf32>
    %cst_88 = arith.constant dense<0.000000e+00> : vector<17x160xf32>
    %80 = tpu.matmul %77, %79, %cst_88 {dimension_numbers = #tpu.dot_dimension_numbers<[1], [0], [0], [1], [0, 0, 1, 1], [], []>} : vector<17x168xf32>, vector<168x160xf32>, vector<17x160xf32> -> vector<17x160xf32>
    %81 = arith.addf %76, %80 : vector<17x160xf32>
    %c6 = arith.constant 6 : index
    %c0_89 = arith.constant 0 : index
    %82 = vector.load %arg15[%c6, %c0_89] : memref<27x168xf32, #tpu.memory_space<vmem>>, vector<17x168xf32>
    %c3_90 = arith.constant 3 : index
    %c0_91 = arith.constant 0 : index
    %c0_92 = arith.constant 0 : index
    %83 = vector.load %arg5[%c3_90, %c0_91, %c0_92] : memref<5x168x160xf32, #tpu.memory_space<vmem>>, vector<1x168x160xf32>
    %84 = vector.shape_cast %83 : vector<1x168x160xf32> to vector<168x160xf32>
    %cst_93 = arith.constant dense<0.000000e+00> : vector<17x160xf32>
    %85 = tpu.matmul %82, %84, %cst_93 {dimension_numbers = #tpu.dot_dimension_numbers<[1], [0], [0], [1], [0, 0, 1, 1], [], []>} : vector<17x168xf32>, vector<168x160xf32>, vector<17x160xf32> -> vector<17x160xf32>
    %86 = arith.addf %81, %85 : vector<17x160xf32>
    %c8 = arith.constant 8 : index
    %c0_94 = arith.constant 0 : index
    %87 = vector.load %arg15[%c8, %c0_94] : memref<27x168xf32, #tpu.memory_space<vmem>>, vector<17x168xf32>
    %c4_95 = arith.constant 4 : index
    %c0_96 = arith.constant 0 : index
    %c0_97 = arith.constant 0 : index
    %88 = vector.load %arg5[%c4_95, %c0_96, %c0_97] : memref<5x168x160xf32, #tpu.memory_space<vmem>>, vector<1x168x160xf32>
    %89 = vector.shape_cast %88 : vector<1x168x160xf32> to vector<168x160xf32>
    %cst_98 = arith.constant dense<0.000000e+00> : vector<17x160xf32>
    %90 = tpu.matmul %87, %89, %cst_98 {dimension_numbers = #tpu.dot_dimension_numbers<[1], [0], [0], [1], [0, 0, 1, 1], [], []>} : vector<17x168xf32>, vector<168x160xf32>, vector<17x160xf32> -> vector<17x160xf32>
    %91 = arith.addf %86, %90 : vector<17x160xf32>
    %c2_99 = arith.constant 2 : index
    %c0_100 = arith.constant 0 : index
    %92 = vector.load %arg15[%c2_99, %c0_100] : memref<27x168xf32, #tpu.memory_space<vmem>>, vector<17x168xf32>
    %c0_101 = arith.constant 0 : index
    %c0_102 = arith.constant 0 : index
    %c0_103 = arith.constant 0 : index
    %93 = vector.load %arg5[%c0_101, %c0_102, %c0_103] : memref<5x168x160xf32, #tpu.memory_space<vmem>>, vector<1x168x160xf32>
    %94 = vector.shape_cast %93 : vector<1x168x160xf32> to vector<168x160xf32>
    %cst_104 = arith.constant dense<0.000000e+00> : vector<17x160xf32>
    %95 = tpu.matmul %92, %94, %cst_104 {dimension_numbers = #tpu.dot_dimension_numbers<[1], [0], [0], [1], [0, 0, 1, 1], [], []>} : vector<17x168xf32>, vector<168x160xf32>, vector<17x160xf32> -> vector<17x160xf32>
    %c4_105 = arith.constant 4 : index
    %c0_106 = arith.constant 0 : index
    %96 = vector.load %arg15[%c4_105, %c0_106] : memref<27x168xf32, #tpu.memory_space<vmem>>, vector<17x168xf32>
    %c1_107 = arith.constant 1 : index
    %c0_108 = arith.constant 0 : index
    %c0_109 = arith.constant 0 : index
    %97 = vector.load %arg5[%c1_107, %c0_108, %c0_109] : memref<5x168x160xf32, #tpu.memory_space<vmem>>, vector<1x168x160xf32>
    %98 = vector.shape_cast %97 : vector<1x168x160xf32> to vector<168x160xf32>
    %cst_110 = arith.constant dense<0.000000e+00> : vector<17x160xf32>
    %99 = tpu.matmul %96, %98, %cst_110 {dimension_numbers = #tpu.dot_dimension_numbers<[1], [0], [0], [1], [0, 0, 1, 1], [], []>} : vector<17x168xf32>, vector<168x160xf32>, vector<17x160xf32> -> vector<17x160xf32>
    %100 = arith.addf %95, %99 : vector<17x160xf32>
    %c6_111 = arith.constant 6 : index
    %c0_112 = arith.constant 0 : index
    %101 = vector.load %arg15[%c6_111, %c0_112] : memref<27x168xf32, #tpu.memory_space<vmem>>, vector<17x168xf32>
    %c2_113 = arith.constant 2 : index
    %c0_114 = arith.constant 0 : index
    %c0_115 = arith.constant 0 : index
    %102 = vector.load %arg5[%c2_113, %c0_114, %c0_115] : memref<5x168x160xf32, #tpu.memory_space<vmem>>, vector<1x168x160xf32>
    %103 = vector.shape_cast %102 : vector<1x168x160xf32> to vector<168x160xf32>
    %cst_116 = arith.constant dense<0.000000e+00> : vector<17x160xf32>
    %104 = tpu.matmul %101, %103, %cst_116 {dimension_numbers = #tpu.dot_dimension_numbers<[1], [0], [0], [1], [0, 0, 1, 1], [], []>} : vector<17x168xf32>, vector<168x160xf32>, vector<17x160xf32> -> vector<17x160xf32>
    %105 = arith.addf %100, %104 : vector<17x160xf32>
    %c8_117 = arith.constant 8 : index
    %c0_118 = arith.constant 0 : index
    %106 = vector.load %arg15[%c8_117, %c0_118] : memref<27x168xf32, #tpu.memory_space<vmem>>, vector<17x168xf32>
    %c3_119 = arith.constant 3 : index
    %c0_120 = arith.constant 0 : index
    %c0_121 = arith.constant 0 : index
    %107 = vector.load %arg5[%c3_119, %c0_120, %c0_121] : memref<5x168x160xf32, #tpu.memory_space<vmem>>, vector<1x168x160xf32>
    %108 = vector.shape_cast %107 : vector<1x168x160xf32> to vector<168x160xf32>
    %cst_122 = arith.constant dense<0.000000e+00> : vector<17x160xf32>
    %109 = tpu.matmul %106, %108, %cst_122 {dimension_numbers = #tpu.dot_dimension_numbers<[1], [0], [0], [1], [0, 0, 1, 1], [], []>} : vector<17x168xf32>, vector<168x160xf32>, vector<17x160xf32> -> vector<17x160xf32>
    %110 = arith.addf %105, %109 : vector<17x160xf32>
    %c10 = arith.constant 10 : index
    %c0_123 = arith.constant 0 : index
    %111 = vector.load %arg15[%c10, %c0_123] : memref<27x168xf32, #tpu.memory_space<vmem>>, vector<17x168xf32>
    %c4_124 = arith.constant 4 : index
    %c0_125 = arith.constant 0 : index
    %c0_126 = arith.constant 0 : index
    %112 = vector.load %arg5[%c4_124, %c0_125, %c0_126] : memref<5x168x160xf32, #tpu.memory_space<vmem>>, vector<1x168x160xf32>
    %113 = vector.shape_cast %112 : vector<1x168x160xf32> to vector<168x160xf32>
    %cst_127 = arith.constant dense<0.000000e+00> : vector<17x160xf32>
    %114 = tpu.matmul %111, %113, %cst_127 {dimension_numbers = #tpu.dot_dimension_numbers<[1], [0], [0], [1], [0, 0, 1, 1], [], []>} : vector<17x168xf32>, vector<168x160xf32>, vector<17x160xf32> -> vector<17x160xf32>
    %115 = arith.addf %110, %114 : vector<17x160xf32>
    %116 = arith.maximumf %91, %115 : vector<17x160xf32>
    %c0_128 = arith.constant 0 : index
    %c0_129 = arith.constant 0 : index
    %117 = vector.load %arg6[%c0_128, %c0_129] : memref<1x160xf32, #tpu.memory_space<vmem>>, vector<1x160xf32>
    %118 = vector.broadcast %117 : vector<1x160xf32> to vector<17x160xf32>
    %119 = arith.addf %116, %118 : vector<17x160xf32>
    %cst_130 = arith.constant 0.000000e+00 : f32
    %120 = vector.broadcast %cst_130 : f32 to vector<17x160xf32>
    %121 = arith.maximumf %119, %120 : vector<17x160xf32>
    %c0_131 = arith.constant 0 : index
    %c0_132 = arith.constant 0 : index
    %122 = vector.load %arg7[%c0_131, %c0_132] : memref<160x160xf32, #tpu.memory_space<vmem>>, vector<160x160xf32>
    %cst_133 = arith.constant dense<0.000000e+00> : vector<17x160xf32>
    %123 = tpu.matmul %121, %122, %cst_133 {dimension_numbers = #tpu.dot_dimension_numbers<[1], [0], [0], [1], [0, 0, 1, 1], [], []>} : vector<17x160xf32>, vector<160x160xf32>, vector<17x160xf32> -> vector<17x160xf32>
    %124 = arith.maximumf %121, %123 : vector<17x160xf32>
    %c0_134 = arith.constant 0 : index
    %c0_135 = arith.constant 0 : index
    %125 = vector.load %arg16[%c0_134, %c0_135] : memref<17x160xf32, #tpu.memory_space<vmem>>, vector<17x160xf32>
    tpu.vector_store %arg16[%c0_134, %c0_135], %124 {strides = array<i32>} : memref<17x160xf32, #tpu.memory_space<vmem>>, vector<17x160xf32>,
    %c0_136 = arith.constant 0 : index
    %c0_137 = arith.constant 0 : index
    %126 = vector.load %arg16[%c0_136, %c0_137] : memref<17x160xf32, #tpu.memory_space<vmem>>, vector<1x160xf32>
    %c0_138 = arith.constant 0 : index
    %c0_139 = arith.constant 0 : index
    %c0_140 = arith.constant 0 : index
    %127 = vector.load %arg8[%c0_138, %c0_139, %c0_140] : memref<5x160x120xf32, #tpu.memory_space<vmem>>, vector<1x160x120xf32>
    %128 = vector.shape_cast %127 : vector<1x160x120xf32> to vector<160x120xf32>
    %cst_141 = arith.constant dense<0.000000e+00> : vector<1x120xf32>
    %129 = tpu.matmul %126, %128, %cst_141 {dimension_numbers = #tpu.dot_dimension_numbers<[1], [0], [0], [1], [0, 0, 1, 1], [], []>} : vector<1x160xf32>, vector<160x120xf32>, vector<1x120xf32> -> vector<1x120xf32>
    %c4_142 = arith.constant 4 : index
    %c0_143 = arith.constant 0 : index
    %130 = vector.load %arg16[%c4_142, %c0_143] : memref<17x160xf32, #tpu.memory_space<vmem>>, vector<1x160xf32>
    %c1_144 = arith.constant 1 : index
    %c0_145 = arith.constant 0 : index
    %c0_146 = arith.constant 0 : index
    %131 = vector.load %arg8[%c1_144, %c0_145, %c0_146] : memref<5x160x120xf32, #tpu.memory_space<vmem>>, vector<1x160x120xf32>
    %132 = vector.shape_cast %131 : vector<1x160x120xf32> to vector<160x120xf32>
    %cst_147 = arith.constant dense<0.000000e+00> : vector<1x120xf32>
    %133 = tpu.matmul %130, %132, %cst_147 {dimension_numbers = #tpu.dot_dimension_numbers<[1], [0], [0], [1], [0, 0, 1, 1], [], []>} : vector<1x160xf32>, vector<160x120xf32>, vector<1x120xf32> -> vector<1x120xf32>
    %134 = arith.addf %129, %133 : vector<1x120xf32>
    %c8_148 = arith.constant 8 : index
    %c0_149 = arith.constant 0 : index
    %135 = vector.load %arg16[%c8_148, %c0_149] : memref<17x160xf32, #tpu.memory_space<vmem>>, vector<1x160xf32>
    %c2_150 = arith.constant 2 : index
    %c0_151 = arith.constant 0 : index
    %c0_152 = arith.constant 0 : index
    %136 = vector.load %arg8[%c2_150, %c0_151, %c0_152] : memref<5x160x120xf32, #tpu.memory_space<vmem>>, vector<1x160x120xf32>
    %137 = vector.shape_cast %136 : vector<1x160x120xf32> to vector<160x120xf32>
    %cst_153 = arith.constant dense<0.000000e+00> : vector<1x120xf32>
    %138 = tpu.matmul %135, %137, %cst_153 {dimension_numbers = #tpu.dot_dimension_numbers<[1], [0], [0], [1], [0, 0, 1, 1], [], []>} : vector<1x160xf32>, vector<160x120xf32>, vector<1x120xf32> -> vector<1x120xf32>
    %139 = arith.addf %134, %138 : vector<1x120xf32>
    %c12 = arith.constant 12 : index
    %c0_154 = arith.constant 0 : index
    %140 = vector.load %arg16[%c12, %c0_154] : memref<17x160xf32, #tpu.memory_space<vmem>>, vector<1x160xf32>
    %c3_155 = arith.constant 3 : index
    %c0_156 = arith.constant 0 : index
    %c0_157 = arith.constant 0 : index
    %141 = vector.load %arg8[%c3_155, %c0_156, %c0_157] : memref<5x160x120xf32, #tpu.memory_space<vmem>>, vector<1x160x120xf32>
    %142 = vector.shape_cast %141 : vector<1x160x120xf32> to vector<160x120xf32>
    %cst_158 = arith.constant dense<0.000000e+00> : vector<1x120xf32>
    %143 = tpu.matmul %140, %142, %cst_158 {dimension_numbers = #tpu.dot_dimension_numbers<[1], [0], [0], [1], [0, 0, 1, 1], [], []>} : vector<1x160xf32>, vector<160x120xf32>, vector<1x120xf32> -> vector<1x120xf32>
    %144 = arith.addf %139, %143 : vector<1x120xf32>
    %c16 = arith.constant 16 : index
    %c0_159 = arith.constant 0 : index
    %145 = vector.load %arg16[%c16, %c0_159] : memref<17x160xf32, #tpu.memory_space<vmem>>, vector<1x160xf32>
    %c4_160 = arith.constant 4 : index
    %c0_161 = arith.constant 0 : index
    %c0_162 = arith.constant 0 : index
    %146 = vector.load %arg8[%c4_160, %c0_161, %c0_162] : memref<5x160x120xf32, #tpu.memory_space<vmem>>, vector<1x160x120xf32>
    %147 = vector.shape_cast %146 : vector<1x160x120xf32> to vector<160x120xf32>
    %cst_163 = arith.constant dense<0.000000e+00> : vector<1x120xf32>
    %148 = tpu.matmul %145, %147, %cst_163 {dimension_numbers = #tpu.dot_dimension_numbers<[1], [0], [0], [1], [0, 0, 1, 1], [], []>} : vector<1x160xf32>, vector<160x120xf32>, vector<1x120xf32> -> vector<1x120xf32>
    %149 = arith.addf %144, %148 : vector<1x120xf32>
    %c0_164 = arith.constant 0 : index
    %c0_165 = arith.constant 0 : index
    %150 = vector.load %arg9[%c0_164, %c0_165] : memref<1x120xf32, #tpu.memory_space<vmem>>, vector<1x120xf32>
    %151 = arith.addf %149, %150 : vector<1x120xf32>
    %cst_166 = arith.constant 0.000000e+00 : f32
    %152 = vector.broadcast %cst_166 : f32 to vector<1x120xf32>
    %153 = arith.maximumf %151, %152 : vector<1x120xf32>
    %c0_167 = arith.constant 0 : index
    %c0_168 = arith.constant 0 : index
    %154 = vector.load %arg10[%c0_167, %c0_168] : memref<120x84xf32, #tpu.memory_space<vmem>>, vector<120x84xf32>
    %cst_169 = arith.constant dense<0.000000e+00> : vector<1x84xf32>
    %155 = tpu.matmul %153, %154, %cst_169 {dimension_numbers = #tpu.dot_dimension_numbers<[1], [0], [0], [1], [0, 0, 1, 1], [], []>} : vector<1x120xf32>, vector<120x84xf32>, vector<1x84xf32> -> vector<1x84xf32>
    %c0_170 = arith.constant 0 : index
    %c0_171 = arith.constant 0 : index
    %156 = vector.load %arg11[%c0_170, %c0_171] : memref<1x84xf32, #tpu.memory_space<vmem>>, vector<1x84xf32>
    %157 = arith.addf %155, %156 : vector<1x84xf32>
    %cst_172 = arith.constant 0.000000e+00 : f32
    %158 = vector.broadcast %cst_172 : f32 to vector<1x84xf32>
    %159 = arith.maximumf %157, %158 : vector<1x84xf32>
    %c0_173 = arith.constant 0 : index
    %c0_174 = arith.constant 0 : index
    %160 = vector.load %arg12[%c0_173, %c0_174] : memref<84x10xf32, #tpu.memory_space<vmem>>, vector<84x10xf32>
    %cst_175 = arith.constant dense<0.000000e+00> : vector<1x10xf32>
    %161 = tpu.matmul %159, %160, %cst_175 {dimension_numbers = #tpu.dot_dimension_numbers<[1], [0], [0], [1], [0, 0, 1, 1], [], []>} : vector<1x84xf32>, vector<84x10xf32>, vector<1x10xf32> -> vector<1x10xf32>
    %c0_176 = arith.constant 0 : index
    %c0_177 = arith.constant 0 : index
    %162 = vector.load %arg13[%c0_176, %c0_177] : memref<1x10xf32, #tpu.memory_space<vmem>>, vector<1x10xf32>
    %163 = arith.addf %161, %162 : vector<1x10xf32>
    %c0_178 = arith.constant 0 : index
    %c0_179 = arith.constant 0 : index
    %c0_180 = arith.constant 0 : index
    %164 = vector.load %arg14[%c0_178, %c0_179, %c0_180] : memref<1x1x10xf32, #tpu.memory_space<vmem>>, vector<1x1x10xf32>
    %165 = vector.shape_cast %164 : vector<1x1x10xf32> to vector<1x10xf32>
    %166 = vector.shape_cast %163 : vector<1x10xf32> to vector<1x1x10xf32>
    tpu.vector_store %arg14[%c0_178, %c0_179, %c0_180], %166 {strides = array<i32>} : memref<1x1x10xf32, #tpu.memory_space<vmem>>, vector<1x1x10xf32>,
    return
  }
  func.func @transform_0(%arg0: i32) -> (i32, i32, i32) {
    %c0_i32 = arith.constant 0 : i32
    %c0_i32_0 = arith.constant 0 : i32
    %c0_i32_1 = arith.constant 0 : i32
    return %arg0, %c0_i32, %c0_i32_0 : i32, i32, i32
  }
  func.func @transform_1(%arg0: i32) -> (i32, i32, i32) {
    %c0_i32 = arith.constant 0 : i32
    %c0_i32_0 = arith.constant 0 : i32
    %c0_i32_1 = arith.constant 0 : i32
    %c0_i32_2 = arith.constant 0 : i32
    return %c0_i32, %c0_i32_0, %c0_i32_1 : i32, i32, i32
  }
  func.func @transform_2(%arg0: i32) -> (i32, i32) {
    %c0_i32 = arith.constant 0 : i32
    %c0_i32_0 = arith.constant 0 : i32
    %c0_i32_1 = arith.constant 0 : i32
    return %c0_i32, %c0_i32_0 : i32, i32
  }
  func.func @transform_3(%arg0: i32) -> (i32, i32) {
    %c0_i32 = arith.constant 0 : i32
    %c0_i32_0 = arith.constant 0 : i32
    %c0_i32_1 = arith.constant 0 : i32
    return %c0_i32, %c0_i32_0 : i32, i32
  }
  func.func @transform_4(%arg0: i32) -> (i32, i32, i32) {
    %c0_i32 = arith.constant 0 : i32
    %c0_i32_0 = arith.constant 0 : i32
    %c0_i32_1 = arith.constant 0 : i32
    %c0_i32_2 = arith.constant 0 : i32
    return %c0_i32, %c0_i32_0, %c0_i32_1 : i32, i32, i32
  }
  func.func @transform_5(%arg0: i32) -> (i32, i32) {
    %c0_i32 = arith.constant 0 : i32
    %c0_i32_0 = arith.constant 0 : i32
    %c0_i32_1 = arith.constant 0 : i32
    return %c0_i32, %c0_i32_0 : i32, i32
  }
  func.func @transform_6(%arg0: i32) -> (i32, i32) {
    %c0_i32 = arith.constant 0 : i32
    %c0_i32_0 = arith.constant 0 : i32
    %c0_i32_1 = arith.constant 0 : i32
    return %c0_i32, %c0_i32_0 : i32, i32
  }
  func.func @transform_7(%arg0: i32) -> (i32, i32, i32) {
    %c0_i32 = arith.constant 0 : i32
    %c0_i32_0 = arith.constant 0 : i32
    %c0_i32_1 = arith.constant 0 : i32
    %c0_i32_2 = arith.constant 0 : i32
    return %c0_i32, %c0_i32_0, %c0_i32_1 : i32, i32, i32
  }
  func.func @transform_8(%arg0: i32) -> (i32, i32) {
    %c0_i32 = arith.constant 0 : i32
    %c0_i32_0 = arith.constant 0 : i32
    %c0_i32_1 = arith.constant 0 : i32
    return %c0_i32, %c0_i32_0 : i32, i32
  }
  func.func @transform_9(%arg0: i32) -> (i32, i32) {
    %c0_i32 = arith.constant 0 : i32
    %c0_i32_0 = arith.constant 0 : i32
    %c0_i32_1 = arith.constant 0 : i32
    return %c0_i32, %c0_i32_0 : i32, i32
  }
  func.func @transform_10(%arg0: i32) -> (i32, i32) {
    %c0_i32 = arith.constant 0 : i32
    %c0_i32_0 = arith.constant 0 : i32
    %c0_i32_1 = arith.constant 0 : i32
    return %c0_i32, %c0_i32_0 : i32, i32
  }
  func.func @transform_11(%arg0: i32) -> (i32, i32) {
    %c0_i32 = arith.constant 0 : i32
    %c0_i32_0 = arith.constant 0 : i32
    %c0_i32_1 = arith.constant 0 : i32
    return %c0_i32, %c0_i32_0 : i32, i32
  }
  func.func @transform_12(%arg0: i32) -> (i32, i32) {
    %c0_i32 = arith.constant 0 : i32
    %c0_i32_0 = arith.constant 0 : i32
    %c0_i32_1 = arith.constant 0 : i32
    return %c0_i32, %c0_i32_0 : i32, i32
  }
  func.func @transform_13(%arg0: i32) -> (i32, i32, i32) {
    %c0_i32 = arith.constant 0 : i32
    %c0_i32_0 = arith.constant 0 : i32
    %c0_i32_1 = arith.constant 0 : i32
    return %arg0, %c0_i32, %c0_i32_0 : i32, i32, i32
  }
}

</mosaic_0001>

<bundles_post_ra>
// kernel: lenet_forward.1
= control target key start
LH: loop header
LB: loop body
LE: loop exit
PB: predicated region body
PF: predicated region fallthrough
CT: control target
= control target key end

     0   :  { %18 = vsyncpa [#allocation5], 0  ;;  %s8015_s0 = inlined_call_operand.vmem [shape: f32[2,32,96], index: 0, kind: input, shape index: {}]   ;;  %s8016_s1 = inlined_call_operand.vmem [shape: f32[5,96,168], index: 1, kind: input, shape index: {}]   ;;  %s8017_s2 = inlined_call_operand.vmem [shape: f32[1,168], index: 2, kind: input, shape index: {}]   ;;  %s8018_s3 = inlined_call_operand.vmem [shape: f32[168,168], index: 3, kind: input, shape index: {}]   ;;  %s8019_s4 = inlined_call_operand.vmem [shape: f32[5,168,160], index: 4, kind: input, shape index: {}]   ;;  %s8020_s5 = inlined_call_operand.vmem [shape: f32[1,160], index: 5, kind: input, shape index: {}]   ;;  %s8021_s6 = inlined_call_operand.vmem [shape: f32[160,160], index: 6, kind: input, shape index: {}]   ;;  %s8022_s7 = inlined_call_operand.vmem [shape: f32[5,160,120], index: 7, kind: input, shape index: {}]   ;;  %s8023_s8 = inlined_call_operand.vmem [shape: f32[1,120], index: 8, kind: input, shape index: {}]   ;;  %s8024_s9 = inlined_call_operand.vmem [shape: f32[120,84], index: 9, kind: input, shape index: {}]   ;;  %s8025_s10 = inlined_call_operand.vmem [shape: f32[1,84], index: 10, kind: input, shape index: {}]   ;;  %s8026_s11 = inlined_call_operand.vmem [shape: f32[84,10], index: 11, kind: input, shape index: {}]   ;;  %s8027_s12 = inlined_call_operand.vmem [shape: f32[1,10], index: 12, kind: input, shape index: {}]   ;;  %s8028_s13 = inlined_call_operand.hbm [shape: f32[2,1,10], index: 13, kind: output, shape index: {}]  }
   0x1   :  { %20 = vsyncpa [#allocation5 + $0x1], 0  ;;  %s5697_s25 = smov 0   ;;  %s5699_s26 = smov 0  }
   0x2   :  { %s5701_s27 = smov 0   ;;  %s5703_s28 = smov 0  }
   0x3 LB: > { %8033 = sst [smem:[#allocation7_spill]] %s5617_s27  ;;  %s5718_s29 = sadd.s32 4294967295, %s5621_s28   ;;  %s5621_s28 = sphi %s5703_s28, %s8040_s28   ;;  %s5617_s27 = sphi %s5701_s27, %s8042_s27   ;;  %s5613_s26 = sphi %s5699_s26, %s8044_s26   ;;  %s5609_s25 = sphi %s5697_s25, %s8043_s25  }
   0x4   : > { %s3972_s30 = sadd.s32 4294967294, %s5621_s28   ;;  %s5722_s14 = sadd.s32 1, %s5621_s28  }
   0x5   : > { %8034 = sst [smem:[#allocation8_spill]] %s5722_s14  ;;  %s311_s15 = sadd.s32 1, %s5617_s27 }
   0x6   : > { %s308_s16 = ssub.s32 %s5621_s28, %s5722_s14  ;;  %p321_p0 = scmp.ne.s32.totalorder %s5617_s27, %s5613_s26 }
   0x7   : > { %p309_p1 = scmp.eq.s32.totalorder %s308_s16, 0  ;;  %p322_p2 = scmp.eq.s32.totalorder %s5718_s29, 1 }
   0x8   : > { %p327_p3 = scmp.ne.s32.totalorder %s5613_s26, %s5609_s25  ;;  %p328_p4 = scmp.eq.s32.totalorder %s3972_s30, 1 }
   0x9   : > { %s5733_s17 = scalar_select %p309_p1, %s5617_s27, %s311_s15  }
   0xa   : > { %p5735_p5 = por %p322_p2, %p321_p0  ;;  %p5739_p6 = por %p328_p4, %p327_p3 }
   0xb   : > { %8035 = sst [smem:[#allocation9_spill]] %s5733_s17  ;;  %p3975_p7 = scmp.ge.s32.totalorder %s5621_s28, 1 }
   0xc   : > { %s8037_s19 = scalar_select %p5739_p6, 1, 0 }
   0xd   : > { %p390_p8 = scmp.lt.s32.totalorder %s5621_s28, 3 }
   0xe   : > { %8038 = sst [smem:[#allocation10_spill]] %s8037_s19 }
   0xf   : > { %p391_p9 = pnand %p3975_p7, %p390_p8 }
  0x10   : > { %v3979_v0 = vld [vmem:[%s8016_s1 + $0xc8] sm:$0xff] (!%p391_p9)  ;;  %v3981_v1 = vld [vmem:[%s8016_s1 + $0xd8] sm:$0xff] (!%p391_p9)  ;;  %v3978_v2 = vld [vmem:[%s8016_s1 + $0xc0] sm:$0xff] (!%p391_p9)  ;;  %v5623_v7 = vmov (!%p391_p9), 0.0   ;;  %p433_p10 = scmp.lt.s32.totalorder (!%p391_p9), %s5718_s29, 1  ;;  %vm495_vm0 = vcmask (!%p391_p9), 785408  }
  0x11   : > { %394 = sbr.rel (%p391_p9) target bundleno = 1953 (0x7a1), region = 72  ;;  %v4497_v3 = vpack.c.bf16 (!%p391_p9), %v3981_v1, %v3979_v0  ;;  %v3980_v4 = vld [vmem:[%s8016_s1 + $0xd0] sm:$0xff] (!%p391_p9)  ;;  %v3983_v5 = vld [vmem:[%s8016_s1 + $0xe8] sm:$0xff] (!%p391_p9)  ;;  %v3985_v6 = vld [vmem:[%s8016_s1 + $0xf8] sm:$0xff] (!%p391_p9)  ;;  %572 = vmatprep.mubr.f32.mxu0 (!%p391_p9), %v5623_v7  ;;  %1176 = vmatprep.mubr.f32.mxu1 (!%p391_p9), %v5623_v7  ;;  %vm1675_vm1 = vcmask (!%p391_p9), 326656   ;;  %vm1792_vm2 = vcmask (!%p391_p9), 321536  }
  0x12   : > { %v4499_v8 = vpack.c.bf16 (!%p391_p9), %v3980_v4, %v3978_v2  ;;  %v4501_v9 = vpack.c.bf16 (!%p391_p9), %v3985_v6, %v3983_v5  ;;  %v3982_v10 = vld [vmem:[%s8016_s1 + $0xe0] sm:$0xff] (!%p391_p9)  ;;  %v3984_v11 = vld [vmem:[%s8016_s1 + $0xf0] sm:$0xff] (!%p391_p9)  ;;  %v3987_v12 = vld [vmem:[%s8016_s1 + $0x108] sm:$0xff] (!%p391_p9)  ;;  %vm1895_vm3 = vcmask (!%p391_p9), 1045504   ;;  %vm2140_vm4 = vcmask (!%p391_p9), 1043456   ;;  %s4407_s21 = sshll.u32 (!%p391_p9), %s5718_s29, 4 }
  0x13   : > { %4498 = vmatprep.subr.bf16.mxu0 (!%p391_p9), %v4497_v3  ;;  %4618 = vmatprep.subr.bf16.mxu1 (!%p391_p9), %v4497_v3  ;;  %v3989_v13 = vld [vmem:[%s8016_s1 + $0x118] sm:$0xff] (!%p391_p9)  ;;  %v4503_v14 = vpack.c.bf16 (!%p391_p9), %v3984_v11, %v3982_v10  ;;  %v3986_v16 = vld [vmem:[%s8016_s1 + $0x100] sm:$0xff] (!%p391_p9)  ;;  %v3988_v17 = vld [vmem:[%s8016_s1 + $0x110] sm:$0xff] (!%p391_p9)  ;;  %vm2300_vm5 = vcmask (!%p391_p9), 1041408   ;;  %vm3087_vm6 = vcmask (!%p391_p9), 261120   ;;  %vm3191_vm7 = vcmask (!%p391_p9), 253952   ;;  %s7973_s17 = scalar_lea.hbm (!%p391_p9), %s8028_s13, %s4407_s21 }
  0x14   : > { %4500 = vmatpush1.bf16.msra.mxu0 (!%p391_p9), %v4499_v8  ;;  %4620 = vmatpush1.bf16.msra.mxu1 (!%p391_p9), %v4499_v8  ;;  %v4505_v15 = vpack.c.bf16 (!%p391_p9), %v3989_v13, %v3987_v12  ;;  %v3991_v18 = vld [vmem:[%s8016_s1 + $0x128] sm:$0xff] (!%p391_p9)  ;;  %v3993_v19 = vld [vmem:[%s8016_s1 + $0x138] sm:$0xff] (!%p391_p9)  ;;  %v4507_v20 = vpack.c.bf16 (!%p391_p9), %v3988_v17, %v3986_v16  ;;  %v3990_v22 = vld [vmem:[%s8016_s1 + $0x120] sm:$0xff] (!%p391_p9)  ;;  %vm5625_vm8 = vmmov (!%p391_p9), 0   ;;  %vm3738_vm9 = vcmask (!%p391_p9), 982016  }
  0x15   : > { %4502 = vmatprep.subr.bf16.mxu0 (!%p391_p9), %v4501_v9  ;;  %4622 = vmatprep.subr.bf16.mxu1 (!%p391_p9), %v4501_v9  ;;  %v4509_v21 = vpack.c.bf16 (!%p391_p9), %v3993_v19, %v3991_v18  ;;  %v3992_v23 = vld [vmem:[%s8016_s1 + $0x130] sm:$0xff] (!%p391_p9)  ;;  %v3995_v24 = vld [vmem:[%s8016_s1 + $0x148] sm:$0xff] (!%p391_p9)  ;;  %v3997_v25 = vld [vmem:[%s8016_s1 + $0x158] sm:$0xff] (!%p391_p9)  ;;  %vm3825_vm10 = vcmask (!%p391_p9), 687104   ;;  %vm3902_vm11 = vcmask (!%p391_p9), 73728  }
  0x16   : > { %v4511_v26 = vpack.c.bf16 (!%p391_p9), %v3992_v23, %v3990_v22  ;;  %v4513_v27 = vpack.c.bf16 (!%p391_p9), %v3997_v25, %v3995_v24  ;;  %v3994_v28 = vld [vmem:[%s8016_s1 + $0x140] sm:$0xff] (!%p391_p9)  ;;  %v3996_v29 = vld [vmem:[%s8016_s1 + $0x150] sm:$0xff] (!%p391_p9)  ;;  %v3999_v30 = vld [vmem:[%s8016_s1 + $0x168] sm:$0xff] (!%p391_p9) }
  0x17   : > { %v4001_v31 = vld [vmem:[%s8016_s1 + $0x178] sm:$0xff] (!%p391_p9)  ;;  %v4515_v32 = vpack.c.bf16 (!%p391_p9), %v3996_v29, %v3994_v28  ;;  %v3998_v34 = vld [vmem:[%s8016_s1 + $0x160] sm:$0xff] (!%p391_p9)  ;;  %v4000_v35 = vld [vmem:[%s8016_s1 + $0x170] sm:$0xff] (!%p391_p9) }
  0x18   : > { %4504 = vmatpush1.bf16.msra.mxu0 %v4503_v14  ;;  %4624 = vmatpush1.bf16.msra.mxu1 %v4503_v14  ;;  %s434_s20 = scalar_select %p433_p10, %s5718_s29, 1  ;;  %v4517_v33 = vpack.c.bf16 %v4001_v31, %v3999_v30  ;;  %v443_v36 = vld [vmem:[%s8016_s1 + $0x8] sm:$0xff]  ;;  %v445_v37 = vld [vmem:[%s8016_s1 + $0x18] sm:$0xff]  ;;  %v4519_v38 = vpack.c.bf16 %v4000_v35, %v3998_v34  ;;  %v442_v40 = vld [vmem:[%s8016_s1] sm:$0xff] }
  0x19   : > { %4506 = vmatprep.subr.bf16.mxu0 %v4505_v15  ;;  %4626 = vmatprep.subr.bf16.mxu1 %v4505_v15  ;;  %v4521_v39 = vpack.c.bf16 %v445_v37, %v443_v36  ;;  %v444_v41 = vld [vmem:[%s8016_s1 + $0x10] sm:$0xff]  ;;  %v447_v42 = vld [vmem:[%s8016_s1 + $0x28] sm:$0xff]  ;;  %v449_v43 = vld [vmem:[%s8016_s1 + $0x38] sm:$0xff]  ;;  %s5626_s29 = smov [#allocation4]  }
  0x1a   : > { %s4410_s15 = sshll.u32 %s434_s20, 5  ;;  %v4523_v45 = vpack.c.bf16 %v444_v41, %v442_v40  ;;  %v4525_v47 = vpack.c.bf16 %v449_v43, %v447_v42  ;;  %v446_v48 = vld [vmem:[%s8016_s1 + $0x20] sm:$0xff]  ;;  %v448_v49 = vld [vmem:[%s8016_s1 + $0x30] sm:$0xff]  ;;  %v451_v50 = vld [vmem:[%s8016_s1 + $0x48] sm:$0xff]  ;;  %s5563_s30 = sshll.u32 %s5626_s29, 4  ;;  %s5564_s30 = int_to_ptr.vmem [resolvable:$false] %s5563_s30 }
  0x1b   : > { %s5830_s22 = scalar_lea.vmem %s8015_s0, %s4410_s15  ;;  %v453_v51 = vld [vmem:[%s8016_s1 + $0x58] sm:$0xff]  ;;  %v4527_v52 = vpack.c.bf16 %v448_v49, %v446_v48  ;;  %v450_v56 = vld [vmem:[%s8016_s1 + $0x40] sm:$0xff]  ;;  %v452_v57 = vld [vmem:[%s8016_s1 + $0x50] sm:$0xff]  ;;  %s431_s15 = sand.u32 1, %s5613_s26  }
  0x1c   : > { %4508 = vmatpush1.bf16.msra.mxu0 %v4507_v20  ;;  %4628 = vmatpush1.bf16.msra.mxu1 %v4507_v20  ;;  %v5845_v44 = vld [vmem:[%s5830_s22 + $0x1] sm:$0xff]  ;;  %v5867_v53 = vld [vmem:[%s5830_s22 + $0x9] sm:$0xff]  ;;  %v4529_v55 = vpack.c.bf16 %v453_v51, %v451_v50  ;;  %v457_v59 = vld [vmem:[%s8016_s1 + $0x78] sm:$0xff]  ;;  %v4531_v60 = vpack.c.bf16 %v452_v57, %v450_v56  ;;  %s432_s19 = scalar_lea.vmem [#allocation4], %s431_s15  ;;  %s3905_s20 = scalar_lea.sflag [#allocation5], %s431_s15 }
  0x1d   : > { %4510 = vmatprep.subr.bf16.mxu0 %v4509_v21  ;;  %4630 = vmatprep.subr.bf16.mxu1 %v4509_v21  ;;  %v5848_v46 = vld [vmem:[%s5830_s22 + $0x2] sm:$0xff]  ;;  %v5870_v54 = vld [vmem:[%s5830_s22 + $0xa] sm:$0xff]  ;;  %v5894_v62 = vld [vmem:[%s5830_s22 + $0x12] sm:$0xff]  ;;  %s3917_s23 = sshll.u32 %s432_s19, 4  ;;  %s5565_s16 = scalar_lea.vmem %s5564_s30, 32  ;;  %s7975_s23 = int_to_ptr.vmem [resolvable:$true] %s3917_s23 }
  0x1e   : > { %v455_v58 = vld [vmem:[%s8016_s1 + $0x68] sm:$0xff]  ;;  %v5891_v61 = vld [vmem:[%s5830_s22 + $0x11] sm:$0xff]  ;;  %v454_v0 = vld [vmem:[%s8016_s1 + $0x60] sm:$0xff]  ;;  %s5559_s14 = scalar_lea.vmem %s7975_s23, 16  ;;  %p5566_p0 = scmp.lt.s32.totalorder %s7975_s23, %s5564_s30 }
  0x1f   : > { %v4533_v63 = vpack.c.bf16 %v457_v59, %v455_v58  ;;  %v456_v1 = vld [vmem:[%s8016_s1 + $0x70] sm:$0xff]  ;;  %v459_v2 = vld [vmem:[%s8016_s1 + $0x88] sm:$0xff]  ;;  %v461_v3 = vld [vmem:[%s8016_s1 + $0x98] sm:$0xff]  ;;  %p5560_p11 = scmp.ne.s32.totalorder %s7975_s23, %s5559_s14  ;;  %p5567_p1 = scmp.lt.s32.totalorder %s5565_s16, %s5559_s14 }
  0x20   : > { %4512 = vmatpush1.bf16.msra.mxu0 %v4511_v26  ;;  %4632 = vmatpush1.bf16.msra.mxu1 %v4511_v26  ;;  %v4535_v4 = vpack.c.bf16 %v456_v1, %v454_v0  ;;  %v5915_v5 = vld [vmem:[%s5830_s22 + $0x19] sm:$0x7]  ;;  %v4537_v8 = vpack.c.bf16 %v461_v3, %v459_v2  ;;  %v458_v9 = vld [vmem:[%s8016_s1 + $0x80] sm:$0xff]  ;;  %v460_v10 = vld [vmem:[%s8016_s1 + $0x90] sm:$0xff] }
  0x21   : > { %4514 = vmatprep.subr.bf16.mxu0 %v4513_v27  ;;  %4634 = vmatprep.subr.bf16.mxu1 %v4513_v27  ;;  %v5918_v6 = vld [vmem:[%s5830_s22 + $0x1a] sm:$0x7]  ;;  %v463_v11 = vld [vmem:[%s8016_s1 + $0xa8] sm:$0xff]  ;;  %v4539_v13 = vpack.c.bf16 %v460_v10, %v458_v9  ;;  %v462_v15 = vld [vmem:[%s8016_s1 + $0xa0] sm:$0xff]  ;;  %p5561_p12 = pnand %p5560_p11, %p5735_p5  ;;  %p5568_p2 = por %p5567_p1, %p5566_p0 }
  0x22   : > { %v465_v12 = vld [vmem:[%s8016_s1 + $0xb8] sm:$0xff]  ;;  %v464_v16 = vld [vmem:[%s8016_s1 + $0xb0] sm:$0xff]  ;;  %v4011_v17 = vld [vmem:[%s8016_s1 + $0x188] sm:$0xff] }
  0x23   : > { %v4541_v14 = vpack.c.bf16 %v465_v12, %v463_v11  ;;  %v4013_v18 = vld [vmem:[%s8016_s1 + $0x198] sm:$0xff]  ;;  %v4543_v19 = vpack.c.bf16 %v464_v16, %v462_v15  ;;  %v4010_v21 = vld [vmem:[%s8016_s1 + $0x180] sm:$0xff]  ;;  %v4012_v22 = vld [vmem:[%s8016_s1 + $0x190] sm:$0xff]  ;;  %p5562_p13 = pneg %p5561_p12 }
  0x24   : > { %4516 = vmatpush1.bf16.msra.mxu0 %v4515_v32  ;;  %4636 = vmatpush1.bf16.msra.mxu1 %v4515_v32  ;;  %v4545_v20 = vpack.c.bf16 %v4013_v18, %v4011_v17  ;;  %v4015_v23 = vld [vmem:[%s8016_s1 + $0x1a8] sm:$0xff]  ;;  %v4017_v24 = vld [vmem:[%s8016_s1 + $0x1b8] sm:$0xff]  ;;  %v438_v25 = vld [vmem:[%s5830_s22] sm:$0xff]  ;;  %v4547_v26 = vpack.c.bf16 %v4012_v22, %v4010_v21 }
  0x25   : > { %4518 = vmatprep.subr.bf16.mxu0 %v4517_v33  ;;  %4638 = vmatprep.subr.bf16.mxu1 %v4517_v33  ;;  %v4549_v27 = vpack.c.bf16 %v4017_v24, %v4015_v23  ;;  %v4014_v28 = vld [vmem:[%s8016_s1 + $0x1a0] sm:$0xff]  ;;  %v4016_v29 = vld [vmem:[%s8016_s1 + $0x1b0] sm:$0xff]  ;;  %v4019_v30 = vld [vmem:[%s8016_s1 + $0x1c8] sm:$0xff]  ;;  %p5569_p3 = pnand %p5568_p2, %p5562_p13 }
  0x26   : > { %v4021_v31 = vld [vmem:[%s8016_s1 + $0x1d8] sm:$0xff]  ;;  %v4551_v32 = vpack.c.bf16 %v4016_v29, %v4014_v28  ;;  %v439_v33 = vld [vmem:[%s5830_s22 + $0x8] sm:$0xff]  ;;  %v4018_v35 = vld [vmem:[%s8016_s1 + $0x1c0] sm:$0xff] }
  0x27   : > { %v4553_v34 = vpack.c.bf16 %v4021_v31, %v4019_v30  ;;  %v4020_v36 = vld [vmem:[%s8016_s1 + $0x1d0] sm:$0xff]  ;;  %v4023_v37 = vld [vmem:[%s8016_s1 + $0x1e8] sm:$0xff]  ;;  %v4022_v42 = vld [vmem:[%s8016_s1 + $0x1e0] sm:$0xff] }
  0x28   : > { %4520 = vmatpush1.bf16.msra.mxu0 %v4519_v38  ;;  %4640 = vmatpush1.bf16.msra.mxu1 %v4519_v38  ;;  %v4025_v38 = vld [vmem:[%s8016_s1 + $0x1f8] sm:$0xff]  ;;  %v440_v40 = vld [vmem:[%s5830_s22 + $0x10] sm:$0xff]  ;;  %v4026_v50 = vld [vmem:[%s8016_s1 + $0x200] sm:$0xff] }
  0x29   : > { %4522 = vmatprep.subr.bf16.mxu0 %v4521_v39  ;;  %4642 = vmatprep.subr.bf16.mxu1 %v4521_v39  ;;  %v4555_v39 = vpack.c.bf16 %v4020_v36, %v4018_v35  ;;  %v4557_v41 = vpack.c.bf16 %v4025_v38, %v4023_v37  ;;  %v4024_v43 = vld [vmem:[%s8016_s1 + $0x1f0] sm:$0xff]  ;;  %v441_v48 = vld [vmem:[%s5830_s22 + $0x18] sm:$0x7]  ;;  %v4030_v57 = vld [vmem:[%s8016_s1 + $0x220] sm:$0xff] }
  0x2a   : > { %v4028_v51 = vld [vmem:[%s8016_s1 + $0x210] sm:$0xff]  ;;  %v4039_v59 = vld [vmem:[%s8016_s1 + $0x248] sm:$0xff]  ;;  %v4038_v0 = vld [vmem:[%s8016_s1 + $0x240] sm:$0xff] }
  0x2b   : > { %4002 = vmatmul.mubr.msk.f32.vlgmr.msra.gmra.mrb[0].mxu0 %vm495_vm0, %v5845_v44  ;;  %4094 = vmatmul.mubr.msk.f32.vlgmr.msra.gmra.mrb[0].mxu1 %vm495_vm0, %v5848_v46  ;;  %v4032_v58 = vld [vmem:[%s8016_s1 + $0x230] sm:$0xff]  ;;  %v4043_v2 = vld [vmem:[%s8016_s1 + $0x268] sm:$0xff]  ;;  %v4045_v3 = vld [vmem:[%s8016_s1 + $0x278] sm:$0xff] }
  0x2c   : > { %4524 = vmatpush1.bf16.msra.mxu0 %v4523_v45  ;;  %4644 = vmatpush1.bf16.msra.mxu1 %v4523_v45  ;;  %v4029_v45 = vld [vmem:[%s8016_s1 + $0x218] sm:$0xff]  ;;  %v4040_v1 = vld [vmem:[%s8016_s1 + $0x250] sm:$0xff]  ;;  %v4042_v9 = vld [vmem:[%s8016_s1 + $0x260] sm:$0xff] }
  0x2d   : > { %4526 = vmatprep.subr.bf16.mxu0 %v4525_v47  ;;  %4646 = vmatprep.subr.bf16.mxu1 %v4525_v47  ;;  %v4559_v47 = vpack.c.bf16 %v4024_v43, %v4022_v42  ;;  %v4044_v10 = vld [vmem:[%s8016_s1 + $0x270] sm:$0xff]  ;;  %v4047_v11 = vld [vmem:[%s8016_s1 + $0x288] sm:$0xff]  ;;  %v4049_v12 = vld [vmem:[%s8016_s1 + $0x298] sm:$0xff] }
  0x2e   : > { %578 = vmatprep.mubr.f32.mxu0 %v5623_v7  ;;  %1182 = vmatprep.mubr.f32.mxu1 %v5623_v7  ;;  %v4577_v15 = vpack.c.bf16 %v4049_v12, %v4047_v11  ;;  %v4046_v16 = vld [vmem:[%s8016_s1 + $0x280] sm:$0xff]  ;;  %v4051_v17 = vld [vmem:[%s8016_s1 + $0x2a8] sm:$0xff]  ;;  %v4053_v18 = vld [vmem:[%s8016_s1 + $0x2b8] sm:$0xff] }
  0x2f   : > { %4003 = vmatmul.mubr.msk.f32.gmra.mrb[2].mxu0 %vm495_vm0, %v5867_v53  ;;  %4095 = vmatmul.mubr.msk.f32.gmra.mrb[2].mxu1 %vm495_vm0, %v5870_v54  ;;  %v4581_v21 = vpack.c.bf16 %v4053_v18, %v4051_v17  ;;  %v4050_v22 = vld [vmem:[%s8016_s1 + $0x2a0] sm:$0xff]  ;;  %v4055_v23 = vld [vmem:[%s8016_s1 + $0x2c8] sm:$0xff]  ;;  %v4057_v24 = vld [vmem:[%s8016_s1 + $0x2d8] sm:$0xff] }
  0x30   : > { %4528 = vmatpush1.bf16.msra.mxu0 %v4527_v52  ;;  %4648 = vmatpush1.bf16.msra.mxu1 %v4527_v52  ;;  %v4031_v52 = vld [vmem:[%s8016_s1 + $0x228] sm:$0xff]  ;;  %v4054_v28 = vld [vmem:[%s8016_s1 + $0x2c0] sm:$0xff]  ;;  %v4056_v29 = vld [vmem:[%s8016_s1 + $0x2d0] sm:$0xff] }
  0x31   : > { %4530 = vmatprep.subr.bf16.mxu0 %v4529_v55  ;;  %4650 = vmatprep.subr.bf16.mxu1 %v4529_v55  ;;  %v4563_v55 = vpack.c.bf16 %v4028_v51, %v4026_v50  ;;  %v4061_v30 = vld [vmem:[%s8016_s1 + $0x2f8] sm:$0xff]  ;;  %v4587_v31 = vpack.c.bf16 %v4056_v29, %v4054_v28  ;;  %v4066_v38 = vld [vmem:[%s8016_s1 + $0x300] sm:$0xff]  ;;  %v6188_v51 = vld [vmem:[%s5830_s22 + $0xc] sm:$0xff] }
  0x32   : > { %584 = vmatprep.mubr.f32.mxu0 %v5623_v7  ;;  %1188 = vmatprep.mubr.f32.mxu1 %v5623_v7  ;;  %v4069_v35 = vld [vmem:[%s8016_s1 + $0x318] sm:$0xff]  ;;  %v6169_v43 = vld [vmem:[%s5830_s22 + $0x4] sm:$0xff]  ;;  %v1485_v28 = vld [vmem:[%s5830_s22 + $0xd] sm:$0xff] }
  0x33   : > { %4004 = vmatmul.mubr.msk.f32.gmra.mrb[4].mxu0 %vm495_vm0, %v5891_v61  ;;  %4096 = vmatmul.mubr.msk.f32.gmra.mrb[4].mxu1 %vm495_vm0, %v5894_v62  ;;  %v1633_v18 = vld [vmem:[%s8018_s3] sm:$0xff] }
  0x34   : > { %4532 = vmatpush1.bf16.msra.mxu0 %v4531_v60  ;;  %4652 = vmatpush1.bf16.msra.mxu1 %v4531_v60  ;;  %v4041_v60 = vld [vmem:[%s8016_s1 + $0x258] sm:$0xff] }
  0x35   : > { %4534 = vmatprep.subr.bf16.mxu0 %v4533_v63  ;;  %4654 = vmatprep.subr.bf16.mxu1 %v4533_v63  ;;  %v4569_v63 = vpack.c.bf16 %v4041_v60, %v4039_v59  ;;  %v6209_v59 = vld [vmem:[%s5830_s22 + $0x14] sm:$0xff] }
  0x36   : > { %590 = vmatprep.mubr.f32.mxu0 %v5623_v7  ;;  %1194 = vmatprep.mubr.f32.mxu1 %v5623_v7 }
  0x37   : > { %4005 = vmatmul.mubr.msk.f32.gmra.mrb[6].mxu0 %vm495_vm0, %v5915_v5  ;;  %4097 = vmatmul.mubr.msk.f32.gmra.mrb[6].mxu1 %vm495_vm0, %v5918_v6 }
  0x38   : > { %4536 = vmatpush1.bf16.msra.mxu0 %v4535_v4  ;;  %4656 = vmatpush1.bf16.msra.mxu1 %v4535_v4  ;;  %v4571_v4 = vpack.c.bf16 %v4040_v1, %v4038_v0  ;;  %v4083_v0 = vld [vmem:[%s8016_s1 + $0x388] sm:$0xff]  ;;  %v4085_v1 = vld [vmem:[%s8016_s1 + $0x398] sm:$0xff] }
  0x39   : > { %4538 = vmatprep.subr.bf16.mxu0 %v4537_v8  ;;  %4658 = vmatprep.subr.bf16.mxu1 %v4537_v8  ;;  %v4573_v8 = vpack.c.bf16 %v4045_v3, %v4043_v2  ;;  %v6230_v3 = vld [vmem:[%s5830_s22 + $0x1c] sm:$0x7] }
  0x3a   : > { %673 = vmatprep.mubr.f32.mxu0 %v5623_v7  ;;  %1265 = vmatprep.mubr.f32.mxu1 %v5623_v7 }
  0x3c   : > { %4540 = vmatpush1.bf16.msra.mxu0 %v4539_v13  ;;  %4660 = vmatpush1.bf16.msra.mxu1 %v4539_v13  ;;  %v4575_v13 = vpack.c.bf16 %v4044_v10, %v4042_v9  ;;  %v4087_v9 = vld [vmem:[%s8016_s1 + $0x3a8] sm:$0xff]  ;;  %v4089_v10 = vld [vmem:[%s8016_s1 + $0x3b8] sm:$0xff] }
  0x3d   : > { %4542 = vmatprep.subr.bf16.mxu0 %v4541_v14  ;;  %4662 = vmatprep.subr.bf16.mxu1 %v4541_v14  ;;  %v6080_v14 = vld [vmem:[%s5830_s22 + $0xb] sm:$0xff]  ;;  %v4613_v12 = vpack.c.bf16 %v4089_v10, %v4087_v9 }
  0x3e   : > { %v1667_v9 = vld [vmem:[%s8018_s3 + $0x110] sm:$0xff] }
  0x40   : > { %4544 = vmatpush1.bf16.msra.mxu0 %v4543_v19  ;;  %4664 = vmatpush1.bf16.msra.mxu1 %v4543_v19 }
  0x41   : > { %4546 = vmatprep.subr.bf16.mxu0 %v4545_v20  ;;  %4666 = vmatprep.subr.bf16.mxu1 %v4545_v20  ;;  %v6101_v20 = vld [vmem:[%s5830_s22 + $0x13] sm:$0xff] }
  0x43   : > { %4006 = vmatmul.mubr.msk.f32.vlgmr.msra.gmra.mrb[0].mxu0 %vm495_vm0, %v438_v25  ;;  %4098 = vmatmul.mubr.msk.f32.vlgmr.msra.gmra.mrb[0].mxu1 %vm495_vm0, %v5845_v44  ;;  %v4027_v44 = vld [vmem:[%s8016_s1 + $0x208] sm:$0xff] }
  0x44   : > { %4548 = vmatpush1.bf16.msra.mxu0 %v4547_v26  ;;  %4668 = vmatpush1.bf16.msra.mxu1 %v4547_v26  ;;  %v4561_v49 = vpack.c.bf16 %v4029_v45, %v4027_v44  ;;  %v6122_v26 = vld [vmem:[%s5830_s22 + $0x1b] sm:$0x7]  ;;  %v4070_v45 = vld [vmem:[%s8016_s1 + $0x320] sm:$0xff] }
  0x45   : > { %4550 = vmatprep.subr.bf16.mxu0 %v4549_v27  ;;  %4670 = vmatprep.subr.bf16.mxu1 %v4549_v27  ;;  %v4585_v27 = vpack.c.bf16 %v4057_v24, %v4055_v23  ;;  %v1637_v24 = vld [vmem:[%s8018_s3 + $0x20] sm:$0xff] }
  0x46   : > { %679 = vmatprep.mubr.f32.mxu0 %v5623_v7  ;;  %1271 = vmatprep.mubr.f32.mxu1 %v5623_v7 }
  0x47   : > { %4007 = vmatmul.mubr.msk.f32.gmra.mrb[2].mxu0 %vm495_vm0, %v439_v33  ;;  %4099 = vmatmul.mubr.msk.f32.gmra.mrb[2].mxu1 %vm495_vm0, %v5867_v53  ;;  %v4033_v53 = vld [vmem:[%s8016_s1 + $0x238] sm:$0xff]  ;;  %v4058_v33 = vld [vmem:[%s8016_s1 + $0x2e0] sm:$0xff] }
  0x48   : > { %4552 = vmatpush1.bf16.msra.mxu0 %v4551_v32  ;;  %4672 = vmatpush1.bf16.msra.mxu1 %v4551_v32  ;;  %v4565_v56 = vpack.c.bf16 %v4033_v53, %v4031_v52  ;;  %v4074_v53 = vld [vmem:[%s8016_s1 + $0x340] sm:$0xff] }
  0x49   : > { %4554 = vmatprep.subr.bf16.mxu0 %v4553_v34  ;;  %4674 = vmatprep.subr.bf16.mxu1 %v4553_v34  ;;  %v4060_v34 = vld [vmem:[%s8016_s1 + $0x2f0] sm:$0xff] }
  0x4a   : > { %685 = vmatprep.mubr.f32.mxu0 %v5623_v7  ;;  %1277 = vmatprep.mubr.f32.mxu1 %v5623_v7  ;;  %v4591_v36 = vpack.c.bf16 %v4060_v34, %v4058_v33  ;;  %v1648_v33 = vld [vmem:[%s8018_s3 + $0x78] sm:$0xff] }
  0x4b   : > { %4008 = vmatmul.mubr.msk.f32.gmra.mrb[4].mxu0 %vm495_vm0, %v440_v40  ;;  %4100 = vmatmul.mubr.msk.f32.gmra.mrb[4].mxu1 %vm495_vm0, %v5891_v61  ;;  %v4567_v61 = vpack.c.bf16 %v4032_v58, %v4030_v57  ;;  %v4071_v40 = vld [vmem:[%s8016_s1 + $0x328] sm:$0xff]  ;;  %v4081_v57 = vld [vmem:[%s8016_s1 + $0x378] sm:$0xff] }
  0x4c   : > { %4556 = vmatpush1.bf16.msra.mxu0 %v4555_v39  ;;  %4676 = vmatpush1.bf16.msra.mxu1 %v4555_v39  ;;  %v4068_v39 = vld [vmem:[%s8016_s1 + $0x310] sm:$0xff] }
  0x4d   : > { %4558 = vmatprep.subr.bf16.mxu0 %v4557_v41  ;;  %4678 = vmatprep.subr.bf16.mxu1 %v4557_v41  ;;  %v4073_v41 = vld [vmem:[%s8016_s1 + $0x338] sm:$0xff]  ;;  %v4595_v42 = vpack.c.bf16 %v4068_v39, %v4066_v38  ;;  %v1650_v38 = vld [vmem:[%s8018_s3 + $0x88] sm:$0xff] }
  0x4e   : > { %691 = vmatprep.mubr.f32.mxu0 %v5623_v7  ;;  %1283 = vmatprep.mubr.f32.mxu1 %v5623_v7  ;;  %v4597_v44 = vpack.c.bf16 %v4073_v41, %v4071_v40  ;;  %v1486_v34 = vld [vmem:[%s5830_s22 + $0x15] sm:$0xff]  ;;  %v1487_v40 = vld [vmem:[%s5830_s22 + $0x1d] sm:$0x7] }
  0x4f   : > { %4009 = vmatmul.mubr.msk.f32.gmra.mrb[6].mxu0 %vm495_vm0, %v441_v48  ;;  %4101 = vmatmul.mubr.msk.f32.gmra.mrb[6].mxu1 %vm495_vm0, %v5915_v5  ;;  %v6061_v5 = vld [vmem:[%s5830_s22 + $0x3] sm:$0xff]  ;;  %v1652_v39 = vld [vmem:[%s8018_s3 + $0x98] sm:$0xff] }
  0x50   : > { %4560 = vmatpush1.bf16.msra.mxu0 %v4559_v47  ;;  %4680 = vmatpush1.bf16.msra.mxu1 %v4559_v47  ;;  %v4072_v47 = vld [vmem:[%s8016_s1 + $0x330] sm:$0xff]  ;;  %v4075_v48 = vld [vmem:[%s8016_s1 + $0x348] sm:$0xff] }
  0x51   : > { %4562 = vmatprep.subr.bf16.mxu0 %v4561_v49  ;;  %4682 = vmatprep.subr.bf16.mxu1 %v4561_v49  ;;  %v4077_v49 = vld [vmem:[%s8016_s1 + $0x358] sm:$0xff]  ;;  %v4599_v50 = vpack.c.bf16 %v4072_v47, %v4070_v45  ;;  %v1654_v45 = vld [vmem:[%s8018_s3 + $0xa8] sm:$0xff] }
  0x52   : > { %803 = vmatprep.mubr.f32.mxu0 %v5623_v7  ;;  %1354 = vmatprep.mubr.f32.mxu1 %v5623_v7  ;;  %v4601_v52 = vpack.c.bf16 %v4077_v49, %v4075_v48  ;;  %v1656_v47 = vld [vmem:[%s8018_s3 + $0xb8] sm:$0xff] }
  0x53   : > { %v4757_v49 = vpack.c.bf16 %v1656_v47, %v1654_v45  ;;  %v4141_v45 = vld [vmem:[%s8019_s4 + $0x208] sm:$0xff] }
  0x54   : > { %4564 = vmatpush1.bf16.msra.mxu0 %v4563_v55  ;;  %4684 = vmatpush1.bf16.msra.mxu1 %v4563_v55  ;;  %v4076_v55 = vld [vmem:[%s8016_s1 + $0x350] sm:$0xff] }
  0x55   : > { %4566 = vmatprep.subr.bf16.mxu0 %v4565_v56  ;;  %4686 = vmatprep.subr.bf16.mxu1 %v4565_v56  ;;  %v4079_v56 = vld [vmem:[%s8016_s1 + $0x368] sm:$0xff]  ;;  %v4603_v58 = vpack.c.bf16 %v4076_v55, %v4074_v53  ;;  %v1660_v53 = vld [vmem:[%s8018_s3 + $0xd8] sm:$0xff] }
  0x56   : > { %v4605_v60 = vpack.c.bf16 %v4081_v57, %v4079_v56  ;;  %v1657_v57 = vld [vmem:[%s8018_s3 + $0xc0] sm:$0xff] }
  0x58   : > { %4568 = vmatpush1.bf16.msra.mxu0 %v4567_v61  ;;  %4688 = vmatpush1.bf16.msra.mxu1 %v4567_v61  ;;  %v4078_v61 = vld [vmem:[%s8016_s1 + $0x360] sm:$0xff] }
  0x59   : > { %4570 = vmatprep.subr.bf16.mxu0 %v4569_v63  ;;  %4690 = vmatprep.subr.bf16.mxu1 %v4569_v63  ;;  %v4080_v63 = vld [vmem:[%s8016_s1 + $0x370] sm:$0xff] }
  0x5a   : > { %v4607_v2 = vpack.c.bf16 %v4080_v63, %v4078_v61 }
  0x5b   : > { %4034 = vmatmul.mubr.msk.f32.vlgmr.msra.gmra.mrb[0].mxu0 %vm495_vm0, %v5848_v46  ;;  %4102 = vmatmul.mubr.msk.f32.vlgmr.msra.gmra.mrb[0].mxu1 %vm495_vm0, %v6061_v5  ;;  %v4048_v46 = vld [vmem:[%s8016_s1 + $0x290] sm:$0xff] }
  0x5c   : > { %4572 = vmatpush1.bf16.msra.mxu0 %v4571_v4  ;;  %4692 = vmatpush1.bf16.msra.mxu1 %v4571_v4  ;;  %v4579_v19 = vpack.c.bf16 %v4048_v46, %v4046_v16  ;;  %v4609_v4 = vpack.c.bf16 %v4085_v1, %v4083_v0  ;;  %v1636_v16 = vld [vmem:[%s8018_s3 + $0x18] sm:$0xff]  ;;  %v1661_v0 = vld [vmem:[%s8018_s3 + $0xe0] sm:$0xff]  ;;  %v1663_v1 = vld [vmem:[%s8018_s3 + $0xf0] sm:$0xff] }
  0x5d   : > { %4574 = vmatprep.subr.bf16.mxu0 %v4573_v8  ;;  %4694 = vmatprep.subr.bf16.mxu1 %v4573_v8  ;;  %v4084_v8 = vld [vmem:[%s8016_s1 + $0x390] sm:$0xff] }
  0x5e   : > { %809 = vmatprep.mubr.f32.mxu0 %v5623_v7  ;;  %1360 = vmatprep.mubr.f32.mxu1 %v5623_v7 }
  0x5f   : > { %4035 = vmatmul.mubr.msk.f32.gmra.mrb[2].mxu0 %vm495_vm0, %v5870_v54  ;;  %4103 = vmatmul.mubr.msk.f32.gmra.mrb[2].mxu1 %vm495_vm0, %v6080_v14  ;;  %v4052_v54 = vld [vmem:[%s8016_s1 + $0x2b0] sm:$0xff] }
  0x60   : > { %4576 = vmatpush1.bf16.msra.mxu0 %v4575_v13  ;;  %4696 = vmatpush1.bf16.msra.mxu1 %v4575_v13  ;;  %v4583_v25 = vpack.c.bf16 %v4052_v54, %v4050_v22  ;;  %v4086_v13 = vld [vmem:[%s8016_s1 + $0x3a0] sm:$0xff] }
  0x61   : > { %4578 = vmatprep.subr.bf16.mxu0 %v4577_v15  ;;  %4698 = vmatprep.subr.bf16.mxu1 %v4577_v15  ;;  %v1634_v15 = vld [vmem:[%s8018_s3 + $0x8] sm:$0xff] }
  0x62   : > { %815 = vmatprep.mubr.f32.mxu0 %v5623_v7  ;;  %1366 = vmatprep.mubr.f32.mxu1 %v5623_v7  ;;  %v4737_v17 = vpack.c.bf16 %v1636_v16, %v1634_v15  ;;  %v1484_v22 = vld [vmem:[%s5830_s22 + $0x5] sm:$0xff]  ;;  %v1671_v15 = vld [vmem:[%s8018_s3 + $0x130] sm:$0xff] }
  0x63   : > { %4036 = vmatmul.mubr.msk.f32.gmra.mrb[4].mxu0 %vm495_vm0, %v5894_v62  ;;  %4104 = vmatmul.mubr.msk.f32.gmra.mrb[4].mxu1 %vm495_vm0, %v6101_v20  ;;  %v4059_v62 = vld [vmem:[%s8016_s1 + $0x2e8] sm:$0xff] }
  0x64   : > { %4580 = vmatpush1.bf16.msra.mxu0 %v4579_v19  ;;  %4700 = vmatpush1.bf16.msra.mxu1 %v4579_v19  ;;  %v4589_v32 = vpack.c.bf16 %v4061_v30, %v4059_v62  ;;  %v1635_v19 = vld [vmem:[%s8018_s3 + $0x10] sm:$0xff]  ;;  %v1641_v30 = vld [vmem:[%s8018_s3 + $0x40] sm:$0xff] }
  0x65   : > { %4582 = vmatprep.subr.bf16.mxu0 %v4581_v21  ;;  %4702 = vmatprep.subr.bf16.mxu1 %v4581_v21  ;;  %v1640_v21 = vld [vmem:[%s8018_s3 + $0x38] sm:$0xff]  ;;  %v4739_v54 = vpack.c.bf16 %v1635_v19, %v1633_v18  ;;  %v4121_v19 = vld [vmem:[%s8019_s4 + $0x168] sm:$0xff] }
  0x66   : > { %821 = vmatprep.mubr.f32.mxu0 %v5623_v7  ;;  %1372 = vmatprep.mubr.f32.mxu1 %v5623_v7  ;;  %v4119_v18 = vld [vmem:[%s8019_s4 + $0x158] sm:$0xff] }
  0x67   : > { %4037 = vmatmul.mubr.msk.f32.gmra.mrb[6].mxu0 %vm495_vm0, %v5918_v6  ;;  %4105 = vmatmul.mubr.msk.f32.gmra.mrb[6].mxu1 %vm495_vm0, %v6122_v26  ;;  %v4067_v6 = vld [vmem:[%s8016_s1 + $0x308] sm:$0xff] }
  0x68   : > { %4584 = vmatpush1.bf16.msra.mxu0 %v4583_v25  ;;  %4704 = vmatpush1.bf16.msra.mxu1 %v4583_v25  ;;  %v4593_v37 = vpack.c.bf16 %v4069_v35, %v4067_v6  ;;  %v1639_v25 = vld [vmem:[%s8018_s3 + $0x30] sm:$0xff] }
  0x69   : > { %4586 = vmatprep.subr.bf16.mxu0 %v4585_v27  ;;  %4706 = vmatprep.subr.bf16.mxu1 %v4585_v27  ;;  %v1644_v27 = vld [vmem:[%s8018_s3 + $0x58] sm:$0xff]  ;;  %v4743_v29 = vpack.c.bf16 %v1639_v25, %v1637_v24 }
  0x6a   : > { %941 = vmatprep.mubr.f32.mxu0 %v5623_v7  ;;  %1451 = vmatprep.mubr.f32.mxu1 %v5623_v7 }
  0x6c   : > { %4588 = vmatpush1.bf16.msra.mxu0 %v4587_v31  ;;  %4708 = vmatpush1.bf16.msra.mxu1 %v4587_v31  ;;  %v1643_v31 = vld [vmem:[%s8018_s3 + $0x50] sm:$0xff] }
  0x6d   : > { %4590 = vmatprep.subr.bf16.mxu0 %v4589_v32  ;;  %4710 = vmatprep.subr.bf16.mxu1 %v4589_v32  ;;  %v1646_v32 = vld [vmem:[%s8018_s3 + $0x68] sm:$0xff]  ;;  %v4747_v6 = vpack.c.bf16 %v1643_v31, %v1641_v30  ;;  %v4126_v31 = vld [vmem:[%s8019_s4 + $0x190] sm:$0xff] }
  0x6e   : > { %v4749_v35 = vpack.c.bf16 %v1648_v33, %v1646_v32  ;;  %v4128_v32 = vld [vmem:[%s8019_s4 + $0x1a0] sm:$0xff]  ;;  %v4131_v33 = vld [vmem:[%s8019_s4 + $0x1b8] sm:$0xff] }
  0x70   : > { %4592 = vmatpush1.bf16.msra.mxu0 %v4591_v36  ;;  %4712 = vmatpush1.bf16.msra.mxu1 %v4591_v36  ;;  %v1645_v36 = vld [vmem:[%s8018_s3 + $0x60] sm:$0xff] }
  0x71   : > { %4594 = vmatprep.subr.bf16.mxu0 %v4593_v37  ;;  %4714 = vmatprep.subr.bf16.mxu1 %v4593_v37  ;;  %v1647_v37 = vld [vmem:[%s8018_s3 + $0x70] sm:$0xff] }
  0x72   : > { %v4751_v41 = vpack.c.bf16 %v1647_v37, %v1645_v36  ;;  %v4130_v36 = vld [vmem:[%s8019_s4 + $0x1b0] sm:$0xff]  ;;  %v4132_v37 = vld [vmem:[%s8019_s4 + $0x1c0] sm:$0xff] }
  0x73   : > { %4062 = vmatmul.mubr.msk.f32.vlgmr.msra.gmra.mrb[0].mxu0 %vm495_vm0, %v6061_v5  ;;  %4106 = vmatmul.mubr.msk.f32.vlgmr.msra.gmra.mrb[0].mxu1 %vm495_vm0, %v6169_v43  ;;  %v4082_v5 = vld [vmem:[%s8016_s1 + $0x380] sm:$0xff] }
  0x74   : > { %4596 = vmatpush1.bf16.msra.mxu0 %v4595_v42  ;;  %4716 = vmatpush1.bf16.msra.mxu1 %v4595_v42  ;;  %v4611_v11 = vpack.c.bf16 %v4084_v8, %v4082_v5  ;;  %v4753_v42 = vpack.c.bf16 %v1652_v39, %v1650_v38  ;;  %v1665_v8 = vld [vmem:[%s8018_s3 + $0x100] sm:$0xff]  ;;  %v4135_v38 = vld [vmem:[%s8019_s4 + $0x1d8] sm:$0xff]  ;;  %v4137_v39 = vld [vmem:[%s8019_s4 + $0x1e8] sm:$0xff] }
  0x75   : > { %4598 = vmatprep.subr.bf16.mxu0 %v4597_v44  ;;  %4718 = vmatprep.subr.bf16.mxu1 %v4597_v44  ;;  %v1651_v44 = vld [vmem:[%s8018_s3 + $0x90] sm:$0xff]  ;;  %v4771_v10 = vpack.c.bf16 %v1667_v9, %v1665_v8 }
  0x76   : > { %947 = vmatprep.mubr.f32.mxu0 %v5623_v7  ;;  %1457 = vmatprep.mubr.f32.mxu1 %v5623_v7 }
  0x77   : > { %4063 = vmatmul.mubr.msk.f32.gmra.mrb[2].mxu0 %vm495_vm0, %v6080_v14  ;;  %4107 = vmatmul.mubr.msk.f32.gmra.mrb[2].mxu1 %vm495_vm0, %v6188_v51  ;;  %v4088_v14 = vld [vmem:[%s8016_s1 + $0x3b0] sm:$0xff] }
  0x78   : > { %4600 = vmatpush1.bf16.msra.mxu0 %v4599_v50  ;;  %4720 = vmatpush1.bf16.msra.mxu1 %v4599_v50  ;;  %v4615_v46 = vpack.c.bf16 %v4088_v14, %v4086_v13  ;;  %v1653_v50 = vld [vmem:[%s8018_s3 + $0xa0] sm:$0xff] }
  0x79   : > { %4602 = vmatprep.subr.bf16.mxu0 %v4601_v52  ;;  %4722 = vmatprep.subr.bf16.mxu1 %v4601_v52  ;;  %v1658_v52 = vld [vmem:[%s8018_s3 + $0xc8] sm:$0xff]  ;;  %v1669_v14 = vld [vmem:[%s8018_s3 + $0x120] sm:$0xff] }
  0x7a   : > { %953 = vmatprep.mubr.f32.mxu0 %v5623_v7  ;;  %1463 = vmatprep.mubr.f32.mxu1 %v5623_v7  ;;  %v4761_v56 = vpack.c.bf16 %v1660_v53, %v1658_v52  ;;  %v4775_v16 = vpack.c.bf16 %v1671_v15, %v1669_v14  ;;  %v1607_v52 = vlaneseq }
  0x7b   : > { %4064 = vmatmul.mubr.msk.f32.gmra.mrb[4].mxu0 %vm495_vm0, %v6101_v20  ;;  %4108 = vmatmul.mubr.msk.f32.gmra.mrb[4].mxu1 %vm495_vm0, %v6209_v59  ;;  %v1638_v20 = vld [vmem:[%s8018_s3 + $0x28] sm:$0xff] }
  0x7c   : > { %4604 = vmatpush1.bf16.msra.mxu0 %v4603_v58  ;;  %4724 = vmatpush1.bf16.msra.mxu1 %v4603_v58  ;;  %v4741_v23 = vpack.c.bf16 %v1640_v21, %v1638_v20  ;;  %v1659_v58 = vld [vmem:[%s8018_s3 + $0xd0] sm:$0xff]  ;;  %v4777_v21 = vpack.c.bf16 %v4121_v19, %v4119_v18  ;;  %v1608_v53 = vshrl.u32 %v1607_v52, 7  ;;  %v4152_v52 = vld [vmem:[%s8019_s4 + $0x260] sm:$0xff] }
  0x7d   : > { %4606 = vmatprep.subr.bf16.mxu0 %v4605_v60  ;;  %4726 = vmatprep.subr.bf16.mxu1 %v4605_v60  ;;  %v1664_v60 = vld [vmem:[%s8018_s3 + $0xf8] sm:$0xff]  ;;  %v4763_v61 = vpack.c.bf16 %v1659_v58, %v1657_v57  ;;  %v4118_v20 = vld [vmem:[%s8019_s4 + $0x150] sm:$0xff] }
  0x7e   : > { %959 = vmatprep.mubr.f32.mxu0 %v5623_v7  ;;  %1469 = vmatprep.mubr.f32.mxu1 %v5623_v7  ;;  %v6516_v57 = vsub.s32 1, %v1608_v53 }
  0x7f   : > { %4065 = vmatmul.mubr.msk.f32.gmra.mrb[6].mxu0 %vm495_vm0, %v6122_v26  ;;  %4109 = vmatmul.mubr.msk.f32.gmra.mrb[6].mxu1 %vm495_vm0, %v6230_v3  ;;  %v1642_v26 = vld [vmem:[%s8018_s3 + $0x48] sm:$0xff] }
  0x80   : > { %4608 = vmatpush1.bf16.msra.mxu0 %v4607_v2  ;;  %4728 = vmatpush1.bf16.msra.mxu1 %v4607_v2  ;;  %v4745_v62 = vpack.c.bf16 %v1644_v27, %v1642_v26  ;;  %v1666_v2 = vld [vmem:[%s8018_s3 + $0x108] sm:$0xff]  ;;  %v4122_v26 = vld [vmem:[%s8019_s4 + $0x170] sm:$0xff]  ;;  %v4124_v27 = vld [vmem:[%s8019_s4 + $0x180] sm:$0xff] }
  0x81   : > { %4610 = vmatprep.subr.bf16.mxu0 %v4609_v4  ;;  %4730 = vmatprep.subr.bf16.mxu1 %v4609_v4  ;;  %v4767_v4 = vpack.c.bf16 %v1663_v1, %v1661_v0 }
  0x82   : > { %1079 = vmatprep.mubr.f32.mxu0 %v5623_v7  ;;  %1564 = vmatprep.mubr.f32.mxu1 %v5623_v7 }
  0x84   : > { %4612 = vmatpush1.bf16.msra.mxu0 %v4611_v11  ;;  %4732 = vmatpush1.bf16.msra.mxu1 %v4611_v11  ;;  %v1670_v11 = vld [vmem:[%s8018_s3 + $0x128] sm:$0xff] }
  0x85   : > { %4614 = vmatprep.subr.bf16.mxu0 %v4613_v12  ;;  %4734 = vmatprep.subr.bf16.mxu1 %v4613_v12  ;;  %v1672_v12 = vld [vmem:[%s8018_s3 + $0x138] sm:$0xff] }
  0x86   : > { %v4773_v13 = vpack.c.bf16 %v1672_v12, %v1670_v11 }
  0x88   : > { %4616 = vmatpush1.bf16.msra.mxu0 %v4615_v46  ;;  %4736 = vmatpush1.bf16.msra.mxu1 %v4615_v46  ;;  %v1674_v46 = vld [vmem:[%s8018_s3 + $0x148] sm:$0xff] }
  0x89   : > { %4738 = vmatprep.subr.bf16.mxu0 %v4737_v17  ;;  %v1673_v17 = vld [vmem:[%s8018_s3 + $0x140] sm:$0xff]  ;;  %4778 = vmatprep.subr.bf16.mxu1 %v4777_v21 }
  0x8b   : > { %4090 = vmatmul.mubr.msk.f32.vlgmr.msra.gmra.mrb[0].mxu0 %vm495_vm0, %v6169_v43  ;;  %4110 = vmatmul.mubr.msk.f32.vlgmr.msra.gmra.mrb[0].mxu1 %vm495_vm0, %v1484_v22  ;;  %v1649_v43 = vld [vmem:[%s8018_s3 + $0x80] sm:$0xff] }
  0x8c   : > { %1085 = vmatprep.mubr.f32.mxu0 %v5623_v7  ;;  %1570 = vmatprep.mubr.f32.mxu1 %v5623_v7  ;;  %v4755_v48 = vpack.c.bf16 %v1651_v44, %v1649_v43  ;;  %v4120_v22 = vld [vmem:[%s8019_s4 + $0x160] sm:$0xff]  ;;  %v4139_v44 = vld [vmem:[%s8019_s4 + $0x1f8] sm:$0xff] }
  0x8d   : > { %4740 = vmatpush1.bf16.msra.mxu0 %v4739_v54  ;;  %v4123_v54 = vld [vmem:[%s8019_s4 + $0x178] sm:$0xff]  ;;  %v6424_v24 = vpack.c.bf16 %v4120_v22, %v4118_v20  ;;  %v4136_v43 = vld [vmem:[%s8019_s4 + $0x1e0] sm:$0xff] }
  0x8e   : > { %4742 = vmatprep.subr.bf16.mxu0 %v4741_v23  ;;  %v4125_v23 = vld [vmem:[%s8019_s4 + $0x188] sm:$0xff] }
  0x8f   : > { %4091 = vmatmul.mubr.msk.f32.gmra.mrb[2].mxu0 %vm495_vm0, %v6188_v51  ;;  %4111 = vmatmul.mubr.msk.f32.gmra.mrb[2].mxu1 %vm495_vm0, %v1485_v28  ;;  %v1655_v51 = vld [vmem:[%s8018_s3 + $0xb0] sm:$0xff]  ;;  %v6426_v25 = vpack.c.bf16 %v4125_v23, %v4123_v54  ;;  %v4127_v28 = vld [vmem:[%s8019_s4 + $0x198] sm:$0xff] }
  0x90   : > { %1091 = vmatprep.mubr.f32.mxu0 %v5623_v7  ;;  %1576 = vmatprep.mubr.f32.mxu1 %v5623_v7  ;;  %v4759_v55 = vpack.c.bf16 %v1655_v51, %v1653_v50  ;;  %v4140_v50 = vld [vmem:[%s8019_s4 + $0x200] sm:$0xff] }
  0x91   : > { %4744 = vmatpush1.bf16.msra.mxu0 %v4743_v29  ;;  %v4129_v29 = vld [vmem:[%s8019_s4 + $0x1a8] sm:$0xff]  ;;  %4780 = vmatpush1.bf16.msra.mxu1 %v6424_v24 }
  0x92   : > { %4746 = vmatprep.subr.bf16.mxu0 %v4745_v62  ;;  %v6441_v62 = vpack.c.bf16 %v4124_v27, %v4122_v26  ;;  %4782 = vmatprep.subr.bf16.mxu1 %v6426_v25  ;;  %v6444_v30 = vpack.c.bf16 %v4129_v29, %v4127_v28 }
  0x93   : > { %4092 = vmatmul.mubr.msk.f32.gmra.mrb[4].mxu0 %vm495_vm0, %v6209_v59  ;;  %4112 = vmatmul.mubr.msk.f32.gmra.mrb[4].mxu1 %vm495_vm0, %v1486_v34  ;;  %v1662_v59 = vld [vmem:[%s8018_s3 + $0xe8] sm:$0xff] }
  0x94   : > { %1097 = vmatprep.mubr.f32.mxu0 %v5623_v7  ;;  %1582 = vmatprep.mubr.f32.mxu1 %v5623_v7  ;;  %v4765_v63 = vpack.c.bf16 %v1664_v60, %v1662_v59  ;;  %v4133_v34 = vld [vmem:[%s8019_s4 + $0x1c8] sm:$0xff] }
  0x95   : > { %4748 = vmatpush1.bf16.msra.mxu0 %v4747_v6  ;;  %4784 = vmatpush1.bf16.msra.mxu1 %v6441_v62  ;;  %v6459_v6 = vpack.c.bf16 %v4128_v32, %v4126_v31 }
  0x96   : > { %4750 = vmatprep.subr.bf16.mxu0 %v4749_v35  ;;  %4786 = vmatprep.subr.bf16.mxu1 %v6444_v30  ;;  %v6462_v35 = vpack.c.bf16 %v4133_v34, %v4131_v33 }
  0x97   : > { %4093 = vmatmul.mubr.msk.f32.gmra.mrb[6].mxu0 %vm495_vm0, %v6230_v3  ;;  %4113 = vmatmul.mubr.msk.f32.gmra.mrb[6].mxu1 %vm495_vm0, %v1487_v40  ;;  %v1668_v3 = vld [vmem:[%s8018_s3 + $0x118] sm:$0xff]  ;;  %v6477_v40 = vpack.c.bf16 %v4132_v37, %v4130_v36 }
  0x98   : > { %v4769_v5 = vpack.c.bf16 %v1668_v3, %v1666_v2 }
  0x99   : > { %4752 = vmatpush1.bf16.msra.mxu0 %v4751_v41  ;;  %4788 = vmatpush1.bf16.msra.mxu1 %v6459_v6  ;;  %v6480_v41 = vpack.c.bf16 %v4137_v39, %v4135_v38  ;;  %v4142_v38 = vld [vmem:[%s8019_s4 + $0x210] sm:$0xff]  ;;  %v4144_v39 = vld [vmem:[%s8019_s4 + $0x220] sm:$0xff] }
  0x9a   : > { %4754 = vmatprep.subr.bf16.mxu0 %v4753_v42  ;;  %4790 = vmatprep.subr.bf16.mxu1 %v6462_v35  ;;  %v4134_v42 = vld [vmem:[%s8019_s4 + $0x1d0] sm:$0xff] }
  0x9b   : > { %v6495_v47 = vpack.c.bf16 %v4136_v43, %v4134_v42  ;;  %v4149_v42 = vld [vmem:[%s8019_s4 + $0x248] sm:$0xff] }
  0x9d   : > { %4756 = vmatpush1.bf16.msra.mxu0 %v4755_v48  ;;  %4792 = vmatpush1.bf16.msra.mxu1 %v6477_v40  ;;  %v6498_v48 = vpack.c.bf16 %v4141_v45, %v4139_v44  ;;  %v4146_v44 = vld [vmem:[%s8019_s4 + $0x230] sm:$0xff]  ;;  %v4148_v45 = vld [vmem:[%s8019_s4 + $0x240] sm:$0xff] }
  0x9e   : > { %4758 = vmatprep.subr.bf16.mxu0 %v4757_v49  ;;  %4794 = vmatprep.subr.bf16.mxu1 %v6480_v41  ;;  %v4138_v49 = vld [vmem:[%s8019_s4 + $0x1f0] sm:$0xff] }
  0x9f   : > { %v6507_v51 = vpack.c.bf16 %v4140_v50, %v4138_v49  ;;  %v4153_v49 = vld [vmem:[%s8019_s4 + $0x268] sm:$0xff] }
  0xa1   : > { %4760 = vmatpush1.bf16.msra.mxu0 %v4759_v55  ;;  %4796 = vmatpush1.bf16.msra.mxu1 %v6495_v47  ;;  %v6511_v55 = vsub.s32 0, %v1608_v53 }
  0xa2   : > { %4762 = vmatprep.subr.bf16.mxu0 %v4761_v56  ;;  %4798 = vmatprep.subr.bf16.mxu1 %v6498_v48  ;;  %v1605_v56 = vld [vmem:[%s8017_s2] sm:$0x3] }
  0xa3   : > { %v1610_v58 = vrot.slane %v1605_v56, %v6511_v55 }
  0xa5   : > { %4764 = vmatpush1.bf16.msra.mxu0 %v4763_v61  ;;  %4800 = vmatpush1.bf16.msra.mxu1 %v6507_v51  ;;  %v1614_v61 = vrot.slane %v1605_v56, %v6516_v57  ;;  %v4155_v56 = vld [vmem:[%s8019_s4 + $0x278] sm:$0xff] }
  0xa6   : > { %4766 = vmatprep.subr.bf16.mxu0 %v4765_v63 }
  0xa9   : > { %4768 = vmatpush1.bf16.msra.mxu0 %v4767_v4 }
  0xaa   : > { %4770 = vmatprep.subr.bf16.mxu0 %v4769_v5 }
  0xad   : > { %4772 = vmatpush1.bf16.msra.mxu0 %v4771_v10 }
  0xae   : > { %4774 = vmatprep.subr.bf16.mxu0 %v4773_v13 }
  0xb1   : > { %4776 = vmatpush1.bf16.msra.mxu0 %v4775_v16 }
  0xb2   : > { %1728 = vmatprep.subr.mxu0 %v1674_v46 }
  0xb5   : > { %1729 = vmatpush1.msra.mxu0 %v1673_v17 }
  0xb6   : > { %4978 = vmatprep.subr.bf16.mxu0 %v4777_v21 }
 0x15e   : > { %v1081_v59 = vpop.f32.mrb[0].mxu0  ;;  %v1566_v60 = vpop.f32.mrb[0].mxu1 }
 0x15f   : > { %v1597_v63 = vmax.f32 %v1081_v59, %v1566_v60  ;;  %v1083_v0 = vpop.f32.mrb[1].mxu0  ;;  %v1568_v1 = vpop.f32.mrb[1].mxu1  ;;  %v4154_v60 = vld [vmem:[%s8019_s4 + $0x270] sm:$0xff] }
 0x160   : > { %v1598_v2 = vmax.f32 %v1083_v0, %v1568_v1  ;;  %v4159_v0 = vld [vmem:[%s8019_s4 + $0x298] sm:$0xff]  ;;  %v4158_v1 = vld [vmem:[%s8019_s4 + $0x290] sm:$0xff] }
 0x161   : > { %v6520_v3 = vadd.f32 %v1610_v58, %v1597_v63 }
 0x162   : > { %v6522_v4 = vadd.f32 %v1614_v61, %v1598_v2  ;;  %v1087_v5 = vpop.f32.mrb[2].mxu0  ;;  %v1572_v8 = vpop.f32.mrb[2].mxu1  ;;  %v1801_v2 = vld [vmem:[%s8019_s4 + $0x8] sm:$0xff] }
 0x163   : > { %v1599_v9 = vmax.f32 %v1087_v5, %v1572_v8  ;;  %v1089_v10 = vpop.f32.mrb[3].mxu0  ;;  %v1574_v11 = vpop.f32.mrb[3].mxu1  ;;  %v1625_v14 = vmax.f32 %v6520_v3, 0.0  ;;  %v1803_v5 = vld [vmem:[%s8019_s4 + $0x18] sm:$0xff] }
 0x164   : > { %v1626_v12 = vmax.f32 %v6522_v4, 0.0  ;;  %v1600_v13 = vmax.f32 %v1089_v10, %v1574_v11  ;;  %v4817_v8 = vpack.c.bf16 %v1803_v5, %v1801_v2  ;;  %v1813_v5 = vld [vmem:[%s8019_s4 + $0x68] sm:$0xff] }
 0x165   : > { %v6526_v15 = vadd.f32 %v1610_v58, %v1599_v9 }
 0x166   : > { %v6528_v16 = vadd.f32 %v1614_v61, %v1600_v13  ;;  %v1093_v46 = vpop.f32.mrb[4].mxu0  ;;  %v1578_v17 = vpop.f32.mrb[4].mxu1  ;;  %4114 = vmatprep.mubr.msk.f32.mxu0 %vm1675_vm1, %v1626_v12 }
 0x167   : > { %v1601_v18 = vmax.f32 %v1093_v46, %v1578_v17  ;;  %v1095_v19 = vpop.f32.mrb[5].mxu0  ;;  %v1580_v20 = vpop.f32.mrb[5].mxu1  ;;  %1753 = vmatmul.mubr.f32.vlgmr.msra.gmra.mrb[8].mxu0 %v1625_v14  ;;  %v1627_v54 = vmax.f32 %v6526_v15, 0.0 }
 0x168   : > { %v1628_v21 = vmax.f32 %v6528_v16, 0.0  ;;  %v1602_v22 = vmax.f32 %v1095_v19, %v1580_v20  ;;  %4980 = vmatpush1.bf16.msra.mxu0 %v6424_v24 }
 0x169   : > { %v6538_v23 = vadd.f32 %v1610_v58, %v1601_v18  ;;  %4982 = vmatprep.subr.bf16.mxu0 %v6426_v25 }
 0x16a   : > { %v6541_v26 = vadd.f32 %v1614_v61, %v1602_v22  ;;  %v1099_v27 = vpop.f32.mrb[6].mxu0  ;;  %v1584_v28 = vpop.f32.mrb[6].mxu1  ;;  %4115 = vmatprep.mubr.msk.f32.mxu0 %vm1675_vm1, %v1628_v21 }
 0x16b   : > { %v1603_v29 = vmax.f32 %v1099_v27, %v1584_v28  ;;  %v1101_v31 = vpop.f32.mrb[7].mxu0  ;;  %v1586_v32 = vpop.f32.mrb[7].mxu1  ;;  %1759 = vmatmul.mubr.f32.gmra.mrb[10].mxu0 %v1627_v54  ;;  %v1629_v25 = vmax.f32 %v6538_v23, 0.0  ;;  %v1802_v28 = vld [vmem:[%s8019_s4 + $0x10] sm:$0xff] }
 0x16c   : > { %v1630_v24 = vmax.f32 %v6541_v26, 0.0  ;;  %v1604_v33 = vmax.f32 %v1101_v31, %v1586_v32  ;;  %4984 = vmatpush1.bf16.msra.mxu0 %v6441_v62  ;;  %v1800_v26 = vld [vmem:[%s8019_s4] sm:$0xff] }
 0x16d   : > { %v6551_v34 = vadd.f32 %v1610_v58, %v1603_v29  ;;  %4986 = vmatprep.subr.bf16.mxu0 %v6444_v30  ;;  %v4143_v30 = vld [vmem:[%s8019_s4 + $0x218] sm:$0xff]  ;;  %v4157_v58 = vld [vmem:[%s8019_s4 + $0x288] sm:$0xff] }
 0x16e   : > { %v6554_v36 = vadd.f32 %v1614_v61, %v1604_v33  ;;  %4116 = vmatprep.mubr.msk.f32.mxu0 %vm1675_vm1, %v1630_v24  ;;  %v4813_v59 = vpack.c.bf16 %v4157_v58, %v4155_v56  ;;  %v4156_v61 = vld [vmem:[%s8019_s4 + $0x280] sm:$0xff]  ;;  %v1807_v33 = vld [vmem:[%s8019_s4 + $0x38] sm:$0xff] }
 0x16f   : > { %1765 = vmatmul.mubr.f32.gmra.mrb[12].mxu0 %v1629_v25  ;;  %v1631_v62 = vmax.f32 %v6551_v34, 0.0  ;;  %v4815_v63 = vpack.c.bf16 %v4156_v61, %v4154_v60  ;;  %v1811_v56 = vld [vmem:[%s8019_s4 + $0x58] sm:$0xff]  ;;  %v1808_v61 = vld [vmem:[%s8019_s4 + $0x40] sm:$0xff] }
 0x170   : > { %v1632_v37 = vmax.f32 %v6554_v36, 0.0  ;;  %4988 = vmatpush1.bf16.msra.mxu0 %v6459_v6  ;;  %v4145_v6 = vld [vmem:[%s8019_s4 + $0x228] sm:$0xff] }
 0x171   : > { %4990 = vmatprep.subr.bf16.mxu0 %v6462_v35  ;;  %v4801_v35 = vpack.c.bf16 %v4145_v6, %v4143_v30  ;;  %v4819_v30 = vpack.c.bf16 %v1802_v28, %v1800_v26  ;;  %v1825_v26 = vld [vmem:[%s8019_s4 + $0xc8] sm:$0xff]  ;;  %v1827_v28 = vld [vmem:[%s8019_s4 + $0xd8] sm:$0xff] }
 0x172   : > { %4117 = vmatprep.mubr.msk.f32.mxu0 %vm1675_vm1, %v1632_v37 }
 0x173   : > { %1771 = vmatmul.mubr.f32.gmra.mrb[14].mxu0 %v1631_v62  ;;  %4802 = vmatprep.subr.bf16.mxu1 %v4801_v35 }
 0x174   : > { %4992 = vmatpush1.bf16.msra.mxu0 %v6477_v40  ;;  %v4803_v40 = vpack.c.bf16 %v4144_v39, %v4142_v38 }
 0x175   : > { %4994 = vmatprep.subr.bf16.mxu0 %v6480_v41  ;;  %v4147_v41 = vld [vmem:[%s8019_s4 + $0x238] sm:$0xff] }
 0x176   : > { %4804 = vmatpush1.bf16.msra.mxu1 %v4803_v40  ;;  %v4805_v43 = vpack.c.bf16 %v4149_v42, %v4147_v41  ;;  %v1806_v42 = vld [vmem:[%s8019_s4 + $0x30] sm:$0xff] }
 0x178   : > { %4996 = vmatpush1.bf16.msra.mxu0 %v6495_v47  ;;  %v4807_v47 = vpack.c.bf16 %v4148_v45, %v4146_v44  ;;  %4806 = vmatprep.subr.bf16.mxu1 %v4805_v43 }
 0x179   : > { %4998 = vmatprep.subr.bf16.mxu0 %v6498_v48  ;;  %v4151_v48 = vld [vmem:[%s8019_s4 + $0x258] sm:$0xff] }
 0x17a   : > { %4808 = vmatpush1.bf16.msra.mxu1 %v4807_v47  ;;  %v4809_v50 = vpack.c.bf16 %v4153_v49, %v4151_v48 }
 0x17c   : > { %5000 = vmatpush1.bf16.msra.mxu0 %v6507_v51  ;;  %v4150_v51 = vld [vmem:[%s8019_s4 + $0x250] sm:$0xff]  ;;  %4810 = vmatprep.subr.bf16.mxu1 %v4809_v50 }
 0x17d   : > { %5002 = vmatprep.subr.bf16.mxu0 %v4801_v35  ;;  %v4811_v53 = vpack.c.bf16 %v4152_v52, %v4150_v51  ;;  %v1804_v35 = vld [vmem:[%s8019_s4 + $0x20] sm:$0xff] }
 0x17e   : > { %v4823_v58 = vpack.c.bf16 %v1806_v42, %v1804_v35  ;;  %v1835_v35 = vld [vmem:[%s8019_s4 + $0x118] sm:$0xff]  ;;  %v1834_v42 = vld [vmem:[%s8019_s4 + $0x110] sm:$0xff] }
 0x17f   : > { %4812 = vmatpush1.bf16.msra.mxu1 %v4811_v53 }
 0x180   : > { %5004 = vmatpush1.bf16.msra.mxu0 %v4803_v40  ;;  %4814 = vmatprep.subr.bf16.mxu1 %v4813_v59 }
 0x181   : > { %5006 = vmatprep.subr.bf16.mxu0 %v4805_v43 }
 0x183   : > { %4816 = vmatpush1.bf16.msra.mxu1 %v4815_v63 }
 0x184   : > { %5008 = vmatpush1.bf16.msra.mxu0 %v4807_v47  ;;  %1955 = vmatprep.subr.mxu1 %v4159_v0 }
 0x185   : > { %5010 = vmatprep.subr.bf16.mxu0 %v4809_v50 }
 0x187   : > { %1956 = vmatpush1.msra.mxu1 %v4158_v1 }
 0x188   : > { %5012 = vmatpush1.bf16.msra.mxu0 %v4811_v53  ;;  %4818 = vmatprep.subr.bf16.mxu1 %v4817_v8  ;;  %v1809_v53 = vld [vmem:[%s8019_s4 + $0x48] sm:$0xff] }
 0x189   : > { %5014 = vmatprep.subr.bf16.mxu0 %v4813_v59  ;;  %v4825_v2 = vpack.c.bf16 %v1811_v56, %v1809_v53  ;;  %v1836_v56 = vld [vmem:[%s8019_s4 + $0x120] sm:$0xff] }
 0x18c   : > { %5016 = vmatpush1.bf16.msra.mxu0 %v4815_v63  ;;  %v1810_v63 = vld [vmem:[%s8019_s4 + $0x50] sm:$0xff] }
 0x18d   : > { %2596 = vmatprep.subr.mxu0 %v4159_v0 }
 0x190   : > { %2597 = vmatpush1.msra.mxu0 %v4158_v1 }
 0x191   : > { %5018 = vmatprep.subr.bf16.mxu0 %v4817_v8  ;;  %v1815_v8 = vld [vmem:[%s8019_s4 + $0x78] sm:$0xff] }
 0x23a   : > { %v1754_v9 = vpop.f32.mrb[8].mxu0 }
 0x23b   : > { %v6637_v10 = vmax.f32 %v1625_v14, %v1754_v9  ;;  %v1756_v11 = vpop.f32.mrb[9].mxu0  ;;  %v4827_v9 = vpack.c.bf16 %v1810_v63, %v1808_v61  ;;  %v1841_v63 = vld [vmem:[%s8019_s4 + $0x148] sm:$0xff] }
 0x23c   : > { %v1778_v13 = vmax.f32 %v1626_v12, %v1756_v11  ;;  %v1812_v11 = vld [vmem:[%s8019_s4 + $0x60] sm:$0xff] }
 0x23d   : > { %1785 = vst [vmem:[#allocation2] sm:$0xff] %v6637_v10 }
 0x23e   : > { %1786 = vst.msk [vmem:[#allocation2 + $0x8] sm:$0xff] %vm1675_vm1, %v1778_v13  ;;  %v1760_v46 = vpop.f32.mrb[10].mxu0  ;;  %v1814_v13 = vld [vmem:[%s8019_s4 + $0x70] sm:$0xff] }
 0x23f   : > { %v6645_v17 = vmax.f32 %v1627_v54, %v1760_v46  ;;  %v1762_v18 = vpop.f32.mrb[11].mxu0  ;;  %v4829_v46 = vpack.c.bf16 %v1815_v8, %v1813_v5  ;;  %v4169_v5 = vld [vmem:[%s8019_s4 + $0x2b8] sm:$0xff]  ;;  %v4166_v8 = vld [vmem:[%s8019_s4 + $0x2a0] sm:$0xff] }
 0x240   : > { %v1780_v19 = vmax.f32 %v1628_v21, %v1762_v18  ;;  %v1817_v18 = vld [vmem:[%s8019_s4 + $0x88] sm:$0xff] }
 0x241   : > { %1787 = vst [vmem:[#allocation2 + $0x10] sm:$0xff] %v6645_v17  ;;  %v2142_v6 = vrot.slane %v6645_v17, 4 }
 0x242   : > { %1788 = vst.msk [vmem:[#allocation2 + $0x18] sm:$0xff] %vm1675_vm1, %v1780_v19  ;;  %v1766_v3 = vpop.f32.mrb[12].mxu0  ;;  %v1819_v19 = vld [vmem:[%s8019_s4 + $0x98] sm:$0xff] }
 0x243   : > { %v6653_v4 = vmax.f32 %v1629_v25, %v1766_v3  ;;  %v1768_v12 = vpop.f32.mrb[13].mxu0 }
 0x244   : > { %v1782_v14 = vmax.f32 %v1630_v24, %v1768_v12  ;;  %v1842_v16 = vld [vmem:[#allocation2] sm:$0xfc]  ;;  %v1805_v24 = vld [vmem:[%s8019_s4 + $0x28] sm:$0xff]  ;;  %v4831_v12 = vpack.c.bf16 %v1814_v13, %v1812_v11 }
 0x245   : > { %1789 = vst [vmem:[#allocation2 + $0x20] sm:$0xff] %v6653_v4  ;;  %v2089_v20 = vld [vmem:[#allocation2] sm:$0xf0]  ;;  %v1843_v54 = vld [vmem:[#allocation2 + $0x8] sm:$0xfc]  ;;  %v1896_v31 = vrot.slane %v1842_v16, 2  ;;  %v4821_v40 = vpack.c.bf16 %v1807_v33, %v1805_v24 }
 0x246   : > { %1790 = vst.msk [vmem:[#allocation2 + $0x28] sm:$0xff] %vm1675_vm1, %v1782_v14  ;;  %v1772_v15 = vpop.f32.mrb[14].mxu0  ;;  %v2090_v23 = vld [vmem:[#allocation2 + $0x8] sm:$0xf0]  ;;  %v2141_v32 = vrot.slane %v2089_v20, 4  ;;  %v1899_v25 = vrot.slane %v1843_v54, 2  ;;  %v4833_v14 = vpack.c.bf16 %v1819_v19, %v1817_v18 }
 0x247   : > { %v1783_v21 = vmax.f32 %v1631_v62, %v1772_v15  ;;  %v1774_v22 = vpop.f32.mrb[15].mxu0  ;;  %v2144_v36 = vrot.slane %v2090_v23, 4  ;;  %v1897_v62 = vrot.slane %v6645_v17, 2  ;;  %v1795_v3 = vld [vmem:[#allocation2 + $0x8] sm:$0xff]  ;;  %v1816_v15 = vld [vmem:[%s8019_s4 + $0x80] sm:$0xff]  ;;  %v1818_v16 = vld [vmem:[%s8019_s4 + $0x90] sm:$0xff] }
 0x248   : > { %v1784_v27 = vmax.f32 %v1632_v37, %v1774_v22  ;;  %v6698_v45 = vsel %vm2140_vm4, %v2141_v32, %v2142_v6  ;;  %v1821_v20 = vld [vmem:[%s8019_s4 + $0xa8] sm:$0xff]  ;;  %v4835_v22 = vpack.c.bf16 %v1818_v16, %v1816_v15  ;;  %v1820_v23 = vld [vmem:[%s8019_s4 + $0xa0] sm:$0xff]  ;;  %v4841_v32 = vpack.c.bf16 %v1827_v28, %v1825_v26  ;;  %v1826_v33 = vld [vmem:[%s8019_s4 + $0xd0] sm:$0xff] }
 0x249   : > { %1791 = vst [vmem:[#allocation2 + $0x30] sm:$0x7] %v1783_v21  ;;  %v6669_v29 = vld [vmem:[#allocation2 + $0x18] sm:$0xff]  ;;  %v6695_v44 = vsel %vm1895_vm3, %v1896_v31, %v1897_v62  ;;  %v1824_v24 = vld [vmem:[%s8019_s4 + $0xc0] sm:$0xff]  ;;  %v4175_v15 = vld [vmem:[%s8019_s4 + $0x2e8] sm:$0xff] }
 0x24a   : > { %1793 = vst.msk [vmem:[#allocation2 + $0x38] sm:$0x7] %vm1792_vm2, %v1784_v27  ;;  %v1900_v34 = vrot.slane %v6669_v29, 2  ;;  %v2145_v37 = vrot.slane %v6669_v29, 4  ;;  %v1823_v21 = vld [vmem:[%s8019_s4 + $0xb8] sm:$0xff]  ;;  %v1822_v27 = vld [vmem:[%s8019_s4 + $0xb0] sm:$0xff] }
 0x24b   : > { %v4837_v54 = vpack.c.bf16 %v1823_v21, %v1821_v20  ;;  %v4839_v31 = vpack.c.bf16 %v1822_v27, %v1820_v23  ;;  %v1840_v11 = vld [vmem:[%s8019_s4 + $0x140] sm:$0xff]  ;;  %v4173_v18 = vld [vmem:[%s8019_s4 + $0x2d8] sm:$0xff]  ;;  %v2305_v26 = vrot.slane %v6669_v29, 6 }
 0x24c   : > { %v1901_v38 = vsel %vm1895_vm3, %v1899_v25, %v1900_v34  ;;  %v6686_v39 = vsel %vm2140_vm4, %v2144_v36, %v2145_v37  ;;  %v1844_v41 = vld [vmem:[#allocation2 + $0x20] sm:$0x7]  ;;  %v1829_v25 = vld [vmem:[%s8019_s4 + $0xe8] sm:$0xff]  ;;  %v4843_v36 = vpack.c.bf16 %v1826_v33, %v1824_v24  ;;  %v4177_v16 = vld [vmem:[%s8019_s4 + $0x2f8] sm:$0xff] }
 0x24d   : > { %v2091_v43 = vld [vmem:[#allocation2 + $0x20] sm:$0x1f]  ;;  %4160 = vmatprep.mubr.msk.f32.mxu1 %vm1675_vm1, %v1901_v38  ;;  %4301 = vmatprep.mubr.msk.f32.mxu0 %vm1675_vm1, %v6686_v39  ;;  %v1845_v47 = vld [vmem:[#allocation2 + $0x28] sm:$0x7]  ;;  %v6700_v49 = vrot.slane %v1844_v41, 2  ;;  %v4865_v21 = vpack.c.bf16 %v4177_v16, %v4175_v15  ;;  %v4181_v23 = vld [vmem:[%s8019_s4 + $0x318] sm:$0xff] }
 0x24e   : > { %v2092_v48 = vld [vmem:[#allocation2 + $0x28] sm:$0x1f]  ;;  %v6702_v50 = vrot.slane %v2091_v43, 4  ;;  %1980 = vmatmul.mubr.f32.vlgmr.msra.gmra.mrb[8].mxu1 %v6695_v44  ;;  %2621 = vmatmul.mubr.f32.vlgmr.msra.gmra.mrb[16].mxu0 %v6698_v45  ;;  %v6706_v51 = vrot.slane %v1845_v47, 2  ;;  %v1832_v41 = vld [vmem:[%s8019_s4 + $0x100] sm:$0xff]  ;;  %v1839_v47 = vld [vmem:[%s8019_s4 + $0x138] sm:$0xff] }
 0x24f   : > { %v6708_v52 = vrot.slane %v2092_v48, 4  ;;  %4820 = vmatpush1.bf16.msra.mxu1 %v4819_v30  ;;  %5020 = vmatpush1.bf16.msra.mxu0 %v4819_v30  ;;  %v6736_v0 = vsel %vm1895_vm3, %v1897_v62, %v6700_v49  ;;  %v1828_v62 = vld [vmem:[%s8019_s4 + $0xe0] sm:$0xff]  ;;  %v1830_v30 = vld [vmem:[%s8019_s4 + $0xf0] sm:$0xff]  ;;  %v1837_v43 = vld [vmem:[%s8019_s4 + $0x128] sm:$0xff]  ;;  %v4851_v48 = vpack.c.bf16 %v1834_v42, %v1832_v41 }
 0x250   : > { %v6718_v59 = vsel %vm1895_vm3, %v1900_v34, %v6706_v51  ;;  %4822 = vmatprep.subr.bf16.mxu1 %v4821_v40  ;;  %5022 = vmatprep.subr.bf16.mxu0 %v4821_v40  ;;  %v6740_v1 = vsel %vm2140_vm4, %v2142_v6, %v6702_v50  ;;  %v1831_v34 = vld [vmem:[%s8019_s4 + $0xf8] sm:$0xff]  ;;  %v1833_v6 = vld [vmem:[%s8019_s4 + $0x108] sm:$0xff]  ;;  %v4853_v53 = vpack.c.bf16 %v1839_v47, %v1837_v43  ;;  %v1798_v28 = vld [vmem:[#allocation2 + $0x20] sm:$0x1] }
 0x251   : > { %v6722_v60 = vsel %vm2140_vm4, %v2145_v37, %v6708_v52  ;;  %4161 = vmatprep.mubr.msk.f32.mxu1 %vm1675_vm1, %v6718_v59  ;;  %v4845_v37 = vpack.c.bf16 %v1831_v34, %v1829_v25  ;;  %v4849_v40 = vpack.c.bf16 %v1835_v35, %v1833_v6  ;;  %v4183_v33 = vld [vmem:[%s8019_s4 + $0x328] sm:$0xff]  ;;  %v4186_v35 = vld [vmem:[%s8019_s4 + $0x340] sm:$0xff]  ;;  %v4193_v41 = vld [vmem:[%s8019_s4 + $0x378] sm:$0xff] }
 0x252   : > { %4302 = vmatprep.mubr.msk.f32.mxu0 %vm1675_vm1, %v6722_v60  ;;  %1986 = vmatmul.mubr.f32.gmra.mrb[10].mxu1 %v6736_v0  ;;  %v4190_v47 = vld [vmem:[%s8019_s4 + $0x360] sm:$0xff]  ;;  %v4204_v15 = vld [vmem:[%s8019_s4 + $0x3d0] sm:$0xff] }
 0x253   : > { %2627 = vmatmul.mubr.f32.gmra.mrb[18].mxu0 %v6740_v1  ;;  %4824 = vmatpush1.bf16.msra.mxu1 %v4823_v58 }
 0x254   : > { %5024 = vmatpush1.bf16.msra.mxu0 %v4823_v58  ;;  %4162 = vmatprep.mubr.msk.f32.mxu1 %vm1675_vm1, %v6706_v51  ;;  %v1838_v58 = vld [vmem:[%s8019_s4 + $0x130] sm:$0xff] }
 0x255   : > { %4303 = vmatprep.mubr.msk.f32.mxu0 %vm1675_vm1, %v6708_v52  ;;  %4826 = vmatprep.subr.bf16.mxu1 %v4825_v2  ;;  %v4855_v61 = vpack.c.bf16 %v1838_v58, %v1836_v56  ;;  %v4197_v56 = vld [vmem:[%s8019_s4 + $0x398] sm:$0xff] }
 0x256   : > { %5026 = vmatprep.subr.bf16.mxu0 %v4825_v2  ;;  %1992 = vmatmul.mubr.f32.gmra.mrb[12].mxu1 %v6700_v49  ;;  %v4167_v2 = vld [vmem:[%s8019_s4 + $0x2a8] sm:$0xff] }
 0x257   : > { %2633 = vmatmul.mubr.f32.gmra.mrb[20].mxu0 %v6702_v50  ;;  %4828 = vmatpush1.bf16.msra.mxu1 %v4827_v9  ;;  %v4857_v13 = vpack.c.bf16 %v4169_v5, %v4167_v2  ;;  %v4196_v2 = vld [vmem:[%s8019_s4 + $0x390] sm:$0xff]  ;;  %v4199_v5 = vld [vmem:[%s8019_s4 + $0x3a8] sm:$0xff] }
 0x258   : > { %5028 = vmatpush1.bf16.msra.mxu0 %v4827_v9  ;;  %4163 = vmatprep.mubr.msk.f32.mxu1 %vm1675_vm1, %v1795_v3  ;;  %v4168_v9 = vld [vmem:[%s8019_s4 + $0x2b0] sm:$0xff]  ;;  %v4170_v3 = vld [vmem:[%s8019_s4 + $0x2c0] sm:$0xff] }
 0x259   : > { %4304 = vmatprep.mubr.msk.f32.mxu0 %vm1675_vm1, %v1901_v38  ;;  %4830 = vmatprep.subr.bf16.mxu1 %v4829_v46  ;;  %v4847_v38 = vpack.c.bf16 %v1830_v30, %v1828_v62  ;;  %v4859_v19 = vpack.c.bf16 %v4168_v9, %v4166_v8  ;;  %v4189_v62 = vld [vmem:[%s8019_s4 + $0x358] sm:$0xff] }
 0x25a   : > { %5030 = vmatprep.subr.bf16.mxu0 %v4829_v46  ;;  %v4171_v46 = vld [vmem:[%s8019_s4 + $0x2c8] sm:$0xff]  ;;  %v4201_v8 = vld [vmem:[%s8019_s4 + $0x3b8] sm:$0xff] }
 0x25b   : > { %4832 = vmatpush1.bf16.msra.mxu1 %v4831_v12 }
 0x25c   : > { %5032 = vmatpush1.bf16.msra.mxu0 %v4831_v12  ;;  %4834 = vmatprep.subr.bf16.mxu1 %v4833_v14  ;;  %v4172_v12 = vld [vmem:[%s8019_s4 + $0x2d0] sm:$0xff] }
 0x25d   : > { %5034 = vmatprep.subr.bf16.mxu0 %v4833_v14  ;;  %v4861_v14 = vpack.c.bf16 %v4173_v18, %v4171_v46  ;;  %v4863_v20 = vpack.c.bf16 %v4172_v12, %v4170_v3  ;;  %v4200_v46 = vld [vmem:[%s8019_s4 + $0x3b0] sm:$0xff]  ;;  %v4203_v18 = vld [vmem:[%s8019_s4 + $0x3c8] sm:$0xff] }
 0x25f   : > { %4836 = vmatpush1.bf16.msra.mxu1 %v4835_v22 }
 0x260   : > { %5036 = vmatpush1.bf16.msra.mxu0 %v4835_v22  ;;  %4838 = vmatprep.subr.bf16.mxu1 %v4837_v54  ;;  %v4179_v22 = vld [vmem:[%s8019_s4 + $0x308] sm:$0xff] }
 0x261   : > { %5038 = vmatprep.subr.bf16.mxu0 %v4837_v54  ;;  %v2250_v54 = vld [vmem:[#allocation2 + $0x8] sm:$0xc0]  ;;  %v4869_v24 = vpack.c.bf16 %v4181_v23, %v4179_v22  ;;  %v4211_v23 = vld [vmem:[%s8019_s4 + $0x3f0] sm:$0xff] }
 0x262   : > { %v2252_v22 = vld [vmem:[#allocation2 + $0x28] sm:$0x7f] }
 0x263   : > { %4840 = vmatpush1.bf16.msra.mxu1 %v4839_v31 }
 0x264   : > { %5040 = vmatpush1.bf16.msra.mxu0 %v4839_v31  ;;  %4842 = vmatprep.subr.bf16.mxu1 %v4841_v32  ;;  %v4180_v31 = vld [vmem:[%s8019_s4 + $0x310] sm:$0xff] }
 0x265   : > { %5042 = vmatprep.subr.bf16.mxu0 %v4841_v32  ;;  %v2304_v32 = vrot.slane %v2250_v54, 6 }
 0x267   : > { %4844 = vmatpush1.bf16.msra.mxu1 %v4843_v36  ;;  %v6914_v25 = vsel %vm2300_vm5, %v2304_v32, %v2305_v26  ;;  %v7003_v32 = vrot.slane %v2252_v22, 6 }
 0x268   : > { %5044 = vmatpush1.bf16.msra.mxu0 %v4843_v36  ;;  %4846 = vmatprep.subr.bf16.mxu1 %v4845_v37 }
 0x269   : > { %5046 = vmatprep.subr.bf16.mxu0 %v4845_v37  ;;  %v4184_v37 = vld [vmem:[%s8019_s4 + $0x330] sm:$0xff] }
 0x26b   : > { %4848 = vmatpush1.bf16.msra.mxu1 %v4847_v38 }
 0x26c   : > { %5048 = vmatpush1.bf16.msra.mxu0 %v4847_v38  ;;  %4850 = vmatprep.subr.bf16.mxu1 %v4849_v40  ;;  %v4188_v38 = vld [vmem:[%s8019_s4 + $0x350] sm:$0xff] }
 0x26d   : > { %5050 = vmatprep.subr.bf16.mxu0 %v4849_v40  ;;  %v4191_v40 = vld [vmem:[%s8019_s4 + $0x368] sm:$0xff]  ;;  %v4879_v42 = vpack.c.bf16 %v4188_v38, %v4186_v35  ;;  %v4221_v35 = vld [vmem:[%s8019_s4 + $0x440] sm:$0xff] }
 0x26e   : > { %v4881_v43 = vpack.c.bf16 %v4193_v41, %v4191_v40  ;;  %v4226_v40 = vld [vmem:[%s8019_s4 + $0x468] sm:$0xff] }
 0x26f   : > { %4852 = vmatpush1.bf16.msra.mxu1 %v4851_v48 }
 0x270   : > { %5052 = vmatpush1.bf16.msra.mxu0 %v4851_v48  ;;  %4854 = vmatprep.subr.bf16.mxu1 %v4853_v53  ;;  %v4192_v48 = vld [vmem:[%s8019_s4 + $0x370] sm:$0xff] }
 0x271   : > { %5054 = vmatprep.subr.bf16.mxu0 %v4853_v53  ;;  %v4195_v53 = vld [vmem:[%s8019_s4 + $0x388] sm:$0xff]  ;;  %v4883_v58 = vpack.c.bf16 %v4192_v48, %v4190_v47  ;;  %v4225_v47 = vld [vmem:[%s8019_s4 + $0x460] sm:$0xff] }
 0x273   : > { %4856 = vmatpush1.bf16.msra.mxu1 %v4855_v61 }
 0x274   : > { %5056 = vmatpush1.bf16.msra.mxu0 %v4855_v61  ;;  %2046 = vmatprep.subr.mxu1 %v1841_v63  ;;  %v4885_v61 = vpack.c.bf16 %v4197_v56, %v4195_v53  ;;  %v4227_v56 = vld [vmem:[%s8019_s4 + $0x470] sm:$0xff] }
 0x275   : > { %2679 = vmatprep.subr.mxu0 %v1841_v63  ;;  %v4194_v63 = vld [vmem:[%s8019_s4 + $0x380] sm:$0xff] }
 0x276   : > { %v4887_v9 = vpack.c.bf16 %v4196_v2, %v4194_v63 }
 0x277   : > { %2047 = vmatpush1.msra.mxu1 %v1840_v11 }
 0x278   : > { %2680 = vmatpush1.msra.mxu0 %v1840_v11  ;;  %2071 = vmatmul.mubr.f32.vlgmr.msra.gmra.mrb[8].mxu1 %v6637_v10  ;;  %v4174_v10 = vld [vmem:[%s8019_s4 + $0x2e0] sm:$0xff]  ;;  %v4889_v11 = vpack.c.bf16 %v4201_v8, %v4199_v5  ;;  %v4231_v5 = vld [vmem:[%s8019_s4 + $0x490] sm:$0xff] }
 0x279   : > { %4858 = vmatprep.subr.bf16.mxu1 %v4857_v13  ;;  %2704 = vmatmul.mubr.f32.vlgmr.msra.gmra.mrb[16].mxu0 %v6695_v44  ;;  %v4176_v44 = vld [vmem:[%s8019_s4 + $0x2f0] sm:$0xff]  ;;  %v4233_v8 = vld [vmem:[%s8019_s4 + $0x4a0] sm:$0xff] }
 0x27a   : > { %5058 = vmatprep.subr.bf16.mxu0 %v4857_v13  ;;  %4164 = vmatprep.mubr.msk.f32.mxu1 %vm1675_vm1, %v6669_v29  ;;  %v4867_v27 = vpack.c.bf16 %v4176_v44, %v4174_v10  ;;  %v4198_v13 = vld [vmem:[%s8019_s4 + $0x3a0] sm:$0xff]  ;;  %v4212_v44 = vld [vmem:[%s8019_s4 + $0x3f8] sm:$0xff] }
 0x27b   : > { %4860 = vmatpush1.bf16.msra.mxu1 %v4859_v19  ;;  %4305 = vmatprep.mubr.msk.f32.mxu0 %vm1675_vm1, %v6718_v59  ;;  %v1799_v59 = vld [vmem:[#allocation2 + $0x28] sm:$0x1]  ;;  %v4891_v3 = vpack.c.bf16 %v4200_v46, %v4198_v13  ;;  %v2249_v10 = vld [vmem:[#allocation2] sm:$0xc0]  ;;  %v4919_v13 = vpack.c.bf16 %v4233_v8, %v4231_v5 }
 0x27c   : > { %5060 = vmatpush1.bf16.msra.mxu0 %v4859_v19  ;;  %2077 = vmatmul.mubr.f32.gmra.mrb[10].mxu1 %v6645_v17  ;;  %v4205_v19 = vld [vmem:[%s8019_s4 + $0x3d8] sm:$0xff]  ;;  %v2301_v54 = vrot.slane %v2249_v10, 6 }
 0x27d   : > { %4862 = vmatprep.subr.bf16.mxu1 %v4861_v14  ;;  %2710 = vmatmul.mubr.f32.gmra.mrb[18].mxu0 %v6736_v0  ;;  %v4178_v0 = vld [vmem:[%s8019_s4 + $0x300] sm:$0xff]  ;;  %v4893_v12 = vpack.c.bf16 %v4205_v19, %v4203_v18  ;;  %v4235_v18 = vld [vmem:[%s8019_s4 + $0x4b0] sm:$0xff]  ;;  %v4244_v10 = vld [vmem:[%s8019_s4 + $0x4f8] sm:$0xff] }
 0x27e   : > { %5062 = vmatprep.subr.bf16.mxu0 %v4861_v14  ;;  %4165 = vmatprep.mubr.msk.f32.mxu1 %vm1675_vm1, %v1799_v59  ;;  %v4871_v34 = vpack.c.bf16 %v4180_v31, %v4178_v0  ;;  %v4202_v14 = vld [vmem:[%s8019_s4 + $0x3c0] sm:$0xff]  ;;  %v2302_v31 = vrot.slane %v6645_v17, 6 }
 0x27f   : > { %4864 = vmatpush1.bf16.msra.mxu1 %v4863_v20  ;;  %4306 = vmatprep.mubr.msk.f32.mxu0 %vm1675_vm1, %v6706_v51  ;;  %v4185_v51 = vld [vmem:[%s8019_s4 + $0x338] sm:$0xff]  ;;  %v4895_v16 = vpack.c.bf16 %v4204_v15, %v4202_v14  ;;  %v4206_v59 = vld [vmem:[%s8019_s4 + $0x3e0] sm:$0xff] }
 0x280   : > { %5064 = vmatpush1.bf16.msra.mxu0 %v4863_v20  ;;  %2083 = vmatmul.mubr.f32.gmra.mrb[12].mxu1 %v1798_v28  ;;  %v4873_v36 = vpack.c.bf16 %v4185_v51, %v4183_v33  ;;  %v4207_v20 = vld [vmem:[%s8019_s4 + $0x3e8] sm:$0xff]  ;;  %v2251_v0 = vld [vmem:[#allocation2 + $0x20] sm:$0x7f] }
 0x281   : > { %4866 = vmatprep.subr.bf16.mxu1 %v4865_v21  ;;  %2716 = vmatmul.mubr.f32.gmra.mrb[20].mxu0 %v6700_v49  ;;  %v4182_v49 = vld [vmem:[%s8019_s4 + $0x320] sm:$0xff]  ;;  %v4218_v33 = vld [vmem:[%s8019_s4 + $0x428] sm:$0xff] }
 0x282   : > { %5066 = vmatprep.subr.bf16.mxu0 %v4865_v21  ;;  %4208 = vmatprep.mubr.msk.f32.mxu1 %vm1675_vm1, %v6686_v39  ;;  %v4187_v39 = vld [vmem:[%s8019_s4 + $0x348] sm:$0xff]  ;;  %v4875_v30 = vpack.c.bf16 %v4184_v37, %v4182_v49  ;;  %v4215_v49 = vld [vmem:[%s8019_s4 + $0x410] sm:$0xff]  ;;  %v4217_v37 = vld [vmem:[%s8019_s4 + $0x420] sm:$0xff] }
 0x283   : > { %4868 = vmatpush1.bf16.msra.mxu1 %v4867_v27  ;;  %4307 = vmatprep.mubr.msk.f32.mxu0 %vm1675_vm1, %v6914_v25  ;;  %v4877_v6 = vpack.c.bf16 %v4189_v62, %v4187_v39  ;;  %v4214_v21 = vld [vmem:[%s8019_s4 + $0x408] sm:$0xff]  ;;  %v4220_v62 = vld [vmem:[%s8019_s4 + $0x438] sm:$0xff]  ;;  %v4237_v19 = vld [vmem:[%s8019_s4 + $0x4c0] sm:$0xff] }
 0x284   : > { %5068 = vmatpush1.bf16.msra.mxu0 %v4867_v27  ;;  %4870 = vmatprep.subr.bf16.mxu1 %v4869_v24  ;;  %v4213_v27 = vld [vmem:[%s8019_s4 + $0x400] sm:$0xff]  ;;  %v4897_v28 = vpack.c.bf16 %v4214_v21, %v4212_v44  ;;  %v4923_v14 = vpack.c.bf16 %v4237_v19, %v4235_v18  ;;  %v4246_v44 = vld [vmem:[%s8019_s4 + $0x508] sm:$0xff] }
 0x285   : > { %5070 = vmatprep.subr.bf16.mxu0 %v4869_v24  ;;  %v4216_v24 = vld [vmem:[%s8019_s4 + $0x418] sm:$0xff]  ;;  %v4899_v51 = vpack.c.bf16 %v4213_v27, %v4211_v23  ;;  %v4929_v22 = vpack.c.bf16 %v4246_v44, %v4244_v10  ;;  %v4250_v27 = vld [vmem:[%s8019_s4 + $0x528] sm:$0xff]  ;;  %v4280_v10 = vld [vmem:[%s8019_s4 + $0x600] sm:$0xff] }
 0x286   : > { %v4901_v39 = vpack.c.bf16 %v4218_v33, %v4216_v24  ;;  %v4248_v23 = vld [vmem:[%s8019_s4 + $0x518] sm:$0xff]  ;;  %v4249_v24 = vld [vmem:[%s8019_s4 + $0x520] sm:$0xff]  ;;  %v4282_v44 = vld [vmem:[%s8019_s4 + $0x610] sm:$0xff] }
 0x287   : > { %4872 = vmatpush1.bf16.msra.mxu1 %v4871_v34 }
 0x288   : > { %5072 = vmatpush1.bf16.msra.mxu0 %v4871_v34  ;;  %4874 = vmatprep.subr.bf16.mxu1 %v4873_v36  ;;  %v7013_v34 = vsel %vm2300_vm5, %v2301_v54, %v2302_v31  ;;  %v4245_v54 = vld [vmem:[%s8019_s4 + $0x500] sm:$0xff] }
 0x289   : > { %5074 = vmatprep.subr.bf16.mxu0 %v4873_v36  ;;  %v7015_v36 = vrot.slane %v2251_v0, 6  ;;  %v4933_v0 = vpack.c.bf16 %v4250_v27, %v4248_v23  ;;  %v4284_v23 = vld [vmem:[%s8019_s4 + $0x620] sm:$0xff]  ;;  %v4286_v27 = vld [vmem:[%s8019_s4 + $0x630] sm:$0xff] }
 0x28b   : > { %4876 = vmatpush1.bf16.msra.mxu1 %v4875_v30 }
 0x28c   : > { %5076 = vmatpush1.bf16.msra.mxu0 %v4875_v30  ;;  %4878 = vmatprep.subr.bf16.mxu1 %v4877_v6  ;;  %v4222_v30 = vld [vmem:[%s8019_s4 + $0x448] sm:$0xff] }
 0x28d   : > { %5078 = vmatprep.subr.bf16.mxu0 %v4877_v6  ;;  %v4903_v6 = vpack.c.bf16 %v4217_v37, %v4215_v49  ;;  %v4905_v38 = vpack.c.bf16 %v4222_v30, %v4220_v62  ;;  %v4257_v49 = vld [vmem:[%s8019_s4 + $0x548] sm:$0xff]  ;;  %v4259_v37 = vld [vmem:[%s8019_s4 + $0x558] sm:$0xff]  ;;  %v4256_v62 = vld [vmem:[%s8019_s4 + $0x540] sm:$0xff] }
 0x28e   : > { %v4258_v30 = vld [vmem:[%s8019_s4 + $0x550] sm:$0xff] }
 0x28f   : > { %4880 = vmatpush1.bf16.msra.mxu1 %v4879_v42 }
 0x290   : > { %5080 = vmatpush1.bf16.msra.mxu0 %v4879_v42  ;;  %4882 = vmatprep.subr.bf16.mxu1 %v4881_v43 }
 0x291   : > { %5082 = vmatprep.subr.bf16.mxu0 %v4881_v43  ;;  %v4223_v43 = vld [vmem:[%s8019_s4 + $0x450] sm:$0xff] }
 0x292   : > { %v4911_v48 = vpack.c.bf16 %v4225_v47, %v4223_v43  ;;  %v4267_v43 = vld [vmem:[%s8019_s4 + $0x598] sm:$0xff]  ;;  %v4266_v47 = vld [vmem:[%s8019_s4 + $0x590] sm:$0xff] }
 0x293   : > { %4884 = vmatpush1.bf16.msra.mxu1 %v4883_v58 }
 0x294   : > { %5084 = vmatpush1.bf16.msra.mxu0 %v4883_v58  ;;  %4886 = vmatprep.subr.bf16.mxu1 %v4885_v61  ;;  %v4229_v58 = vld [vmem:[%s8019_s4 + $0x480] sm:$0xff] }
 0x295   : > { %5086 = vmatprep.subr.bf16.mxu0 %v4885_v61  ;;  %v4234_v61 = vld [vmem:[%s8019_s4 + $0x4a8] sm:$0xff]  ;;  %v4915_v63 = vpack.c.bf16 %v4229_v58, %v4227_v56  ;;  %v7207_v56 = vld [vmem:[#allocation2 + $0x38] sm:$0x1]  ;;  %v7212_v58 = vld [vmem:[#allocation2 + $0x30] sm:$0x1] }
 0x297   : > { %4888 = vmatpush1.bf16.msra.mxu1 %v4887_v9 }
 0x298   : > { %5088 = vmatpush1.bf16.msra.mxu0 %v4887_v9  ;;  %4890 = vmatprep.subr.bf16.mxu1 %v4889_v11  ;;  %v4236_v9 = vld [vmem:[%s8019_s4 + $0x4b8] sm:$0xff] }
 0x299   : > { %5090 = vmatprep.subr.bf16.mxu0 %v4889_v11  ;;  %v4238_v11 = vld [vmem:[%s8019_s4 + $0x4c8] sm:$0xff] }
 0x29a   : > { %v4921_v46 = vpack.c.bf16 %v4238_v11, %v4236_v9  ;;  %v4272_v11 = vld [vmem:[%s8019_s4 + $0x5c0] sm:$0xff] }
 0x29b   : > { %4892 = vmatpush1.bf16.msra.mxu1 %v4891_v3 }
 0x29c   : > { %5092 = vmatpush1.bf16.msra.mxu0 %v4891_v3  ;;  %4894 = vmatprep.subr.bf16.mxu1 %v4893_v12  ;;  %v4240_v3 = vld [vmem:[%s8019_s4 + $0x4d8] sm:$0xff] }
 0x29d   : > { %5094 = vmatprep.subr.bf16.mxu0 %v4893_v12  ;;  %v4242_v12 = vld [vmem:[%s8019_s4 + $0x4e8] sm:$0xff] }
 0x29e   : > { %v4925_v15 = vpack.c.bf16 %v4242_v12, %v4240_v3  ;;  %v4276_v3 = vld [vmem:[%s8019_s4 + $0x5e0] sm:$0xff]  ;;  %v4278_v12 = vld [vmem:[%s8019_s4 + $0x5f0] sm:$0xff] }
 0x29f   : > { %4896 = vmatpush1.bf16.msra.mxu1 %v4895_v16 }
 0x2a0   : > { %5096 = vmatpush1.bf16.msra.mxu0 %v4895_v16  ;;  %2200 = vmatprep.subr.mxu1 %v4207_v20  ;;  %v4239_v16 = vld [vmem:[%s8019_s4 + $0x4d0] sm:$0xff] }
 0x2a1   : > { %2762 = vmatprep.subr.mxu0 %v4207_v20  ;;  %v4241_v20 = vld [vmem:[%s8019_s4 + $0x4e0] sm:$0xff] }
 0x2a2   : > { %v4927_v21 = vpack.c.bf16 %v4241_v20, %v4239_v16  ;;  %v4959_v16 = vpack.c.bf16 %v4278_v12, %v4276_v3  ;;  %v3062_v3 = vld [vmem:[%s8021_s6 + $0x78] sm:$0xff] }
 0x2a3   : > { %2201 = vmatpush1.msra.mxu1 %v4206_v59 }
 0x2a4   : > { %2763 = vmatpush1.msra.mxu0 %v4206_v59  ;;  %2225 = vmatmul.mubr.f32.vlgmr.msra.gmra.mrb[8].mxu1 %v6698_v45  ;;  %v7030_v45 = vsel %vm2300_vm5, %v2305_v26, %v7003_v32  ;;  %v4219_v26 = vld [vmem:[%s8019_s4 + $0x430] sm:$0xff] }
 0x2a5   : > { %4898 = vmatprep.subr.bf16.mxu1 %v4897_v28  ;;  %2787 = vmatmul.mubr.f32.vlgmr.msra.gmra.mrb[16].mxu0 %v7013_v34  ;;  %v4907_v41 = vpack.c.bf16 %v4221_v35, %v4219_v26  ;;  %v4243_v59 = vld [vmem:[%s8019_s4 + $0x4f0] sm:$0xff]  ;;  %v4261_v26 = vld [vmem:[%s8019_s4 + $0x568] sm:$0xff]  ;;  %v4263_v35 = vld [vmem:[%s8019_s4 + $0x578] sm:$0xff] }
 0x2a6   : > { %5098 = vmatprep.subr.bf16.mxu0 %v4897_v28  ;;  %4209 = vmatprep.mubr.msk.f32.mxu1 %vm1675_vm1, %v6722_v60  ;;  %v7043_v60 = vsel %vm2300_vm5, %v2302_v31, %v7015_v36  ;;  %v4931_v28 = vpack.c.bf16 %v4245_v54, %v4243_v59  ;;  %v4247_v31 = vld [vmem:[%s8019_s4 + $0x510] sm:$0xff]  ;;  %v4963_v59 = vpack.c.bf16 %v4282_v44, %v4280_v10  ;;  %v3063_v44 = vld [vmem:[%s8021_s6 + $0x80] sm:$0xff] }
 0x2a7   : > { %4900 = vmatpush1.bf16.msra.mxu1 %v4899_v51  ;;  %4308 = vmatprep.mubr.msk.f32.mxu0 %vm1675_vm1, %v7030_v45  ;;  %v4935_v33 = vpack.c.bf16 %v4249_v24, %v4247_v31  ;;  %v4967_v31 = vpack.c.bf16 %v4286_v27, %v4284_v23  ;;  %v3067_v27 = vld [vmem:[%s8021_s6 + $0xa0] sm:$0xff] }
 0x2a8   : > { %5100 = vmatpush1.bf16.msra.mxu0 %v4899_v51  ;;  %2231 = vmatmul.mubr.f32.gmra.mrb[10].mxu1 %v6740_v1  ;;  %v4224_v1 = vld [vmem:[%s8019_s4 + $0x458] sm:$0xff] }
 0x2a9   : > { %4902 = vmatprep.subr.bf16.mxu1 %v4901_v39  ;;  %2793 = vmatmul.mubr.f32.gmra.mrb[18].mxu0 %v7043_v60  ;;  %v4909_v42 = vpack.c.bf16 %v4226_v40, %v4224_v1  ;;  %v4252_v51 = vld [vmem:[%s8019_s4 + $0x538] sm:$0xff]  ;;  %v4260_v1 = vld [vmem:[%s8019_s4 + $0x560] sm:$0xff]  ;;  %v4262_v40 = vld [vmem:[%s8019_s4 + $0x570] sm:$0xff] }
 0x2aa   : > { %5102 = vmatprep.subr.bf16.mxu0 %v4901_v39  ;;  %4210 = vmatprep.mubr.msk.f32.mxu1 %vm1675_vm1, %v6708_v52  ;;  %v4228_v52 = vld [vmem:[%s8019_s4 + $0x478] sm:$0xff]  ;;  %v4251_v39 = vld [vmem:[%s8019_s4 + $0x530] sm:$0xff] }
 0x2ab   : > { %4904 = vmatpush1.bf16.msra.mxu1 %v4903_v6  ;;  %4309 = vmatprep.mubr.msk.f32.mxu0 %vm1675_vm1, %v7003_v32 }
 0x2ac   : > { %5104 = vmatpush1.bf16.msra.mxu0 %v4903_v6  ;;  %2237 = vmatmul.mubr.f32.gmra.mrb[12].mxu1 %v6702_v50  ;;  %v4230_v50 = vld [vmem:[%s8019_s4 + $0x488] sm:$0xff]  ;;  %v4937_v6 = vpack.c.bf16 %v4259_v37, %v4257_v49  ;;  %v4295_v37 = vld [vmem:[%s8019_s4 + $0x678] sm:$0xff] }
 0x2ad   : > { %4906 = vmatprep.subr.bf16.mxu1 %v4905_v38  ;;  %2799 = vmatmul.mubr.f32.gmra.mrb[20].mxu0 %v7015_v36  ;;  %v4913_v53 = vpack.c.bf16 %v4230_v50, %v4228_v52  ;;  %v2901_v50 = vld [vmem:[#allocation2 + $0x18] sm:$0xfc]  ;;  %v4293_v49 = vld [vmem:[%s8019_s4 + $0x668] sm:$0xff] }
 0x2ae   : > { %5106 = vmatprep.subr.bf16.mxu0 %v4905_v38  ;;  %4253 = vmatprep.mubr.msk.f32.mxu1 %vm1675_vm1, %v6914_v25  ;;  %v4232_v25 = vld [vmem:[%s8019_s4 + $0x498] sm:$0xff]  ;;  %v4939_v38 = vpack.c.bf16 %v4258_v30, %v4256_v62  ;;  %v4973_v62 = vpack.c.bf16 %v4295_v37, %v4293_v49  ;;  %v4292_v30 = vld [vmem:[%s8019_s4 + $0x660] sm:$0xff]  ;;  %v3073_v49 = vld [vmem:[%s8021_s6 + $0xd0] sm:$0xff] }
 0x2af   : > { %4908 = vmatpush1.bf16.msra.mxu1 %v4907_v41  ;;  %4310 = vmatprep.mubr.msk.f32.mxu0 %vm1675_vm1, %v6669_v29  ;;  %v4917_v2 = vpack.c.bf16 %v4234_v61, %v4232_v25  ;;  %v2912_v25 = vrot.slane %v2901_v50, 2  ;;  %v3052_v50 = vld [vmem:[%s8021_s6 + $0x28] sm:$0xff] }
 0x2b0   : > { %5108 = vmatpush1.bf16.msra.mxu0 %v4907_v41  ;;  %4910 = vmatprep.subr.bf16.mxu1 %v4909_v42  ;;  %v4941_v41 = vpack.c.bf16 %v4263_v35, %v4261_v26  ;;  %v4297_v35 = vld [vmem:[%s8019_s4 + $0x688] sm:$0xff] }
 0x2b1   : > { %5110 = vmatprep.subr.bf16.mxu0 %v4909_v42  ;;  %v7180_v42 = vld [vmem:[#allocation2 + $0x28] sm:$0xff] }
 0x2b2   : > { %v3076_v37 = vld [vmem:[%s8021_s6 + $0xe8] sm:$0xff] }
 0x2b3   : > { %4912 = vmatpush1.bf16.msra.mxu1 %v4911_v48 }
 0x2b4   : > { %5112 = vmatpush1.bf16.msra.mxu0 %v4911_v48  ;;  %4914 = vmatprep.subr.bf16.mxu1 %v4913_v53  ;;  %v4269_v48 = vld [vmem:[%s8019_s4 + $0x5a8] sm:$0xff] }
 0x2b5   : > { %5114 = vmatprep.subr.bf16.mxu0 %v4913_v53  ;;  %v2913_v53 = vrot.slane %v7180_v42, 2 }
 0x2b7   : > { %4916 = vmatpush1.bf16.msra.mxu1 %v4915_v63  ;;  %v2914_v5 = vsel %vm1895_vm3, %v2912_v25, %v2913_v53 }
 0x2b8   : > { %5116 = vmatpush1.bf16.msra.mxu0 %v4915_v63  ;;  %4918 = vmatprep.subr.bf16.mxu1 %v4917_v2  ;;  %v4268_v63 = vld [vmem:[%s8019_s4 + $0x5a0] sm:$0xff] }
 0x2b9   : > { %5118 = vmatprep.subr.bf16.mxu0 %v4917_v2  ;;  %v4273_v2 = vld [vmem:[%s8019_s4 + $0x5c8] sm:$0xff] }
 0x2bb   : > { %4920 = vmatpush1.bf16.msra.mxu1 %v4919_v13 }
 0x2bc   : > { %5120 = vmatpush1.bf16.msra.mxu0 %v4919_v13  ;;  %4922 = vmatprep.subr.bf16.mxu1 %v4921_v46  ;;  %v4274_v13 = vld [vmem:[%s8019_s4 + $0x5d0] sm:$0xff] }
 0x2bd   : > { %5122 = vmatprep.subr.bf16.mxu0 %v4921_v46  ;;  %v4279_v46 = vld [vmem:[%s8019_s4 + $0x5f8] sm:$0xff]  ;;  %v4955_v18 = vpack.c.bf16 %v4274_v13, %v4272_v11  ;;  %v3056_v11 = vld [vmem:[%s8021_s6 + $0x48] sm:$0xff] }
 0x2be   : > { %v3058_v13 = vld [vmem:[%s8021_s6 + $0x58] sm:$0xff] }
 0x2bf   : > { %4924 = vmatpush1.bf16.msra.mxu1 %v4923_v14 }
 0x2c0   : > { %5124 = vmatpush1.bf16.msra.mxu0 %v4923_v14  ;;  %4926 = vmatprep.subr.bf16.mxu1 %v4925_v15  ;;  %v4281_v14 = vld [vmem:[%s8019_s4 + $0x608] sm:$0xff] }
 0x2c1   : > { %5126 = vmatprep.subr.bf16.mxu0 %v4925_v15  ;;  %v4283_v15 = vld [vmem:[%s8019_s4 + $0x618] sm:$0xff] }
 0x2c2   : > { %v4961_v20 = vpack.c.bf16 %v4283_v15, %v4281_v14  ;;  %v3061_v15 = vld [vmem:[%s8021_s6 + $0x70] sm:$0xff] }
 0x2c3   : > { %4928 = vmatpush1.bf16.msra.mxu1 %v4927_v21 }
 0x2c4   : > { %5128 = vmatpush1.bf16.msra.mxu0 %v4927_v21  ;;  %4930 = vmatprep.subr.bf16.mxu1 %v4929_v22  ;;  %v4285_v21 = vld [vmem:[%s8019_s4 + $0x628] sm:$0xff] }
 0x2c5   : > { %5130 = vmatprep.subr.bf16.mxu0 %v4929_v22  ;;  %v4287_v22 = vld [vmem:[%s8019_s4 + $0x638] sm:$0xff] }
 0x2c6   : > { %v4965_v54 = vpack.c.bf16 %v4287_v22, %v4285_v21  ;;  %v3065_v21 = vld [vmem:[%s8021_s6 + $0x90] sm:$0xff]  ;;  %v3068_v22 = vld [vmem:[%s8021_s6 + $0xa8] sm:$0xff] }
 0x2c7   : > { %4932 = vmatpush1.bf16.msra.mxu1 %v4931_v28 }
 0x2c8   : > { %5132 = vmatpush1.bf16.msra.mxu0 %v4931_v28  ;;  %4934 = vmatprep.subr.bf16.mxu1 %v4933_v0  ;;  %v4289_v28 = vld [vmem:[%s8019_s4 + $0x648] sm:$0xff] }
 0x2c9   : > { %5134 = vmatprep.subr.bf16.mxu0 %v4933_v0  ;;  %v4291_v0 = vld [vmem:[%s8019_s4 + $0x658] sm:$0xff] }
 0x2ca   : > { %v4969_v24 = vpack.c.bf16 %v4291_v0, %v4289_v28  ;;  %v3069_v28 = vld [vmem:[%s8021_s6 + $0xb0] sm:$0xff]  ;;  %v3072_v0 = vld [vmem:[%s8021_s6 + $0xc8] sm:$0xff] }
 0x2cb   : > { %4936 = vmatpush1.bf16.msra.mxu1 %v4935_v33 }
 0x2cc   : > { %5136 = vmatpush1.bf16.msra.mxu0 %v4935_v33  ;;  %2360 = vmatprep.subr.mxu1 %v4252_v51  ;;  %v4288_v33 = vld [vmem:[%s8019_s4 + $0x640] sm:$0xff] }
 0x2cd   : > { %2851 = vmatprep.subr.mxu0 %v4252_v51  ;;  %v4290_v51 = vld [vmem:[%s8019_s4 + $0x650] sm:$0xff] }
 0x2cf   : > { %2361 = vmatpush1.msra.mxu1 %v4251_v39 }
 0x2d0   : > { %2852 = vmatpush1.msra.mxu0 %v4251_v39  ;;  %2385 = vmatmul.mubr.f32.vlgmr.msra.gmra.mrb[8].mxu1 %v7013_v34  ;;  %v4265_v34 = vld [vmem:[%s8019_s4 + $0x588] sm:$0xff]  ;;  %v4971_v39 = vpack.c.bf16 %v4290_v51, %v4288_v33  ;;  %v3071_v51 = vld [vmem:[%s8021_s6 + $0xc0] sm:$0xff] }
 0x2d1   : > { %4938 = vmatprep.subr.bf16.mxu1 %v4937_v6  ;;  %2876 = vmatmul.mubr.f32.vlgmr.msra.gmra.mrb[16].mxu0 %v6645_v17  ;;  %v4943_v17 = vpack.c.bf16 %v4262_v40, %v4260_v1  ;;  %v4945_v52 = vpack.c.bf16 %v4267_v43, %v4265_v34  ;;  %v2903_v1 = vld [vmem:[#allocation2 + $0x38] sm:$0x7]  ;;  %v3048_v40 = vld [vmem:[%s8021_s6 + $0x8] sm:$0xff]  ;;  %v4296_v34 = vld [vmem:[%s8019_s4 + $0x680] sm:$0xff] }
 0x2d2   : > { %5138 = vmatprep.subr.bf16.mxu0 %v4937_v6  ;;  %4254 = vmatprep.mubr.msk.f32.mxu1 %vm1675_vm1, %v7030_v45  ;;  %v4264_v45 = vld [vmem:[%s8019_s4 + $0x580] sm:$0xff]  ;;  %v4294_v6 = vld [vmem:[%s8019_s4 + $0x670] sm:$0xff] }
 0x2d3   : > { %4940 = vmatpush1.bf16.msra.mxu1 %v4939_v38  ;;  %4311 = vmatprep.mubr.msk.f32.mxu0 %vm1675_vm1, %v7180_v42  ;;  %v4975_v26 = vpack.c.bf16 %v4294_v6, %v4292_v30  ;;  %v3075_v6 = vld [vmem:[%s8021_s6 + $0xe0] sm:$0xff] }
 0x2d4   : > { %5140 = vmatpush1.bf16.msra.mxu0 %v4939_v38  ;;  %2391 = vmatmul.mubr.f32.gmra.mrb[10].mxu1 %v7043_v60  ;;  %v4271_v60 = vld [vmem:[%s8019_s4 + $0x5b8] sm:$0xff]  ;;  %v2900_v38 = vld [vmem:[#allocation2 + $0x10] sm:$0xfc] }
 0x2d5   : > { %4942 = vmatprep.subr.bf16.mxu1 %v4941_v41  ;;  %2882 = vmatmul.mubr.f32.gmra.mrb[18].mxu0 %v6653_v4  ;;  %v4947_v4 = vpack.c.bf16 %v4266_v47, %v4264_v45  ;;  %v4949_v61 = vpack.c.bf16 %v4271_v60, %v4269_v48  ;;  %v2909_v43 = vrot.slane %v2900_v38, 2  ;;  %v3049_v45 = vld [vmem:[%s8021_s6 + $0x10] sm:$0xff]  ;;  %v2917_v47 = vrot.slane %v2903_v1, 2  ;;  %v3054_v48 = vld [vmem:[%s8021_s6 + $0x38] sm:$0xff]  ;;  %v5557_v60 = vld [vmem:[#allocation2 + $0x20] sm:$0xff] }
 0x2d6   : > { %5142 = vmatprep.subr.bf16.mxu0 %v4941_v41  ;;  %4255 = vmatprep.mubr.msk.f32.mxu1 %vm1675_vm1, %v7003_v32  ;;  %v4270_v32 = vld [vmem:[%s8019_s4 + $0x5b0] sm:$0xff]  ;;  %v3050_v41 = vld [vmem:[%s8021_s6 + $0x18] sm:$0xff]  ;;  %v3080_v38 = vld [vmem:[%s8021_s6 + $0x108] sm:$0xff] }
 0x2d7   : > { %4944 = vmatpush1.bf16.msra.mxu1 %v4943_v17  ;;  %4312 = vmatprep.mubr.msk.f32.mxu0 %vm1675_vm1, %v7207_v56  ;;  %v4951_v8 = vpack.c.bf16 %v4270_v32, %v4268_v63  ;;  %v5177_v25 = vpack.c.bf16 %v3050_v41, %v3048_v40  ;;  %v5558_v63 = vld [vmem:[#allocation2 + $0x10] sm:$0xff]  ;;  %v3082_v1 = vld [vmem:[%s8021_s6 + $0x118] sm:$0xff]  ;;  %v3079_v41 = vld [vmem:[%s8021_s6 + $0x100] sm:$0xff] }
 0x2d8   : > { %5144 = vmatpush1.bf16.msra.mxu0 %v4943_v17  ;;  %2397 = vmatmul.mubr.f32.gmra.mrb[12].mxu1 %v7015_v36  ;;  %v4275_v36 = vld [vmem:[%s8019_s4 + $0x5d8] sm:$0xff]  ;;  %v3047_v17 = vld [vmem:[%s8021_s6] sm:$0xff]  ;;  %v5209_v40 = vpack.c.bf16 %v3082_v1, %v3080_v38 }
 0x2d9   : > { %4946 = vmatprep.subr.bf16.mxu1 %v4945_v52  ;;  %2888 = vmatmul.mubr.f32.gmra.mrb[20].mxu0 %v7212_v58  ;;  %v4953_v9 = vpack.c.bf16 %v4275_v36, %v4273_v2  ;;  %v5181_v36 = vpack.c.bf16 %v3054_v48, %v3052_v50  ;;  %v3085_v50 = vld [vmem:[%s8021_s6 + $0x130] sm:$0xff] }
 0x2da   : > { %5146 = vmatprep.subr.bf16.mxu0 %v4945_v52  ;;  %4298 = vmatprep.mubr.msk.f32.mxu1 %vm1675_vm1, %v6669_v29  ;;  %v4277_v29 = vld [vmem:[%s8019_s4 + $0x5e8] sm:$0xff]  ;;  %v2902_v52 = vld [vmem:[#allocation2 + $0x30] sm:$0x7] }
 0x2db   : > { %4948 = vmatpush1.bf16.msra.mxu1 %v4947_v4  ;;  %4313 = vmatprep.mubr.msk.f32.mxu0 %vm1675_vm1, %v2914_v5  ;;  %v4957_v19 = vpack.c.bf16 %v4279_v46, %v4277_v29  ;;  %v2915_v2 = vrot.slane %v2902_v52, 2  ;;  %v3051_v5 = vld [vmem:[%s8021_s6 + $0x20] sm:$0xff] }
 0x2dc   : > { %5148 = vmatpush1.bf16.msra.mxu0 %v4947_v4  ;;  %4950 = vmatprep.subr.bf16.mxu1 %v4949_v61  ;;  %v2910_v4 = vrot.slane %v5557_v60, 2  ;;  %v3083_v52 = vld [vmem:[%s8021_s6 + $0x120] sm:$0xff] }
 0x2dd   : > { %5150 = vmatprep.subr.bf16.mxu0 %v4949_v61  ;;  %v5179_v61 = vpack.c.bf16 %v3049_v45, %v3047_v17  ;;  %v3084_v17 = vld [vmem:[%s8021_s6 + $0x128] sm:$0xff]  ;;  %v3086_v45 = vld [vmem:[%s8021_s6 + $0x138] sm:$0xff]  ;;  %v5215_v48 = vpack.c.bf16 %v3085_v50, %v3083_v52  ;;  %v4323_v52 = vld [vmem:[%s8022_s7 + $0xc0] sm:$0xff] }
 0x2de   : > { %v2911_v32 = vsel %vm1895_vm3, %v2909_v43, %v2910_v4  ;;  %v2916_v46 = vsel %vm1895_vm3, %v2910_v4, %v2915_v2  ;;  %v5624_v4 = vmov 0.0|0.0   ;;  %v4324_v50 = vld [vmem:[%s8022_s7 + $0xc8] sm:$0xff] }
 0x2df   : > { %4952 = vmatpush1.bf16.msra.mxu1 %v4951_v8 }
 0x2e0   : > { %5152 = vmatpush1.bf16.msra.mxu0 %v4951_v8  ;;  %4954 = vmatprep.subr.bf16.mxu1 %v4953_v9  ;;  %v3053_v8 = vld [vmem:[%s8021_s6 + $0x30] sm:$0xff] }
 0x2e1   : > { %5154 = vmatprep.subr.bf16.mxu0 %v4953_v9  ;;  %v2918_v9 = vsel %vm1895_vm3, %v2913_v53, %v2917_v47  ;;  %v5183_v29 = vpack.c.bf16 %v3053_v8, %v3051_v5  ;;  %v3055_v53 = vld [vmem:[%s8021_s6 + $0x40] sm:$0xff]  ;;  %v3199_v5 = vld [vmem:[%s8022_s7 + $0x28] sm:$0xff] }
 0x2e3   : > { %4956 = vmatpush1.bf16.msra.mxu1 %v4955_v18 }
 0x2e4   : > { %5156 = vmatpush1.bf16.msra.mxu0 %v4955_v18  ;;  %4958 = vmatprep.subr.bf16.mxu1 %v4957_v19  ;;  %v3057_v18 = vld [vmem:[%s8021_s6 + $0x50] sm:$0xff] }
 0x2e5   : > { %5158 = vmatprep.subr.bf16.mxu0 %v4957_v19  ;;  %v3060_v19 = vld [vmem:[%s8021_s6 + $0x68] sm:$0xff]  ;;  %v5187_v12 = vpack.c.bf16 %v3057_v18, %v3055_v53  ;;  %v3204_v53 = vld [vmem:[%s8022_s7 + $0x50] sm:$0xff]  ;;  %v3205_v18 = vld [vmem:[%s8022_s7 + $0x58] sm:$0xff] }
 0x2e6   : > { %v5189_v14 = vpack.c.bf16 %v3062_v3, %v3060_v19  ;;  %v5263_v19 = vpack.c.bf16 %v3205_v18, %v3204_v53  ;;  %v3206_v3 = vld [vmem:[%s8022_s7 + $0x60] sm:$0xff]  ;;  %v4333_v53 = vld [vmem:[%s8022_s7 + $0x110] sm:$0xff]  ;;  %v4334_v18 = vld [vmem:[%s8022_s7 + $0x118] sm:$0xff] }
 0x2e7   : > { %4960 = vmatpush1.bf16.msra.mxu1 %v4959_v16 }
 0x2e8   : > { %5160 = vmatpush1.bf16.msra.mxu0 %v4959_v16  ;;  %4962 = vmatprep.subr.bf16.mxu1 %v4961_v20  ;;  %v3064_v16 = vld [vmem:[%s8021_s6 + $0x88] sm:$0xff] }
 0x2e9   : > { %5162 = vmatprep.subr.bf16.mxu0 %v4961_v20  ;;  %v3066_v20 = vld [vmem:[%s8021_s6 + $0x98] sm:$0xff] }
 0x2ea   : > { %v5193_v10 = vpack.c.bf16 %v3066_v20, %v3064_v16 }
 0x2eb   : > { %4964 = vmatpush1.bf16.msra.mxu1 %v4963_v59 }
 0x2ec   : > { %5164 = vmatpush1.bf16.msra.mxu0 %v4963_v59  ;;  %4966 = vmatprep.subr.bf16.mxu1 %v4965_v54  ;;  %v3070_v59 = vld [vmem:[%s8021_s6 + $0xb8] sm:$0xff] }
 0x2ed   : > { %5166 = vmatprep.subr.bf16.mxu0 %v4965_v54  ;;  %v5195_v54 = vpack.c.bf16 %v3065_v21, %v3063_v44  ;;  %v5197_v23 = vpack.c.bf16 %v3070_v59, %v3068_v22 }
 0x2ef   : > { %4968 = vmatpush1.bf16.msra.mxu1 %v4967_v31 }
 0x2f0   : > { %5168 = vmatpush1.bf16.msra.mxu0 %v4967_v31  ;;  %4970 = vmatprep.subr.bf16.mxu1 %v4969_v24  ;;  %v3074_v31 = vld [vmem:[%s8021_s6 + $0xd8] sm:$0xff] }
 0x2f1   : > { %5170 = vmatprep.subr.bf16.mxu0 %v4969_v24  ;;  %v5199_v24 = vpack.c.bf16 %v3069_v28, %v3067_v27  ;;  %v5201_v33 = vpack.c.bf16 %v3074_v31, %v3072_v0  ;;  %v4320_v27 = vld [vmem:[%s8022_s7 + $0xa8] sm:$0xff] }
 0x2f3   : > { %4972 = vmatpush1.bf16.msra.mxu1 %v4971_v39 }
 0x2f4   : > { %5172 = vmatpush1.bf16.msra.mxu0 %v4971_v39  ;;  %4974 = vmatprep.subr.bf16.mxu1 %v4973_v62  ;;  %v3078_v39 = vld [vmem:[%s8021_s6 + $0xf8] sm:$0xff] }
 0x2f5   : > { %5174 = vmatprep.subr.bf16.mxu0 %v4973_v62  ;;  %v5203_v62 = vpack.c.bf16 %v3073_v49, %v3071_v51  ;;  %v5205_v30 = vpack.c.bf16 %v3078_v39, %v3076_v37 }
 0x2f7   : > { %4976 = vmatpush1.bf16.msra.mxu1 %v4975_v26 }
 0x2f8   : > { %5176 = vmatpush1.bf16.msra.mxu0 %v4975_v26  ;;  %2507 = vmatprep.subr.mxu1 %v4297_v35  ;;  %v3077_v26 = vld [vmem:[%s8021_s6 + $0xf0] sm:$0xff] }
 0x2f9   : > { %2968 = vmatprep.subr.mxu0 %v4297_v35  ;;  %v5207_v35 = vpack.c.bf16 %v3077_v26, %v3075_v6  ;;  %v4321_v6 = vld [vmem:[%s8022_s7 + $0xb0] sm:$0xff]  ;;  %v4322_v26 = vld [vmem:[%s8022_s7 + $0xb8] sm:$0xff] }
 0x2fb   : > { %2508 = vmatpush1.msra.mxu1 %v4296_v34 }
 0x2fc   : > { %2969 = vmatpush1.msra.mxu0 %v4296_v34  ;;  %2532 = vmatmul.mubr.f32.vlgmr.msra.gmra.mrb[8].mxu1 %v5558_v63  ;;  %v3081_v34 = vld [vmem:[%s8021_s6 + $0x110] sm:$0xff] }
 0x2fd   : > { %2993 = vmatmul.mubr.f32.vlgmr.msra.gmra.mrb[16].mxu0 %v2911_v32  ;;  %4299 = vmatprep.mubr.msk.f32.mxu1 %vm1675_vm1, %v7180_v42  ;;  %v5185_v42 = vpack.c.bf16 %v3058_v13, %v3056_v11  ;;  %v5211_v43 = vpack.c.bf16 %v3081_v34, %v3079_v41  ;;  %v3196_v63 = vld [vmem:[%s8022_s7 + $0x10] sm:$0xff]  ;;  %v3197_v32 = vld [vmem:[%s8022_s7 + $0x18] sm:$0xff] }
 0x2fe   : > { %4314 = vmatprep.mubr.msk.f32.mxu0 %vm1675_vm1, %v2918_v9  ;;  %5178 = vmatprep.subr.bf16.mxu1 %v5177_v25  ;;  %v3195_v25 = vld [vmem:[%s8022_s7 + $0x8] sm:$0xff]  ;;  %v3200_v9 = vld [vmem:[%s8022_s7 + $0x30] sm:$0xff]  ;;  %v3201_v11 = vld [vmem:[%s8022_s7 + $0x38] sm:$0xff] }
 0x2ff   : > { %5180 = vmatpush1.bf16.msra.mxu1 %v5179_v61  ;;  %5247 = vmatprep.subr.bf16.mxu0 %v5624_v4  ;;  %v5257_v13 = vpack.c.bf16 %v3201_v11, %v3200_v9  ;;  %v4329_v9 = vld [vmem:[%s8022_s7 + $0xf0] sm:$0xff]  ;;  %v4330_v11 = vld [vmem:[%s8022_s7 + $0xf8] sm:$0xff] }
 0x300   : > { %2538 = vmatmul.mubr.f32.gmra.mrb[10].mxu1 %v5557_v60  ;;  %5182 = vmatprep.subr.bf16.mxu1 %v5181_v36  ;;  %v3194_v60 = vld [vmem:[%s8022_s7] sm:$0xff] }
 0x301   : > { %2999 = vmatmul.mubr.f32.gmra.mrb[18].mxu0 %v2916_v46  ;;  %4300 = vmatprep.mubr.msk.f32.mxu1 %vm1675_vm1, %v7207_v56  ;;  %v3059_v56 = vld [vmem:[%s8021_s6 + $0x60] sm:$0xff]  ;;  %v5248_v61 = vpack.c.bf16 %v3195_v25, %v3194_v60  ;;  %v3203_v46 = vld [vmem:[%s8022_s7 + $0x48] sm:$0xff]  ;;  %v5224_v25 = vpack.c.bf16 %v4324_v50, %v4323_v52  ;;  %v4343_v52 = vld [vmem:[%s8022_s7 + $0x150] sm:$0xff] }
 0x302   : > { %4315 = vmatprep.mubr.msk.f32.mxu0 %vm1675_vm1, %v2917_v47  ;;  %v5213_v47 = vpack.c.bf16 %v3086_v45, %v3084_v17  ;;  %v3198_v36 = vld [vmem:[%s8022_s7 + $0x20] sm:$0xff]  ;;  %v5221_v17 = vpack.c.bf16 %v4322_v26, %v4321_v6  ;;  %v4344_v50 = vld [vmem:[%s8022_s7 + $0x158] sm:$0xff] }
 0x303   : > { %5184 = vmatpush1.bf16.msra.mxu1 %v5183_v29  ;;  %5249 = vmatpush1.bf16.msra.mxu0 %v5248_v61  ;;  %v5254_v8 = vpack.c.bf16 %v3199_v5, %v3198_v36  ;;  %v3202_v29 = vld [vmem:[%s8022_s7 + $0x40] sm:$0xff]  ;;  %v4328_v5 = vld [vmem:[%s8022_s7 + $0xe8] sm:$0xff] }
 0x304   : > { %2544 = vmatmul.mubr.f32.gmra.mrb[12].mxu1 %v7212_v58  ;;  %5186 = vmatprep.subr.bf16.mxu1 %v5185_v42  ;;  %v5191_v58 = vpack.c.bf16 %v3061_v15, %v3059_v56  ;;  %v5260_v42 = vpack.c.bf16 %v3203_v46, %v3202_v29  ;;  %v3023_v56 = vld [vmem:[%s8020_s5] sm:$0x3]  ;;  %v4332_v46 = vld [vmem:[%s8022_s7 + $0x108] sm:$0xff] }
 0x305   : > { %3005 = vmatmul.mubr.f32.gmra.mrb[20].mxu0 %v2915_v2  ;;  %v5251_v2 = vpack.c.bf16 %v3197_v32, %v3196_v63  ;;  %5250 = vmatprep.subr.bf16.mxu0 %v5624_v4  ;;  %v3028_v16 = vrot.slane %v3023_v56, %v6511_v55  ;;  %v4325_v63 = vld [vmem:[%s8022_s7 + $0xd0] sm:$0xff]  ;;  %v4326_v32 = vld [vmem:[%s8022_s7 + $0xd8] sm:$0xff]  ;;  %v4327_v36 = vld [vmem:[%s8022_s7 + $0xe0] sm:$0xff] }
 0x306   : > { %v4331_v29 = vld [vmem:[%s8022_s7 + $0x100] sm:$0xff] }
 0x307   : > { %5188 = vmatpush1.bf16.msra.mxu1 %v5187_v12  ;;  %5252 = vmatpush1.bf16.msra.mxu0 %v5251_v2  ;;  %v3207_v12 = vld [vmem:[%s8022_s7 + $0x68] sm:$0xff]  ;;  %v5227_v2 = vpack.c.bf16 %v4326_v32, %v4325_v63  ;;  %v5281_v63 = vpack.c.bf16 %v4344_v50, %v4343_v52 }
 0x308   : > { %5190 = vmatprep.subr.bf16.mxu1 %v5189_v14  ;;  %5253 = vmatprep.subr.bf16.mxu0 %v5624_v4  ;;  %v5266_v14 = vpack.c.bf16 %v3207_v12, %v3206_v3  ;;  %v5239_v3 = vpack.c.bf16 %v4334_v18, %v4333_v53  ;;  %v3209_v12 = vld [vmem:[%s8022_s7 + $0x78] sm:$0xff]  ;;  %v4368_v53 = vld [vmem:[%s8022_s7 + $0x210] sm:$0xff] }
 0x309   : > { %v4369_v18 = vld [vmem:[%s8022_s7 + $0x218] sm:$0xff] }
 0x30b   : > { %5192 = vmatpush1.bf16.msra.mxu1 %v5191_v58  ;;  %5255 = vmatpush1.bf16.msra.mxu0 %v5254_v8  ;;  %v5230_v8 = vpack.c.bf16 %v4328_v5, %v4327_v36  ;;  %v4345_v5 = vld [vmem:[%s8022_s7 + $0x160] sm:$0xff] }
 0x30c   : > { %5194 = vmatprep.subr.bf16.mxu1 %v5193_v10  ;;  %5256 = vmatprep.subr.bf16.mxu0 %v5624_v4  ;;  %v3032_v10 = vrot.slane %v3023_v56, %v6516_v57  ;;  %v4335_v56 = vld [vmem:[%s8022_s7 + $0x120] sm:$0xff] }
 0x30f   : > { %5196 = vmatpush1.bf16.msra.mxu1 %v5195_v54  ;;  %5258 = vmatpush1.bf16.msra.mxu0 %v5257_v13  ;;  %v5233_v13 = vpack.c.bf16 %v4330_v11, %v4329_v9  ;;  %v4366_v9 = vld [vmem:[%s8022_s7 + $0x200] sm:$0xff]  ;;  %v4367_v11 = vld [vmem:[%s8022_s7 + $0x208] sm:$0xff] }
 0x310   : > { %5198 = vmatprep.subr.bf16.mxu1 %v5197_v23  ;;  %5259 = vmatprep.subr.bf16.mxu0 %v5624_v4  ;;  %v4319_v23 = vld [vmem:[%s8022_s7 + $0xa0] sm:$0xff] }
 0x311   : > { %v5218_v37 = vpack.c.bf16 %v4320_v27, %v4319_v23  ;;  %v3213_v23 = vld [vmem:[%s8022_s7 + $0x98] sm:$0xff] }
 0x313   : > { %5200 = vmatpush1.bf16.msra.mxu1 %v5199_v24  ;;  %5261 = vmatpush1.bf16.msra.mxu0 %v5260_v42  ;;  %v5236_v42 = vpack.c.bf16 %v4332_v46, %v4331_v29  ;;  %v5314_v29 = vpack.c.bf16 %v4367_v11, %v4366_v9  ;;  %v4347_v46 = vld [vmem:[%s8022_s7 + $0x170] sm:$0xff]  ;;  %v4391_v11 = vld [vmem:[%s8022_s7 + $0x2c0] sm:$0xff] }
 0x314   : > { %5202 = vmatprep.subr.bf16.mxu1 %v5201_v33  ;;  %5262 = vmatprep.subr.bf16.mxu0 %v5624_v4 }
 0x317   : > { %5204 = vmatpush1.bf16.msra.mxu1 %v5203_v62  ;;  %5264 = vmatpush1.bf16.msra.mxu0 %v5263_v19  ;;  %v3208_v19 = vld [vmem:[%s8022_s7 + $0x70] sm:$0xff] }
 0x318   : > { %5206 = vmatprep.subr.bf16.mxu1 %v5205_v30  ;;  %5265 = vmatprep.subr.bf16.mxu0 %v5624_v4 }
 0x31b   : > { %5208 = vmatpush1.bf16.msra.mxu1 %v5207_v35  ;;  %5267 = vmatpush1.bf16.msra.mxu0 %v5266_v14  ;;  %v5269_v14 = vpack.c.bf16 %v3209_v12, %v3208_v19  ;;  %v4349_v12 = vld [vmem:[%s8022_s7 + $0x180] sm:$0xff] }
 0x31c   : > { %5210 = vmatprep.subr.bf16.mxu1 %v5209_v40  ;;  %5268 = vmatprep.subr.bf16.mxu0 %v5624_v4 }
 0x31f   : > { %5212 = vmatpush1.bf16.msra.mxu1 %v5211_v43  ;;  %5270 = vmatpush1.bf16.msra.mxu0 %v5269_v14  ;;  %v4350_v14 = vld [vmem:[%s8022_s7 + $0x188] sm:$0xff] }
 0x320   : > { %5214 = vmatprep.subr.bf16.mxu1 %v5213_v47  ;;  %5271 = vmatprep.subr.bf16.mxu0 %v5624_v4 }
 0x323   : > { %5216 = vmatpush1.bf16.msra.mxu1 %v5215_v48 }
 0x324   : > { %5217 = vmatprep.subr.bf16.mxu1 %v5624_v4 }
 0x3cf   : > { %v2533_v15 = vpop.f32.mrb[8].mxu1 }
 0x3d0   : > { %v2994_v20 = vpop.f32.mrb[16].mxu0  ;;  %v2535_v58 = vpop.f32.mrb[9].mxu1 }
 0x3d1   : > { %v3017_v44 = vmax.f32 %v2533_v15, %v2994_v20  ;;  %v2996_v21 = vpop.f32.mrb[17].mxu0  ;;  %v4336_v15 = vld [vmem:[%s8022_s7 + $0x128] sm:$0xff] }
 0x3d2   : > { %v3018_v22 = vmax.f32 %v2535_v58, %v2996_v21  ;;  %v5242_v20 = vpack.c.bf16 %v4336_v15, %v4335_v56  ;;  %v3211_v58 = vld [vmem:[%s8022_s7 + $0x88] sm:$0xff]  ;;  %v4338_v21 = vld [vmem:[%s8022_s7 + $0x138] sm:$0xff]  ;;  %v4370_v56 = vld [vmem:[%s8022_s7 + $0x220] sm:$0xff] }
 0x3d3   : > { %v7493_v59 = vadd.f32 %v3028_v16, %v3017_v44  ;;  %v2539_v54 = vpop.f32.mrb[10].mxu1  ;;  %v4337_v44 = vld [vmem:[%s8022_s7 + $0x130] sm:$0xff]  ;;  %v4371_v15 = vld [vmem:[%s8022_s7 + $0x228] sm:$0xff] }
 0x3d4   : > { %v7501_v28 = vadd.f32 %v3032_v10, %v3018_v22  ;;  %v3000_v0 = vpop.f32.mrb[18].mxu0  ;;  %v2541_v31 = vpop.f32.mrb[11].mxu1  ;;  %v3212_v22 = vld [vmem:[%s8022_s7 + $0x90] sm:$0xff] }
 0x3d5   : > { %v3019_v24 = vmax.f32 %v2539_v54, %v3000_v0  ;;  %v3002_v33 = vpop.f32.mrb[19].mxu0  ;;  %v3041_v39 = vmax.f32 %v7493_v59, 0.0  ;;  %v5245_v54 = vpack.c.bf16 %v4338_v21, %v4337_v44  ;;  %v5275_v27 = vpack.c.bf16 %v3213_v23, %v3212_v22  ;;  %v4341_v59 = vld [vmem:[%s8022_s7 + $0x140] sm:$0xff]  ;;  %v4372_v44 = vld [vmem:[%s8022_s7 + $0x230] sm:$0xff]  ;;  %v4373_v21 = vld [vmem:[%s8022_s7 + $0x238] sm:$0xff] }
 0x3d6   : > { %v3042_v51 = vmax.f32 %v7501_v28, 0.0  ;;  %v3020_v49 = vmax.f32 %v2541_v31, %v3002_v33  ;;  %v4353_v23 = vld [vmem:[%s8022_s7 + $0x1a0] sm:$0xff] }
 0x3d7   : > { %v7505_v62 = vadd.f32 %v3028_v16, %v3019_v24  ;;  %v2545_v30 = vpop.f32.mrb[12].mxu1 }
 0x3d8   : > { %v7513_v35 = vadd.f32 %v3032_v10, %v3020_v49  ;;  %v3006_v38 = vpop.f32.mrb[20].mxu0  ;;  %4316 = vmatprep.mubr.msk.f32.mxu1 %vm3087_vm6, %v3042_v51  ;;  %v2547_v1 = vpop.f32.mrb[13].mxu1 }
 0x3d9   : > { %v3021_v40 = vmax.f32 %v2545_v30, %v3006_v38  ;;  %v3008_v41 = vpop.f32.mrb[21].mxu0  ;;  %3162 = vmatmul.mubr.f32.vlgmr.msra.gmra.mrb[14].mxu1 %v3041_v39  ;;  %v3043_v45 = vmax.f32 %v7505_v62, 0.0  ;;  %v4363_v62 = vld [vmem:[%s8022_s7 + $0x1e8] sm:$0xff] }
 0x3da   : > { %v3044_v34 = vmax.f32 %v7513_v35, 0.0  ;;  %v3022_v43 = vmax.f32 %v2547_v1, %v3008_v41  ;;  %5219 = vmatpush1.bf16.msra.mxu1 %v5218_v37 }
 0x3db   : > { %v7522_v47 = vadd.f32 %v3028_v16, %v3021_v40  ;;  %5220 = vmatprep.subr.bf16.mxu1 %v5624_v4  ;;  %v3210_v16 = vld [vmem:[%s8022_s7 + $0x80] sm:$0xff] }
 0x3dc   : > { %v7531_v48 = vadd.f32 %v3032_v10, %v3022_v43  ;;  %4317 = vmatprep.mubr.msk.f32.mxu1 %vm3087_vm6, %v3044_v34  ;;  %v5272_v10 = vpack.c.bf16 %v3211_v58, %v3210_v16  ;;  %v5290_v16 = vpack.c.bf16 %v4350_v14, %v4349_v12  ;;  %v4351_v58 = vld [vmem:[%s8022_s7 + $0x190] sm:$0xff]  ;;  %v4398_v14 = vld [vmem:[%s8022_s7 + $0x2f8] sm:$0xff] }
 0x3dd   : > { %3168 = vmatmul.mubr.f32.gmra.mrb[16].mxu1 %v3043_v45  ;;  %v3045_v61 = vmax.f32 %v7522_v47, 0.0  ;;  %v4397_v12 = vld [vmem:[%s8022_s7 + $0x2f0] sm:$0xff] }
 0x3de   : > { %v3046_v60 = vmax.f32 %v7531_v48, 0.0  ;;  %5222 = vmatpush1.bf16.msra.mxu1 %v5221_v17  ;;  %5273 = vmatpush1.bf16.msra.mxu0 %v5272_v10  ;;  %v4364_v48 = vld [vmem:[%s8022_s7 + $0x1f0] sm:$0xff]  ;;  %v4352_v10 = vld [vmem:[%s8022_s7 + $0x198] sm:$0xff] }
 0x3df   : > { %5223 = vmatprep.subr.bf16.mxu1 %v5624_v4  ;;  %5274 = vmatprep.subr.bf16.mxu0 %v5624_v4  ;;  %v5293_v22 = vpack.c.bf16 %v4352_v10, %v4351_v58  ;;  %v4401_v58 = vld [vmem:[%s8022_s7 + $0x310] sm:$0xff]  ;;  %v4402_v10 = vld [vmem:[%s8022_s7 + $0x318] sm:$0xff] }
 0x3e0   : > { %4318 = vmatprep.mubr.msk.f32.mxu1 %vm3087_vm6, %v3046_v60 }
 0x3e1   : > { %3174 = vmatmul.mubr.f32.gmra.mrb[18].mxu1 %v3045_v61 }
 0x3e2   : > { %5225 = vmatpush1.bf16.msra.mxu1 %v5224_v25  ;;  %5276 = vmatpush1.bf16.msra.mxu0 %v5275_v27  ;;  %v4354_v27 = vld [vmem:[%s8022_s7 + $0x1a8] sm:$0xff] }
 0x3e3   : > { %5226 = vmatprep.subr.bf16.mxu1 %v5624_v4  ;;  %5307 = vmatprep.subr.bf16.mxu0 %v5624_v4 }
 0x3e6   : > { %5228 = vmatpush1.bf16.msra.mxu1 %v5227_v2 }
 0x3e7   : > { %5229 = vmatprep.subr.bf16.mxu1 %v5624_v4 }
 0x3ea   : > { %5231 = vmatpush1.bf16.msra.mxu1 %v5230_v8  ;;  %v4346_v8 = vld [vmem:[%s8022_s7 + $0x168] sm:$0xff] }
 0x3eb   : > { %5232 = vmatprep.subr.bf16.mxu1 %v5624_v4 }
 0x3ee   : > { %5234 = vmatpush1.bf16.msra.mxu1 %v5233_v13  ;;  %v5284_v13 = vpack.c.bf16 %v4346_v8, %v4345_v5  ;;  %v4390_v8 = vld [vmem:[%s8022_s7 + $0x2b8] sm:$0xff] }
 0x3ef   : > { %5235 = vmatprep.subr.bf16.mxu1 %v5624_v4 }
 0x3f2   : > { %5237 = vmatpush1.bf16.msra.mxu1 %v5236_v42  ;;  %v4348_v42 = vld [vmem:[%s8022_s7 + $0x178] sm:$0xff] }
 0x3f3   : > { %5238 = vmatprep.subr.bf16.mxu1 %v5624_v4  ;;  %v5287_v19 = vpack.c.bf16 %v4348_v42, %v4347_v46  ;;  %v4393_v46 = vld [vmem:[%s8022_s7 + $0x2d0] sm:$0xff]  ;;  %v4394_v42 = vld [vmem:[%s8022_s7 + $0x2d8] sm:$0xff] }
 0x3f6   : > { %5240 = vmatpush1.bf16.msra.mxu1 %v5239_v3  ;;  %v5317_v3 = vpack.c.bf16 %v4369_v18, %v4368_v53  ;;  %v5353_v53 = vpack.c.bf16 %v4394_v42, %v4393_v46  ;;  %v4395_v18 = vld [vmem:[%s8022_s7 + $0x2e0] sm:$0xff]  ;;  %v3818_v46 = vld [vmem:[%s8026_s11 + $0x28] sm:$0xff] }
 0x3f7   : > { %5241 = vmatprep.subr.bf16.mxu1 %v5624_v4 }
 0x3fa   : > { %5243 = vmatpush1.bf16.msra.mxu1 %v5242_v20  ;;  %v5320_v20 = vpack.c.bf16 %v4371_v15, %v4370_v56  ;;  %v5359_v56 = vpack.c.bf16 %v4398_v14, %v4397_v12  ;;  %v4399_v15 = vld [vmem:[%s8022_s7 + $0x300] sm:$0xff]  ;;  %v3822_v12 = vld [vmem:[%s8026_s11 + $0x48] sm:$0xff] }
 0x3fb   : > { %5244 = vmatprep.subr.bf16.mxu1 %v5624_v4 }
 0x3fe   : > { %5246 = vmatpush1.bf16.msra.mxu1 %v5245_v54  ;;  %v5323_v54 = vpack.c.bf16 %v4373_v21, %v4372_v44  ;;  %v5365_v44 = vpack.c.bf16 %v4402_v10, %v4401_v58 }
 0x3ff   : > { %5277 = vmatprep.subr.bf16.mxu1 %v5624_v4 }
 0x4ac   : > { %v3163_v0 = vpop.f32.mrb[14].mxu1 }
 0x4ad   : > { %v3180_v31 = vmax.f32 %v3041_v39, %v3163_v0  ;;  %v3165_v24 = vpop.f32.mrb[15].mxu1  ;;  %v4362_v39 = vld [vmem:[%s8022_s7 + $0x1e0] sm:$0xff] }
 0x4ae   : > { %v3181_v33 = vmax.f32 %v3042_v51, %v3165_v24  ;;  %v4342_v51 = vld [vmem:[%s8022_s7 + $0x148] sm:$0xff]  ;;  %v4374_v0 = vld [vmem:[%s8022_s7 + $0x240] sm:$0xff]  ;;  %v5296_v24 = vpack.c.bf16 %v4354_v27, %v4353_v23  ;;  %v3724_v23 = vld [vmem:[%s8024_s9 + $0x10] sm:$0xff] }
 0x4af   : > { %3186 = vst [vmem:[#allocation3] sm:$0xff] %v3180_v31  ;;  %v5278_v41 = vpack.c.bf16 %v4342_v51, %v4341_v59  ;;  %v4375_v31 = vld [vmem:[%s8022_s7 + $0x248] sm:$0xff]  ;;  %v4357_v51 = vld [vmem:[%s8022_s7 + $0x1c0] sm:$0xff] }
 0x4b0   : > { %3187 = vst.msk [vmem:[#allocation3 + $0x8] sm:$0xff] %vm3087_vm6, %v3181_v33  ;;  %v3169_v49 = vpop.f32.mrb[16].mxu1  ;;  %v5326_v33 = vpack.c.bf16 %v4375_v31, %v4374_v0  ;;  %v3725_v0 = vld [vmem:[%s8024_s9 + $0x18] sm:$0xff]  ;;  %v3726_v31 = vld [vmem:[%s8024_s9 + $0x20] sm:$0xff] }
 0x4b1   : > { %v3182_v37 = vmax.f32 %v3043_v45, %v3169_v49  ;;  %v3171_v30 = vpop.f32.mrb[17].mxu1  ;;  %v4355_v49 = vld [vmem:[%s8022_s7 + $0x1b0] sm:$0xff] }
 0x4b2   : > { %v3183_v6 = vmax.f32 %v3044_v34, %v3171_v30  ;;  %v5308_v34 = vpack.c.bf16 %v4363_v62, %v4362_v39  ;;  %v4376_v30 = vld [vmem:[%s8022_s7 + $0x250] sm:$0xff]  ;;  %v4358_v39 = vld [vmem:[%s8022_s7 + $0x1c8] sm:$0xff]  ;;  %v4378_v62 = vld [vmem:[%s8022_s7 + $0x260] sm:$0xff] }
 0x4b3   : > { %3188 = vst [vmem:[#allocation3 + $0x10] sm:$0xff] %v3182_v37  ;;  %v4356_v37 = vld [vmem:[%s8022_s7 + $0x1b8] sm:$0xff] }
 0x4b4   : > { %3189 = vst.msk [vmem:[#allocation3 + $0x18] sm:$0xff] %vm3087_vm6, %v3183_v6  ;;  %v3175_v28 = vpop.f32.mrb[18].mxu1  ;;  %v4377_v6 = vld [vmem:[%s8022_s7 + $0x258] sm:$0xff]  ;;  %v5299_v59 = vpack.c.bf16 %v4356_v37, %v4355_v49  ;;  %v3728_v49 = vld [vmem:[%s8024_s9 + $0x30] sm:$0xff] }
 0x4b5   : > { %v3184_v26 = vmax.f32 %v3045_v61, %v3175_v28  ;;  %v3177_v35 = vpop.f32.mrb[19].mxu1  ;;  %v5329_v28 = vpack.c.bf16 %v4377_v6, %v4376_v30  ;;  %v3729_v37 = vld [vmem:[%s8024_s9 + $0x38] sm:$0xff]  ;;  %v3730_v6 = vld [vmem:[%s8024_s9 + $0x40] sm:$0xff] }
 0x4b6   : > { %v3185_v38 = vmax.f32 %v3046_v60, %v3177_v35  ;;  %v4365_v60 = vld [vmem:[%s8022_s7 + $0x1f8] sm:$0xff]  ;;  %v5302_v35 = vpack.c.bf16 %v4358_v39, %v4357_v51  ;;  %v5377_v30 = vpack.c.bf16 %v3729_v37, %v3728_v49  ;;  %v3732_v51 = vld [vmem:[%s8024_s9 + $0x50] sm:$0xff] }
 0x4b7   : > { %3190 = vst [vmem:[#allocation3 + $0x20] sm:$0x1] %v3184_v26  ;;  %v3215_v1 = vld [vmem:[#allocation3 + $0x4] ss:$8 sm:$0x3]  ;;  %v5311_v36 = vpack.c.bf16 %v4365_v60, %v4364_v48  ;;  %v3733_v39 = vld [vmem:[%s8024_s9 + $0x58] sm:$0xff] }
 0x4b8   : > { %v3193_v40 = vld [vmem:[#allocation3] ss:$8 sm:$0x3]  ;;  %3192 = vst.msk [vmem:[#allocation3 + $0x28] sm:$0x1] %vm3191_vm7, %v3185_v38  ;;  %v3241_v43 = vrot.slane %v3215_v1, %v6511_v55  ;;  %v3245_v17 = vrot.slane %v3215_v1, %v6516_v57  ;;  %v4359_v1 = vld [vmem:[%s8022_s7 + $0x1d0] sm:$0xff] }
 0x4b9   : > { %v3323_v45 = vrot.slane %v3193_v40, %v6511_v55  ;;  %v3327_v47 = vrot.slane %v3193_v40, %v6516_v57  ;;  %v4379_v26 = vld [vmem:[%s8022_s7 + $0x268] sm:$0xff]  ;;  %v4360_v40 = vld [vmem:[%s8022_s7 + $0x1d8] sm:$0xff] }
 0x4ba   : > { %4339 = vmatprep.mubr.msk.f32.mxu1 %vm3087_vm6, %v3245_v17  ;;  %v5332_v38 = vpack.c.bf16 %v4379_v26, %v4378_v62  ;;  %v5383_v62 = vpack.c.bf16 %v3733_v39, %v3732_v51  ;;  %v3734_v26 = vld [vmem:[%s8024_s9 + $0x60] sm:$0xff] }
 0x4bb   : > { %4340 = vmatprep.mubr.msk.f32.mxu0 %vm3087_vm6, %v3327_v47  ;;  %3314 = vmatmul.mubr.f32.vlgmr.msra.gmra.mrb[20].mxu1 %v3241_v43  ;;  %v7661_v25 = vld [vmem:[#allocation3 + $0x10] ss:$8 sm:$0x3]  ;;  %v7663_v61 = vld [vmem:[#allocation3 + $0x14] ss:$8 sm:$0x3]  ;;  %v5305_v43 = vpack.c.bf16 %v4360_v40, %v4359_v1 }
 0x4bc   : > { %3396 = vmatmul.mubr.f32.vlgmr.msra.gmra.mrb[22].mxu0 %v3323_v45  ;;  %5279 = vmatpush1.bf16.msra.mxu1 %v5278_v41  ;;  %v3432_v32 = vrot.slane %v7661_v25, %v6516_v57  ;;  %v3538_v2 = vrot.slane %v7663_v61, %v6516_v57  ;;  %v4380_v41 = vld [vmem:[%s8022_s7 + $0x270] sm:$0xff]  ;;  %v4383_v45 = vld [vmem:[%s8022_s7 + $0x280] sm:$0xff]  ;;  %v4384_v47 = vld [vmem:[%s8022_s7 + $0x288] sm:$0xff]  ;;  %v3428_v48 = vrot.slane %v7661_v25, %v6511_v55 }
 0x4bd   : > { %5309 = vmatpush1.bf16.msra.mxu0 %v5308_v34  ;;  %5280 = vmatprep.subr.bf16.mxu1 %v5624_v4  ;;  %v4381_v34 = vld [vmem:[%s8022_s7 + $0x278] sm:$0xff]  ;;  %v5338_v50 = vpack.c.bf16 %v4384_v47, %v4383_v45  ;;  %v3534_v60 = vrot.slane %v7663_v61, %v6511_v55  ;;  %v4387_v61 = vld [vmem:[%s8022_s7 + $0x2a0] sm:$0xff]  ;;  %v3736_v1 = vld [vmem:[%s8024_s9 + $0x70] sm:$0xff] }
 0x4be   : > { %5310 = vmatprep.subr.bf16.mxu0 %v5624_v4  ;;  %4361 = vmatprep.mubr.msk.f32.mxu1 %vm3087_vm6, %v3432_v32  ;;  %v5335_v17 = vpack.c.bf16 %v4381_v34, %v4380_v41  ;;  %v4386_v32 = vld [vmem:[%s8022_s7 + $0x298] sm:$0xff] }
 0x4bf   : > { %4382 = vmatprep.mubr.msk.f32.mxu0 %vm3087_vm6, %v3538_v2  ;;  %v3614_v52 = vld [vmem:[#allocation3 + $0x20] ss:$8 sm:$0x3] }
 0x4c0   : > { %5282 = vmatpush1.bf16.msra.mxu1 %v5281_v63  ;;  %v4385_v63 = vld [vmem:[%s8022_s7 + $0x290] sm:$0xff]  ;;  %v3644_v2 = vrot.slane %v3614_v52, %v6516_v57  ;;  %v3640_v21 = vrot.slane %v3614_v52, %v6511_v55  ;;  %v5371_v55 = vpack.c.bf16 %v3725_v0, %v3724_v23 }
 0x4c1   : > { %5312 = vmatpush1.bf16.msra.mxu0 %v5311_v36  ;;  %5283 = vmatprep.subr.bf16.mxu1 %v5624_v4  ;;  %v5341_v25 = vpack.c.bf16 %v4386_v32, %v4385_v63  ;;  %v4388_v36 = vld [vmem:[%s8022_s7 + $0x2a8] sm:$0xff]  ;;  %v4389_v57 = vld [vmem:[%s8022_s7 + $0x2b0] sm:$0xff]  ;;  %v3719_v32 = vld [vmem:[%s8023_s8] sm:$0x1] }
 0x4c2   : > { %5313 = vmatprep.subr.bf16.mxu0 %v5624_v4  ;;  %v5344_v5 = vpack.c.bf16 %v4388_v36, %v4387_v61  ;;  %v5347_v9 = vpack.c.bf16 %v4390_v8, %v4389_v57  ;;  %v3813_v61 = vld [vmem:[%s8026_s11] sm:$0xff]  ;;  %v3814_v36 = vld [vmem:[%s8026_s11 + $0x8] sm:$0xff] }
 0x4c3   : > { %v5389_v57 = vpack.c.bf16 %v3814_v36, %v3813_v61 }
 0x4c4   : > { %5285 = vmatpush1.bf16.msra.mxu1 %v5284_v13  ;;  %v4392_v13 = vld [vmem:[%s8022_s7 + $0x2c8] sm:$0xff] }
 0x4c5   : > { %5315 = vmatpush1.bf16.msra.mxu0 %v5314_v29  ;;  %5286 = vmatprep.subr.bf16.mxu1 %v5624_v4  ;;  %v5350_v29 = vpack.c.bf16 %v4392_v13, %v4391_v11  ;;  %v3816_v11 = vld [vmem:[%s8026_s11 + $0x18] sm:$0xff] }
 0x4c6   : > { %5316 = vmatprep.subr.bf16.mxu0 %v5624_v4 }
 0x4c8   : > { %5288 = vmatpush1.bf16.msra.mxu1 %v5287_v19  ;;  %v4396_v19 = vld [vmem:[%s8022_s7 + $0x2e8] sm:$0xff] }
 0x4c9   : > { %5318 = vmatpush1.bf16.msra.mxu0 %v5317_v3  ;;  %5289 = vmatprep.subr.bf16.mxu1 %v5624_v4  ;;  %v5356_v3 = vpack.c.bf16 %v4396_v19, %v4395_v18  ;;  %v3820_v18 = vld [vmem:[%s8026_s11 + $0x38] sm:$0xff] }
 0x4ca   : > { %5319 = vmatprep.subr.bf16.mxu0 %v5624_v4 }
 0x4cc   : > { %5291 = vmatpush1.bf16.msra.mxu1 %v5290_v16  ;;  %v4400_v16 = vld [vmem:[%s8022_s7 + $0x308] sm:$0xff] }
 0x4cd   : > { %5321 = vmatpush1.bf16.msra.mxu0 %v5320_v20  ;;  %5292 = vmatprep.subr.bf16.mxu1 %v5624_v4  ;;  %v5362_v20 = vpack.c.bf16 %v4400_v16, %v4399_v15 }
 0x4ce   : > { %5322 = vmatprep.subr.bf16.mxu0 %v5624_v4 }
 0x4d0   : > { %5294 = vmatpush1.bf16.msra.mxu1 %v5293_v22  ;;  %v3722_v22 = vld [vmem:[%s8024_s9] sm:$0xff] }
 0x4d1   : > { %5324 = vmatpush1.bf16.msra.mxu0 %v5323_v54  ;;  %5295 = vmatprep.subr.bf16.mxu1 %v5624_v4  ;;  %v3723_v54 = vld [vmem:[%s8024_s9 + $0x8] sm:$0xff] }
 0x4d2   : > { %5325 = vmatprep.subr.bf16.mxu0 %v5624_v4  ;;  %v5368_v27 = vpack.c.bf16 %v3723_v54, %v3722_v22 }
 0x4d4   : > { %5297 = vmatpush1.bf16.msra.mxu1 %v5296_v24  ;;  %v3727_v24 = vld [vmem:[%s8024_s9 + $0x28] sm:$0xff] }
 0x4d5   : > { %5327 = vmatpush1.bf16.msra.mxu0 %v5326_v33  ;;  %5298 = vmatprep.subr.bf16.mxu1 %v5624_v4  ;;  %v5374_v33 = vpack.c.bf16 %v3727_v24, %v3726_v31 }
 0x4d6   : > { %5328 = vmatprep.subr.bf16.mxu0 %v5624_v4 }
 0x4d8   : > { %5300 = vmatpush1.bf16.msra.mxu1 %v5299_v59  ;;  %v3731_v59 = vld [vmem:[%s8024_s9 + $0x48] sm:$0xff] }
 0x4d9   : > { %5330 = vmatpush1.bf16.msra.mxu0 %v5329_v28  ;;  %5301 = vmatprep.subr.bf16.mxu1 %v5624_v4  ;;  %v5380_v28 = vpack.c.bf16 %v3731_v59, %v3730_v6 }
 0x4da   : > { %5331 = vmatprep.subr.bf16.mxu0 %v5624_v4 }
 0x4dc   : > { %5303 = vmatpush1.bf16.msra.mxu1 %v5302_v35  ;;  %v3735_v35 = vld [vmem:[%s8024_s9 + $0x68] sm:$0xff] }
 0x4dd   : > { %5333 = vmatpush1.bf16.msra.mxu0 %v5332_v38  ;;  %5304 = vmatprep.subr.bf16.mxu1 %v5624_v4  ;;  %v5386_v38 = vpack.c.bf16 %v3735_v35, %v3734_v26 }
 0x4de   : > { %5334 = vmatprep.subr.bf16.mxu0 %v5624_v4 }
 0x4e0   : > { %5306 = vmatpush1.bf16.msra.mxu1 %v5305_v43 }
 0x4e1   : > { %5336 = vmatpush1.bf16.msra.mxu0 %v5335_v17  ;;  %5337 = vmatprep.subr.bf16.mxu1 %v5624_v4 }
 0x4e2   : > { %5367 = vmatprep.subr.bf16.mxu0 %v5624_v4 }
 0x4e3   : > { %3501 = vmatmul.mubr.f32.vlgmr.msra.gmra.mrb[22].mxu1 %v3428_v48 }
 0x4e4   : > { %3607 = vmatmul.mubr.f32.vlgmr.msra.gmra.mrb[24].mxu0 %v3534_v60  ;;  %5339 = vmatpush1.bf16.msra.mxu1 %v5338_v50 }
 0x4e5   : > { %4403 = vmatprep.mubr.msk.f32.mxu1 %vm3087_vm6, %v3644_v2  ;;  %5340 = vmatprep.subr.bf16.mxu1 %v5624_v4 }
 0x4e6   : > { %5369 = vmatpush3.bf16.msra.mxu0 %v5368_v27  ;;  %4469 = vmatprep.mubr.msk.f32.mxu0 %vm5625_vm8, %v5623_v7 }
 0x4e7   : > { %5370 = vmatprep.subr.bf16.mxu0 %v5624_v4 }
 0x4e8   : > { %5342 = vmatpush1.bf16.msra.mxu1 %v5341_v25 }
 0x4e9   : > { %5343 = vmatprep.subr.bf16.mxu1 %v5624_v4 }
 0x4ea   : > { %5372 = vmatpush3.bf16.msra.mxu0 %v5371_v55 }
 0x4eb   : > { %5373 = vmatprep.subr.bf16.mxu0 %v5624_v4 }
 0x4ec   : > { %5345 = vmatpush1.bf16.msra.mxu1 %v5344_v5 }
 0x4ed   : > { %5346 = vmatprep.subr.bf16.mxu1 %v5624_v4 }
 0x4ee   : > { %5375 = vmatpush3.bf16.msra.mxu0 %v5374_v33 }
 0x4ef   : > { %5376 = vmatprep.subr.bf16.mxu0 %v5624_v4 }
 0x4f0   : > { %5348 = vmatpush1.bf16.msra.mxu1 %v5347_v9  ;;  %v3815_v9 = vld [vmem:[%s8026_s11 + $0x10] sm:$0xff] }
 0x4f1   : > { %5349 = vmatprep.subr.bf16.mxu1 %v5624_v4  ;;  %v5392_v13 = vpack.c.bf16 %v3816_v11, %v3815_v9 }
 0x4f2   : > { %5378 = vmatpush3.bf16.msra.mxu0 %v5377_v30 }
 0x4f3   : > { %5379 = vmatprep.subr.bf16.mxu0 %v5624_v4 }
 0x4f4   : > { %5351 = vmatpush1.bf16.msra.mxu1 %v5350_v29  ;;  %v3817_v29 = vld [vmem:[%s8026_s11 + $0x20] sm:$0xff] }
 0x4f5   : > { %5352 = vmatprep.subr.bf16.mxu1 %v5624_v4  ;;  %v5395_v42 = vpack.c.bf16 %v3818_v46, %v3817_v29 }
 0x4f6   : > { %5381 = vmatpush3.bf16.msra.mxu0 %v5380_v28 }
 0x4f7   : > { %5382 = vmatprep.subr.bf16.mxu0 %v5624_v4 }
 0x4f8   : > { %5354 = vmatpush1.bf16.msra.mxu1 %v5353_v53  ;;  %v3819_v53 = vld [vmem:[%s8026_s11 + $0x30] sm:$0xff] }
 0x4f9   : > { %5355 = vmatprep.subr.bf16.mxu1 %v5624_v4  ;;  %v5398_v19 = vpack.c.bf16 %v3820_v18, %v3819_v53 }
 0x4fa   : > { %5384 = vmatpush3.bf16.msra.mxu0 %v5383_v62 }
 0x4fb   : > { %5385 = vmatprep.subr.bf16.mxu0 %v5624_v4 }
 0x4fc   : > { %5357 = vmatpush1.bf16.msra.mxu1 %v5356_v3  ;;  %v3821_v3 = vld [vmem:[%s8026_s11 + $0x40] sm:$0xff] }
 0x4fd   : > { %5358 = vmatprep.subr.bf16.mxu1 %v5624_v4  ;;  %v5401_v14 = vpack.c.bf16 %v3822_v12, %v3821_v3 }
 0x4fe   : > { %5387 = vmatpush3.bf16.msra.mxu0 %v5386_v38 }
 0x4ff   : > { %4467 = vmatprep.subr.mxu0 %v5623_v7 }
 0x500   : > { %5360 = vmatpush1.bf16.msra.mxu1 %v5359_v56  ;;  %v3823_v56 = vld [vmem:[%s8026_s11 + $0x50] sm:$0xf] }
 0x501   : > { %5361 = vmatprep.subr.bf16.mxu1 %v5624_v4 }
 0x502   : > { %4468 = vmatpush3.msra.mxu0 %v3736_v1 }
 0x503   : > { %5388 = vmatprep.subr.bf16.mxu0 %v5624_v4 }
 0x504   : > { %5363 = vmatpush1.bf16.msra.mxu1 %v5362_v20 }
 0x505   : > { %5364 = vmatprep.subr.bf16.mxu1 %v5624_v4 }
 0x508   : > { %5366 = vmatpush1.bf16.msra.mxu1 %v5365_v44 }
 0x50b   : > { %3713 = vmatmul.mubr.f32.vlgmr.msra.gmra.mrb[24].mxu1 %v3640_v21 }
 0x58e   : > { %v3315_v40 = vpop.f32.mrb[20].mxu1 }
 0x58f   : > { %v3397_v41 = vpop.f32.mrb[22].mxu0  ;;  %v3317_v43 = vpop.f32.mrb[21].mxu1 }
 0x590   : > { %v3398_v34 = vadd.f32 %v3397_v41, %v3315_v40  ;;  %v3399_v17 = vpop.f32.mrb[23].mxu0 }
 0x5b6   : > { %v3502_v45 = vpop.f32.mrb[22].mxu1 }
 0x5b7   : > { %v3608_v47 = vpop.f32.mrb[24].mxu0  ;;  %v3506_v52 = vadd.f32 %v3502_v45, %v3398_v34  ;;  %v3504_v50 = vpop.f32.mrb[23].mxu1 }
 0x5b8   : > { %v3610_v48 = vpop.f32.mrb[25].mxu0 }
 0x5b9   : > { %v3612_v60 = vadd.f32 %v3608_v47, %v3506_v52 }
 0x5de   : > { %v3714_v63 = vpop.f32.mrb[24].mxu1 }
 0x5df   : > { %v3718_v2 = vadd.f32 %v3714_v63, %v3612_v60  ;;  %v3716_v25 = vpop.f32.mrb[25].mxu1 }
 0x5e1   : > { %v3720_v5 = vadd.f32 %v3719_v32, %v3718_v2 }
 0x5e3   : > { %v3721_v8 = vmax.f32 %v3720_v5, 0.0 }
 0x5e5   : > { %4470 = vmatmul.mubr.msk.f32.vlgmr.msra.gmra.mrb[26].mxu0 %vm3738_vm9, %v3721_v8 }
 0x5e6   : > { %5390 = vmatpush3.bf16.msra.mxu0 %v5389_v57  ;;  %4494 = vmatprep.mubr.msk.f32.mxu0 %vm5625_vm8, %v5623_v7 }
 0x5e7   : > { %5391 = vmatprep.subr.bf16.mxu0 %v5624_v4 }
 0x5ea   : > { %5393 = vmatpush3.bf16.msra.mxu0 %v5392_v13 }
 0x5eb   : > { %5394 = vmatprep.subr.bf16.mxu0 %v5624_v4 }
 0x5ee   : > { %5396 = vmatpush3.bf16.msra.mxu0 %v5395_v42 }
 0x5ef   : > { %5397 = vmatprep.subr.bf16.mxu0 %v5624_v4 }
 0x5f2   : > { %5399 = vmatpush3.bf16.msra.mxu0 %v5398_v19 }
 0x5f3   : > { %5400 = vmatprep.subr.bf16.mxu0 %v5624_v4  ;;  %v3737_v4 = vld [vmem:[%s8025_s10] sm:$0x1] }
 0x5f6   : > { %5402 = vmatpush3.bf16.msra.mxu0 %v5401_v14 }
 0x5f7   : > { %4492 = vmatprep.subr.mxu0 %v5623_v7  ;;  %v3824_v7 = vld [vmem:[%s8027_s12] sm:$0x1] }
 0x5fa   : > { %4493 = vmatpush3.msk.msra.mxu0 %vm2140_vm4, %v3823_v56 }
 0x6b8   : > { %v3808_v15 = vpop.f32.mrb[26].mxu0 }
 0x6b9   : > { %v3809_v16 = vadd.f32 %v3808_v15, %v3737_v4  ;;  %v4471_v20 = vpop.f32.mrb[27].mxu0 }
 0x6bb   : > { %v3812_v58 = vmax.f32 %v3809_v16, 0.0 }
 0x6bd   : > { %4495 = vmatmul.mubr.msk.f32.vlgmr.msra.gmra.mrb[28].mxu0 %vm3825_vm10, %v3812_v58 }
 0x790   : > { %v3898_v10 = vpop.f32.mrb[28].mxu0 }
 0x791   : > { %v3899_v44 = vadd.f32 %v3898_v10, %v3824_v7  ;;  %v4496_v21 = vpop.f32.mrb[29].mxu0 }
 0x793   : > { %3903 = vst.msk [vmem:[%s432_s19] sm:$0x1] %vm3902_vm11, %v3899_v44 }
 0x794   : > { %5572 = shalt.err (!%p5569_p3)
}
 0x795   : > { %s5573_s15 = scalar_lea.hbm %s7973_s17, 16  ;;  %s5577_s19 = scalar_lea.hbm %s8028_s13, 32 }
 0x796   : > { %p5574_p4 = scmp.ne.s32.totalorder %s7973_s17, %s5573_s15  ;;  %p5578_p9 = scmp.lt.u32.totalorder %s7973_s17, %s8028_s13 }
 0x797   : > { %p5579_p10 = scmp.lt.u32.totalorder %s5577_s19, %s5573_s15  ;;  %p5581_p12 = scmp.lt.u32.totalorder %s5573_s15, %s7973_s17 }
 0x798   : > { %p5575_p7 = pnand %p5574_p4, %p5735_p5 }
 0x799   : > { %p5580_p11 = por %p5579_p10, %p5578_p9 }
 0x79a   : > { %p5576_p8 = pneg %p5575_p7 }
 0x79b   : > { %p5582_p13 = por %p5581_p12, %p5580_p11 }
 0x79d   : > { %p5583_p0 = pnand %p5582_p13, %p5576_p8 }
 0x79f   : > { %5586 = shalt.err (!%p5583_p0)
}
 0x7a0   : > { %5515 = dma.vmem_to_hbm [thread:$0]  (%p5735_p5), %s7975_s23, 16, %s7973_s17, %s3905_s20  }
 0x7a1 PF: > { %p5521_p1 = scmp.ge.s32.totalorder %s5621_s28, 2  ;;  %s3929_s29 = sand.u32 1, %s5609_s25  }
 0x7a2   : > { %s3930_s30 = scalar_lea.sflag [#allocation5], %s3929_s29 }
 0x7a3   : > { %p5518_p2 = pnand %p5521_p1, %p5739_p6 }
 0x7a5   : > { %5604 = dma.done.wait (!%p5518_p2), %s3930_s30, 16  }
 0x7a6   : > { %5606 = vsyncadd (!%p5518_p2), %s3930_s30, 4294967280  ;;  %s8040_s28 = sld [smem:[#allocation8_spill]]  ;;  %s8041_s16 = sld [smem:[#allocation7_spill]] }
 0x7a7   : > { %s8042_s27 = sld [smem:[#allocation9_spill]]  ;;  %s8043_s25 = smov %s5613_s26 }
 0x7ac   : > { %p23_p3 = scmp.ge.s32.totalorder %s8040_s28, 4   ;;  %s8044_s26 = smov %s8041_s16 }
 0x7ae   :  { %25 = sbr.rel (!%p23_p3) target bundleno = 3 (0x3), region = 123 }
 0x7b5   :  { %3934 = vsyncpa [#allocation5], 1 }
 0x7b6   :  { %3936 = vsyncpa [#allocation5 + $0x1], 1 }

</bundles_post_ra>
